<compile_context>
chip_gen: v7x
topology: tpu7x:2x2x1
jax: 0.10.0
libtpu: 0.0.40
codegen_flags: <defaults>
</compile_context>

<pallas_src>
import functools
import math

import jax
import jax.numpy as jnp
import numpy as np
from jax.experimental import pallas as pl
from jax.experimental.pallas import tpu as pltpu


def _layernorm(x, w, b, eps=1e-5):
    mu = jnp.mean(x, axis=-1, keepdims=True)
    var = jnp.mean((x - mu) ** 2, axis=-1, keepdims=True)
    return (x - mu) * jax.lax.rsqrt(var + eps) * w + b


def cross_attention_kernel(q_ref, k_ref, v_ref,
                           lnq_w_ref, lnq_b_ref, lnk_w_ref, lnk_b_ref,
                           wq_t_ref, wk_t_ref, wv_t_ref, wo_t_ref,
                           lno_w_ref, lno_b_ref,
                           o_ref, *,
                           block_b, n_q, n_k, num_heads,
                           dim_split_q, dim_split_v, inv_temperature, mxu_bf16):
    # Per-dot precision: exact f32 parity when mxu_bf16=False, default otherwise.
    prec = None if mxu_bf16 else jax.lax.Precision.HIGHEST

    def project(x, w_t):
        # y = x @ W^T, with W^T pre-transposed on the host (no in-kernel .T).
        # Optional bf16 operands (single-pass MXU) with f32 accumulation.
        if mxu_bf16:
            x = x.astype(jnp.bfloat16)
            w_t = w_t.astype(jnp.bfloat16)
        return jnp.dot(x, w_t, preferred_element_type=jnp.float32, precision=prec)

    # ---- LayerNorm + projections on flattened (block_b*seq, dim) rows --------
    q = _layernorm(q_ref[...], lnq_w_ref[...], lnq_b_ref[...])   # (Bb*Nq, dim_q)
    k = _layernorm(k_ref[...], lnk_w_ref[...], lnk_b_ref[...])   # (Bb*Nk, dim_k)
    q = project(q, wq_t_ref[...]) * inv_temperature  # fold 1/temperature into Q
    k = project(k, wk_t_ref[...])                                # (Bb*Nk, dim_q)
    v = project(v_ref[...], wv_t_ref[...])                       # (Bb*Nk, dim_o)

    # ---- head split: (Bb*N, H*d) -> (H*Bb, N, d), head-major batch ------------
    # Pure static lane slices + leading-dim concat (no sublane/lane transposes);
    # this matches torch.cat(x.split(d, 2), 0) ordering exactly. n_q/n_k being
    # multiples of 8 keeps the (Bb*n, d) -> (Bb, n, d) reshapes layout-preserving.
    def split_heads(x, n, d):
        return jnp.concatenate(
            [x[:, h * d:(h + 1) * d].reshape(block_b, n, d)
             for h in range(num_heads)], axis=0)

    qh = split_heads(q, n_q, dim_split_q)   # (H*Bb, Nq, dq)
    kh = split_heads(k, n_k, dim_split_q)   # (H*Bb, Nk, dq)
    vh = split_heads(v, n_k, dim_split_v)   # (H*Bb, Nk, dv)

    # ---- fused multi-head attention: single batched einsum pair + one softmax --
    s = jnp.einsum("gqd,gkd->gqk", qh, kh,
                   preferred_element_type=jnp.float32, precision=prec)
    s = jnp.clip(s, -10000.0, 10000.0)            # clip BEFORE softmax (torch parity)
    s = s - jnp.max(s, axis=-1, keepdims=True)
    p = jnp.exp(s)
    p = p / jnp.sum(p, axis=-1, keepdims=True)    # exact divide; p stays f32
    oh = jnp.einsum("gqk,gkd->gqd", p, vh,
                    preferred_element_type=jnp.float32, precision=prec)

    # ---- merge heads back to the channel-concatenated layout (in vregs) -------
    out_cat = jnp.concatenate(
        [oh[h * block_b:(h + 1) * block_b].reshape(block_b * n_q, dim_split_v)
         for h in range(num_heads)], axis=-1)     # (Bb*Nq, dim_o)

    # ---- post-LN + residual GELU(fc_o(.)), single bulk dense store -------------
    out_ln = _layernorm(out_cat, lno_w_ref[...], lno_b_ref[...])
    proj = project(out_ln, wo_t_ref[...])
    gelu = 0.5 * proj * (1.0 + jax.lax.erf(proj * (1.0 / math.sqrt(2.0))))
    o_ref[...] = (out_ln + gelu).astype(o_ref.dtype)


def prepare_params(params):
    """One-time host-side prep: pre-transpose nn.Linear weights (y = x @ W^T is
    computed as x @ W_T inside the kernel) and keep LayerNorm params as (1, dim)
    rows. Executed once; keeps the transposes off the per-call critical path."""
    as_row = lambda a: jnp.asarray(a, jnp.float32).reshape(1, -1)
    return {
        "lnq_w": as_row(params["lnq_w"]), "lnq_b": as_row(params["lnq_b"]),
        "lnk_w": as_row(params["lnk_w"]), "lnk_b": as_row(params["lnk_b"]),
        "lno_w": as_row(params["lno_w"]), "lno_b": as_row(params["lno_b"]),
        "wq_t": jnp.asarray(params["wq"], jnp.float32).T,
        "wk_t": jnp.asarray(params["wk"], jnp.float32).T,
        "wv_t": jnp.asarray(params["wv"], jnp.float32).T,
        "wo_t": jnp.asarray(params["wo"], jnp.float32).T,
    }


@functools.partial(
    jax.jit, static_argnames=("num_heads", "temperature", "block_b", "mxu_bf16"))
def cross_attention(Q, K, V, prepared, *, num_heads, temperature,
                    block_b=None, mxu_bf16=True):
    B, n_q, dim_q = Q.shape
    _, n_k, dim_k = K.shape
    _, _, dim_v = V.shape
    dim_o = prepared["wv_t"].shape[1]
    dim_split_q = dim_q // num_heads
    dim_split_v = dim_o // num_heads

    if block_b is None:
        # Expose >=2 grid steps (so the "parallel" axis can feed both v7x
        # TensorCores) only when a half-batch block still has enough rows to
        # amortize the ~0.35us per-step pipeline overhead; otherwise one step.
        if B % 2 == 0 and (B // 2) * n_q >= 256:
            block_b = B // 2
        else:
            block_b = B
    assert B % block_b == 0, "block_b must divide the batch size"
    n_blocks = B // block_b

    # Flatten batch*seq at the pallas_call boundary (metadata reshape under jit)
    # so the kernel sees large row-dense 2-D tiles.
    Q2 = Q.reshape(B * n_q, dim_q)
    K2 = K.reshape(B * n_k, dim_k)
    V2 = V.reshape(B * n_k, dim_v)

    weights = [prepared["lnq_w"], prepared["lnq_b"],
               prepared["lnk_w"], prepared["lnk_b"],
               prepared["wq_t"], prepared["wk_t"],
               prepared["wv_t"], prepared["wo_t"],
               prepared["lno_w"], prepared["lno_b"]]

    kernel = functools.partial(
        cross_attention_kernel,
        block_b=block_b, n_q=n_q, n_k=n_k, num_heads=num_heads,
        dim_split_q=dim_split_q, dim_split_v=dim_split_v,
        inv_temperature=1.0 / temperature, mxu_bf16=mxu_bf16)

    in_specs = [
        pl.BlockSpec((block_b * n_q, dim_q), lambda b: (b, 0)),
        pl.BlockSpec((block_b * n_k, dim_k), lambda b: (b, 0)),
        pl.BlockSpec((block_b * n_k, dim_v), lambda b: (b, 0)),
    ] + [pl.BlockSpec(w.shape, lambda b: (0, 0)) for w in weights]

    # VMEM budget derived from the actual block sizes (+25% slack), clamped to
    # <=48 MiB so it stays safe under v7x's 64 MiB VMEM while still raising the
    # 16/32 MiB scoped default when block_b is grown on v5e/v6e (128 MiB parts).
    f32 = 4
    io_bytes = 2 * f32 * (block_b * n_q * dim_q
                          + block_b * n_k * (dim_k + dim_v)
                          + block_b * n_q * dim_o)          # double-buffered blocks
    w_bytes = f32 * sum(int(np.prod(w.shape)) for w in weights)
    inter_bytes = f32 * (4 * block_b * n_q * max(dim_q, dim_o)
                         + 4 * block_b * n_k * max(dim_q, dim_o)
                         + 2 * num_heads * block_b * n_q * n_k)
    vmem_limit = int(min(max(1.25 * (io_bytes + w_bytes + inter_bytes),
                             16 * 1024 * 1024), 48 * 1024 * 1024))

    out2 = pl.pallas_call(
        kernel,
        out_shape=jax.ShapeDtypeStruct((B * n_q, dim_o), Q.dtype),
        grid=(n_blocks,),
        in_specs=in_specs,
        out_specs=pl.BlockSpec((block_b * n_q, dim_o), lambda b: (b, 0)),
        compiler_params=pltpu.CompilerParams(
            dimension_semantics=("parallel",),
            vmem_limit_bytes=vmem_limit),
    )(Q2, K2, V2, *weights)

    return out2.reshape(B, n_q, dim_o)


def cross_attention_reference(Q, K, V, params, *, num_heads, temperature):
    """Pure-JAX reference of the PyTorch forward (mask=None, eval mode), using
    Precision.HIGHEST matmuls so it is a genuine f32 reference."""
    hp = jax.lax.Precision.HIGHEST

    def ln(x, w, b, eps=1e-5):
        mu = x.mean(-1, keepdims=True)
        var = ((x - mu) ** 2).mean(-1, keepdims=True)
        return (x - mu) / jnp.sqrt(var + eps) * w + b

    q = jnp.einsum("bnc,oc->bno", ln(Q, params["lnq_w"], params["lnq_b"]),
                   params["wq"], precision=hp)
    k = jnp.einsum("bnc,oc->bno", ln(K, params["lnk_w"], params["lnk_b"]),
                   params["wk"], precision=hp)
    v = jnp.einsum("bnc,oc->bno", V, params["wv"], precision=hp)
    H = num_heads
    qh = jnp.concatenate(jnp.split(q, H, axis=2), axis=0)
    kh = jnp.concatenate(jnp.split(k, H, axis=2), axis=0)
    vh = jnp.concatenate(jnp.split(v, H, axis=2), axis=0)
    L = jnp.einsum("bqd,bkd->bqk", qh, kh, precision=hp) / temperature
    L = jnp.clip(L, -10000.0, 10000.0)
    A = jax.nn.softmax(L, axis=2)
    O = jnp.einsum("bqk,bkd->bqd", A, vh, precision=hp)
    O = jnp.concatenate(jnp.split(O, H, axis=0), axis=2)
    O = ln(O, params["lno_w"], params["lno_b"])
    proj = jnp.einsum("bnc,oc->bno", O, params["wo"], precision=hp)
    gelu = 0.5 * proj * (1.0 + jax.lax.erf(proj / math.sqrt(2.0)))
    return O + gelu


def init_params(key, dim_q, dim_k, dim_v, dim_o):
    ks = jax.random.split(key, 10)
    scale = 0.1
    return {
        # nn.Linear weights in PyTorch (out_features, in_features) layout.
        "wq": scale * jax.random.normal(ks[0], (dim_q, dim_q), jnp.float32),
        "wk": scale * jax.random.normal(ks[1], (dim_q, dim_k), jnp.float32),
        "wv": scale * jax.random.normal(ks[2], (dim_o, dim_v), jnp.float32),
        "wo": scale * jax.random.normal(ks[3], (dim_o, dim_o), jnp.float32),
        # LayerNorm params (perturbed from the PyTorch default init so the
        # scale/shift paths are actually exercised by the check).
        "lnq_w": 1.0 + 0.1 * jax.random.normal(ks[4], (dim_q,), jnp.float32),
        "lnq_b": 0.1 * jax.random.normal(ks[5], (dim_q,), jnp.float32),
        "lnk_w": 1.0 + 0.1 * jax.random.normal(ks[6], (dim_k,), jnp.float32),
        "lnk_b": 0.1 * jax.random.normal(ks[7], (dim_k,), jnp.float32),
        "lno_w": 1.0 + 0.1 * jax.random.normal(ks[8], (dim_o,), jnp.float32),
        "lno_b": 0.1 * jax.random.normal(ks[9], (dim_o,), jnp.float32),
    }


if __name__ == "__main__":
    B, Nq, Nk = 2, 16, 8
    dim_q, dim_k, dim_v, dim_o = 32, 32, 24, 32
    num_heads = 4
    temperature = math.sqrt(dim_o)

    root = jax.random.PRNGKey(0)
    kq, kk, kv, kp = jax.random.split(root, 4)
    Q = jax.random.normal(kq, (B, Nq, dim_q), jnp.float32)
    K = jax.random.normal(kk, (B, Nk, dim_k), jnp.float32)
    V = jax.random.normal(kv, (B, Nk, dim_v), jnp.float32)
    params = init_params(kp, dim_q, dim_k, dim_v, dim_o)
    prepared = prepare_params(params)   # one-time weight transpose / reshape

    ref = jax.block_until_ready(cross_attention_reference(
        Q, K, V, params, num_heads=num_heads, temperature=temperature))

    # Exact-parity path: per-dot f32 (Precision.HIGHEST) matmuls inside the kernel.
    out_f32 = jax.block_until_ready(cross_attention(
        Q, K, V, prepared, num_heads=num_heads, temperature=temperature,
        mxu_bf16=False))
    np.testing.assert_allclose(np.asarray(out_f32), np.asarray(ref),
                               rtol=1e-4, atol=1e-4)

    # Default performance path: bf16-in / f32-acc projections on the MXU
    # (LN/softmax/GELU and the softmax probabilities stay f32). The bf16 operand
    # rounding (~2^-9) is amplified by the output LayerNorm at these small value
    # scales, hence the looser tolerance for this path.
    out_bf16 = jax.block_until_ready(cross_attention(
        Q, K, V, prepared, num_heads=num_heads, temperature=temperature))
    np.testing.assert_allclose(np.asarray(out_bf16), np.asarray(ref),
                               rtol=5e-2, atol=5e-2)

    print("KERNEL_OK")
</pallas_src>

<mosaic_0001>
module attributes {stable_mosaic.version = 11 : i64} {
  func.func @cross_attention_kernel(%arg0: i32, %arg1: memref<32x32xf32, #tpu.memory_space<vmem>>, %arg2: memref<16x32xf32, #tpu.memory_space<vmem>>, %arg3: memref<16x24xf32, #tpu.memory_space<vmem>>, %arg4: memref<1x32xf32, #tpu.memory_space<vmem>>, %arg5: memref<1x32xf32, #tpu.memory_space<vmem>>, %arg6: memref<1x32xf32, #tpu.memory_space<vmem>>, %arg7: memref<1x32xf32, #tpu.memory_space<vmem>>, %arg8: memref<32x32xf32, #tpu.memory_space<vmem>>, %arg9: memref<32x32xf32, #tpu.memory_space<vmem>>, %arg10: memref<24x32xf32, #tpu.memory_space<vmem>>, %arg11: memref<32x32xf32, #tpu.memory_space<vmem>>, %arg12: memref<1x32xf32, #tpu.memory_space<vmem>>, %arg13: memref<1x32xf32, #tpu.memory_space<vmem>>, %arg14: memref<32x32xf32, #tpu.memory_space<vmem>>) attributes {dimension_semantics = [#tpu.dimension_semantics<parallel>], iteration_bounds = array<i64: 1>, scalar_prefetch = 0 : i64, scratch_operands = 0 : i64, tpu.core_type = #tpu.core_type<tc>, window_params = [{transform_indices = @transform_0, window_bounds = array<i64: 32, 32>}, {transform_indices = @transform_1, window_bounds = array<i64: 16, 32>}, {transform_indices = @transform_2, window_bounds = array<i64: 16, 24>}, {pipeline_mode = #tpu.pipeline_mode<synchronous>, transform_indices = @transform_3, window_bounds = array<i64: 1, 32>}, {pipeline_mode = #tpu.pipeline_mode<synchronous>, transform_indices = @transform_4, window_bounds = array<i64: 1, 32>}, {pipeline_mode = #tpu.pipeline_mode<synchronous>, transform_indices = @transform_5, window_bounds = array<i64: 1, 32>}, {pipeline_mode = #tpu.pipeline_mode<synchronous>, transform_indices = @transform_6, window_bounds = array<i64: 1, 32>}, {pipeline_mode = #tpu.pipeline_mode<synchronous>, transform_indices = @transform_7, window_bounds = array<i64: 32, 32>}, {pipeline_mode = #tpu.pipeline_mode<synchronous>, transform_indices = @transform_8, window_bounds = array<i64: 32, 32>}, {pipeline_mode = #tpu.pipeline_mode<synchronous>, transform_indices = @transform_9, window_bounds = array<i64: 24, 32>}, {pipeline_mode = #tpu.pipeline_mode<synchronous>, transform_indices = @transform_10, window_bounds = array<i64: 32, 32>}, {pipeline_mode = #tpu.pipeline_mode<synchronous>, transform_indices = @transform_11, window_bounds = array<i64: 1, 32>}, {pipeline_mode = #tpu.pipeline_mode<synchronous>, transform_indices = @transform_12, window_bounds = array<i64: 1, 32>}, {transform_indices = @transform_13, window_bounds = array<i64: 32, 32>}]} {
    %c0 = arith.constant 0 : index
    %c0_0 = arith.constant 0 : index
    %0 = vector.load %arg1[%c0, %c0_0] : memref<32x32xf32, #tpu.memory_space<vmem>>, vector<32x32xf32>
    %c0_1 = arith.constant 0 : index
    %c0_2 = arith.constant 0 : index
    %1 = vector.load %arg4[%c0_1, %c0_2] : memref<1x32xf32, #tpu.memory_space<vmem>>, vector<1x32xf32>
    %c0_3 = arith.constant 0 : index
    %c0_4 = arith.constant 0 : index
    %2 = vector.load %arg5[%c0_3, %c0_4] : memref<1x32xf32, #tpu.memory_space<vmem>>, vector<1x32xf32>
    %cst = arith.constant dense<0.000000e+00> : vector<32xf32>
    %3 = vector.multi_reduction <add>, %0, %cst [1] : vector<32x32xf32> to vector<32xf32>
    %4 = vector.shape_cast %3 : vector<32xf32> to vector<32x1xf32>
    %cst_5 = arith.constant 3.200000e+01 : f32
    %5 = vector.broadcast %cst_5 : f32 to vector<32x1xf32>
    %6 = arith.divf %4, %5 : vector<32x1xf32>
    %7 = vector.broadcast %6 : vector<32x1xf32> to vector<32x32xf32>
    %8 = arith.subf %0, %7 : vector<32x32xf32>
    %9 = arith.mulf %8, %8 : vector<32x32xf32>
    %cst_6 = arith.constant dense<0.000000e+00> : vector<32xf32>
    %10 = vector.multi_reduction <add>, %9, %cst_6 [1] : vector<32x32xf32> to vector<32xf32>
    %11 = vector.shape_cast %10 : vector<32xf32> to vector<32x1xf32>
    %cst_7 = arith.constant 3.200000e+01 : f32
    %12 = vector.broadcast %cst_7 : f32 to vector<32x1xf32>
    %13 = arith.divf %11, %12 : vector<32x1xf32>
    %14 = vector.broadcast %6 : vector<32x1xf32> to vector<32x32xf32>
    %15 = arith.subf %0, %14 : vector<32x32xf32>
    %cst_8 = arith.constant 9.99999974E-6 : f32
    %16 = vector.broadcast %cst_8 : f32 to vector<32x1xf32>
    %17 = arith.addf %13, %16 : vector<32x1xf32>
    %18 = math.rsqrt %17 : vector<32x1xf32>
    %19 = vector.broadcast %18 : vector<32x1xf32> to vector<32x32xf32>
    %20 = arith.mulf %15, %19 : vector<32x32xf32>
    %21 = vector.broadcast %1 : vector<1x32xf32> to vector<32x32xf32>
    %22 = arith.mulf %20, %21 : vector<32x32xf32>
    %23 = vector.broadcast %2 : vector<1x32xf32> to vector<32x32xf32>
    %24 = arith.addf %22, %23 : vector<32x32xf32>
    %c0_9 = arith.constant 0 : index
    %c0_10 = arith.constant 0 : index
    %25 = vector.load %arg2[%c0_9, %c0_10] : memref<16x32xf32, #tpu.memory_space<vmem>>, vector<16x32xf32>
    %c0_11 = arith.constant 0 : index
    %c0_12 = arith.constant 0 : index
    %26 = vector.load %arg6[%c0_11, %c0_12] : memref<1x32xf32, #tpu.memory_space<vmem>>, vector<1x32xf32>
    %c0_13 = arith.constant 0 : index
    %c0_14 = arith.constant 0 : index
    %27 = vector.load %arg7[%c0_13, %c0_14] : memref<1x32xf32, #tpu.memory_space<vmem>>, vector<1x32xf32>
    %cst_15 = arith.constant dense<0.000000e+00> : vector<16xf32>
    %28 = vector.multi_reduction <add>, %25, %cst_15 [1] : vector<16x32xf32> to vector<16xf32>
    %29 = vector.shape_cast %28 : vector<16xf32> to vector<16x1xf32>
    %cst_16 = arith.constant 3.200000e+01 : f32
    %30 = vector.broadcast %cst_16 : f32 to vector<16x1xf32>
    %31 = arith.divf %29, %30 : vector<16x1xf32>
    %32 = vector.broadcast %31 : vector<16x1xf32> to vector<16x32xf32>
    %33 = arith.subf %25, %32 : vector<16x32xf32>
    %34 = arith.mulf %33, %33 : vector<16x32xf32>
    %cst_17 = arith.constant dense<0.000000e+00> : vector<16xf32>
    %35 = vector.multi_reduction <add>, %34, %cst_17 [1] : vector<16x32xf32> to vector<16xf32>
    %36 = vector.shape_cast %35 : vector<16xf32> to vector<16x1xf32>
    %cst_18 = arith.constant 3.200000e+01 : f32
    %37 = vector.broadcast %cst_18 : f32 to vector<16x1xf32>
    %38 = arith.divf %36, %37 : vector<16x1xf32>
    %39 = vector.broadcast %31 : vector<16x1xf32> to vector<16x32xf32>
    %40 = arith.subf %25, %39 : vector<16x32xf32>
    %cst_19 = arith.constant 9.99999974E-6 : f32
    %41 = vector.broadcast %cst_19 : f32 to vector<16x1xf32>
    %42 = arith.addf %38, %41 : vector<16x1xf32>
    %43 = math.rsqrt %42 : vector<16x1xf32>
    %44 = vector.broadcast %43 : vector<16x1xf32> to vector<16x32xf32>
    %45 = arith.mulf %40, %44 : vector<16x32xf32>
    %46 = vector.broadcast %26 : vector<1x32xf32> to vector<16x32xf32>
    %47 = arith.mulf %45, %46 : vector<16x32xf32>
    %48 = vector.broadcast %27 : vector<1x32xf32> to vector<16x32xf32>
    %49 = arith.addf %47, %48 : vector<16x32xf32>
    %c0_20 = arith.constant 0 : index
    %c0_21 = arith.constant 0 : index
    %50 = vector.load %arg8[%c0_20, %c0_21] : memref<32x32xf32, #tpu.memory_space<vmem>>, vector<32x32xf32>
    %cst_22 = arith.constant dense<0.000000e+00> : vector<32x32xf32>
    %51 = tpu.matmul %24, %50, %cst_22 {dimension_numbers = #tpu.dot_dimension_numbers<[1], [0], [0], [1], [0, 0, 1, 1], [], []>, precision = #tpu.contract_precision<fp32>} : vector<32x32xf32>, vector<32x32xf32>, vector<32x32xf32> -> vector<32x32xf32>
    %cst_23 = arith.constant 0.176776692 : f32
    %52 = vector.broadcast %cst_23 : f32 to vector<32x32xf32>
    %53 = arith.mulf %51, %52 : vector<32x32xf32>
    %c0_24 = arith.constant 0 : index
    %c0_25 = arith.constant 0 : index
    %54 = vector.load %arg9[%c0_24, %c0_25] : memref<32x32xf32, #tpu.memory_space<vmem>>, vector<32x32xf32>
    %cst_26 = arith.constant dense<0.000000e+00> : vector<16x32xf32>
    %55 = tpu.matmul %49, %54, %cst_26 {dimension_numbers = #tpu.dot_dimension_numbers<[1], [0], [0], [1], [0, 0, 1, 1], [], []>, precision = #tpu.contract_precision<fp32>} : vector<16x32xf32>, vector<32x32xf32>, vector<16x32xf32> -> vector<16x32xf32>
    %c0_27 = arith.constant 0 : index
    %c0_28 = arith.constant 0 : index
    %56 = vector.load %arg3[%c0_27, %c0_28] : memref<16x24xf32, #tpu.memory_space<vmem>>, vector<16x24xf32>
    %c0_29 = arith.constant 0 : index
    %c0_30 = arith.constant 0 : index
    %57 = vector.load %arg10[%c0_29, %c0_30] : memref<24x32xf32, #tpu.memory_space<vmem>>, vector<24x32xf32>
    %cst_31 = arith.constant dense<0.000000e+00> : vector<16x32xf32>
    %58 = tpu.matmul %56, %57, %cst_31 {dimension_numbers = #tpu.dot_dimension_numbers<[1], [0], [0], [1], [0, 0, 1, 1], [], []>, precision = #tpu.contract_precision<fp32>} : vector<16x24xf32>, vector<24x32xf32>, vector<16x32xf32> -> vector<16x32xf32>
    %59 = vector.extract_strided_slice %53 {offsets = [0, 0], sizes = [32, 8], strides = [1, 1]} : vector<32x32xf32> to vector<32x8xf32>
    %60 = vector.shape_cast %59 : vector<32x8xf32> to vector<2x16x8xf32>
    %61 = vector.extract_strided_slice %53 {offsets = [0, 8], sizes = [32, 8], strides = [1, 1]} : vector<32x32xf32> to vector<32x8xf32>
    %62 = vector.shape_cast %61 : vector<32x8xf32> to vector<2x16x8xf32>
    %63 = vector.extract_strided_slice %53 {offsets = [0, 16], sizes = [32, 8], strides = [1, 1]} : vector<32x32xf32> to vector<32x8xf32>
    %64 = vector.shape_cast %63 : vector<32x8xf32> to vector<2x16x8xf32>
    %65 = vector.extract_strided_slice %53 {offsets = [0, 24], sizes = [32, 8], strides = [1, 1]} : vector<32x32xf32> to vector<32x8xf32>
    %66 = vector.shape_cast %65 : vector<32x8xf32> to vector<2x16x8xf32>
    %67 = tpu.concatenate %60, %62, %64, %66 in 0 : vector<2x16x8xf32>, vector<2x16x8xf32>, vector<2x16x8xf32>, vector<2x16x8xf32> -> vector<8x16x8xf32>
    %68 = vector.extract_strided_slice %55 {offsets = [0, 0], sizes = [16, 8], strides = [1, 1]} : vector<16x32xf32> to vector<16x8xf32>
    %69 = vector.shape_cast %68 : vector<16x8xf32> to vector<2x8x8xf32>
    %70 = vector.extract_strided_slice %55 {offsets = [0, 8], sizes = [16, 8], strides = [1, 1]} : vector<16x32xf32> to vector<16x8xf32>
    %71 = vector.shape_cast %70 : vector<16x8xf32> to vector<2x8x8xf32>
    %72 = vector.extract_strided_slice %55 {offsets = [0, 16], sizes = [16, 8], strides = [1, 1]} : vector<16x32xf32> to vector<16x8xf32>
    %73 = vector.shape_cast %72 : vector<16x8xf32> to vector<2x8x8xf32>
    %74 = vector.extract_strided_slice %55 {offsets = [0, 24], sizes = [16, 8], strides = [1, 1]} : vector<16x32xf32> to vector<16x8xf32>
    %75 = vector.shape_cast %74 : vector<16x8xf32> to vector<2x8x8xf32>
    %76 = tpu.concatenate %69, %71, %73, %75 in 0 : vector<2x8x8xf32>, vector<2x8x8xf32>, vector<2x8x8xf32>, vector<2x8x8xf32> -> vector<8x8x8xf32>
    %77 = vector.extract_strided_slice %58 {offsets = [0, 0], sizes = [16, 8], strides = [1, 1]} : vector<16x32xf32> to vector<16x8xf32>
    %78 = vector.shape_cast %77 : vector<16x8xf32> to vector<2x8x8xf32>
    %79 = vector.extract_strided_slice %58 {offsets = [0, 8], sizes = [16, 8], strides = [1, 1]} : vector<16x32xf32> to vector<16x8xf32>
    %80 = vector.shape_cast %79 : vector<16x8xf32> to vector<2x8x8xf32>
    %81 = vector.extract_strided_slice %58 {offsets = [0, 16], sizes = [16, 8], strides = [1, 1]} : vector<16x32xf32> to vector<16x8xf32>
    %82 = vector.shape_cast %81 : vector<16x8xf32> to vector<2x8x8xf32>
    %83 = vector.extract_strided_slice %58 {offsets = [0, 24], sizes = [16, 8], strides = [1, 1]} : vector<16x32xf32> to vector<16x8xf32>
    %84 = vector.shape_cast %83 : vector<16x8xf32> to vector<2x8x8xf32>
    %85 = tpu.concatenate %78, %80, %82, %84 in 0 : vector<2x8x8xf32>, vector<2x8x8xf32>, vector<2x8x8xf32>, vector<2x8x8xf32> -> vector<8x8x8xf32>
    "tpu.trace_start"() <{level = 10 : i32, message = "gqd,gkd->gqk"}> : () -> ()
    %cst_32 = arith.constant dense<0.000000e+00> : vector<8x16x8xf32>
    %86 = tpu.matmul %67, %76, %cst_32 {dimension_numbers = #tpu.dot_dimension_numbers<[2], [2], [1], [1], [0, 0, 0, 1, 1, 1], [0], [0]>, precision = #tpu.contract_precision<fp32>} : vector<8x16x8xf32>, vector<8x8x8xf32>, vector<8x16x8xf32> -> vector<8x16x8xf32>
    %cst_33 = arith.constant -1.000000e+04 : f32
    %cst_34 = arith.constant 1.000000e+04 : f32
    "tpu.trace_stop"() : () -> ()
    %87 = vector.broadcast %cst_33 : f32 to vector<8x16x8xf32>
    %88 = arith.maximumf %87, %86 : vector<8x16x8xf32>
    %89 = vector.broadcast %cst_34 : f32 to vector<8x16x8xf32>
    %90 = arith.minimumf %89, %88 : vector<8x16x8xf32>
    %cst_35 = arith.constant dense<0xFF800000> : vector<8x16xf32>
    %91 = vector.multi_reduction <maximumf>, %90, %cst_35 [2] : vector<8x16x8xf32> to vector<8x16xf32>
    %92 = vector.shape_cast %91 : vector<8x16xf32> to vector<8x16x1xf32>
    %93 = vector.broadcast %92 : vector<8x16x1xf32> to vector<8x16x8xf32>
    %94 = arith.subf %90, %93 : vector<8x16x8xf32>
    %95 = math.exp %94 : vector<8x16x8xf32>
    %cst_36 = arith.constant dense<0.000000e+00> : vector<8x16xf32>
    %96 = vector.multi_reduction <add>, %95, %cst_36 [2] : vector<8x16x8xf32> to vector<8x16xf32>
    %97 = vector.shape_cast %96 : vector<8x16xf32> to vector<8x16x1xf32>
    %98 = vector.broadcast %97 : vector<8x16x1xf32> to vector<8x16x8xf32>
    %99 = arith.divf %95, %98 : vector<8x16x8xf32>
    "tpu.trace_start"() <{level = 10 : i32, message = "gqk,gkd->gqd"}> : () -> ()
    %cst_37 = arith.constant dense<0.000000e+00> : vector<8x16x8xf32>
    %100 = tpu.matmul %99, %85, %cst_37 {dimension_numbers = #tpu.dot_dimension_numbers<[2], [1], [1], [2], [0, 0, 0, 1, 1, 2], [0], [0]>, precision = #tpu.contract_precision<fp32>} : vector<8x16x8xf32>, vector<8x8x8xf32>, vector<8x16x8xf32> -> vector<8x16x8xf32>
    "tpu.trace_stop"() : () -> ()
    %101 = vector.extract_strided_slice %100 {offsets = [0, 0, 0], sizes = [2, 16, 8], strides = [1, 1, 1]} : vector<8x16x8xf32> to vector<2x16x8xf32>
    %102 = vector.shape_cast %101 : vector<2x16x8xf32> to vector<32x8xf32>
    %103 = vector.extract_strided_slice %100 {offsets = [2, 0, 0], sizes = [2, 16, 8], strides = [1, 1, 1]} : vector<8x16x8xf32> to vector<2x16x8xf32>
    %104 = vector.shape_cast %103 : vector<2x16x8xf32> to vector<32x8xf32>
    %105 = vector.extract_strided_slice %100 {offsets = [4, 0, 0], sizes = [2, 16, 8], strides = [1, 1, 1]} : vector<8x16x8xf32> to vector<2x16x8xf32>
    %106 = vector.shape_cast %105 : vector<2x16x8xf32> to vector<32x8xf32>
    %107 = vector.extract_strided_slice %100 {offsets = [6, 0, 0], sizes = [2, 16, 8], strides = [1, 1, 1]} : vector<8x16x8xf32> to vector<2x16x8xf32>
    %108 = vector.shape_cast %107 : vector<2x16x8xf32> to vector<32x8xf32>
    %109 = tpu.concatenate %102, %104, %106, %108 in 1 : vector<32x8xf32>, vector<32x8xf32>, vector<32x8xf32>, vector<32x8xf32> -> vector<32x32xf32>
    %c0_38 = arith.constant 0 : index
    %c0_39 = arith.constant 0 : index
    %110 = vector.load %arg12[%c0_38, %c0_39] : memref<1x32xf32, #tpu.memory_space<vmem>>, vector<1x32xf32>
    %c0_40 = arith.constant 0 : index
    %c0_41 = arith.constant 0 : index
    %111 = vector.load %arg13[%c0_40, %c0_41] : memref<1x32xf32, #tpu.memory_space<vmem>>, vector<1x32xf32>
    %cst_42 = arith.constant dense<0.000000e+00> : vector<32xf32>
    %112 = vector.multi_reduction <add>, %109, %cst_42 [1] : vector<32x32xf32> to vector<32xf32>
    %113 = vector.shape_cast %112 : vector<32xf32> to vector<32x1xf32>
    %cst_43 = arith.constant 3.200000e+01 : f32
    %114 = vector.broadcast %cst_43 : f32 to vector<32x1xf32>
    %115 = arith.divf %113, %114 : vector<32x1xf32>
    %116 = vector.broadcast %115 : vector<32x1xf32> to vector<32x32xf32>
    %117 = arith.subf %109, %116 : vector<32x32xf32>
    %118 = arith.mulf %117, %117 : vector<32x32xf32>
    %cst_44 = arith.constant dense<0.000000e+00> : vector<32xf32>
    %119 = vector.multi_reduction <add>, %118, %cst_44 [1] : vector<32x32xf32> to vector<32xf32>
    %120 = vector.shape_cast %119 : vector<32xf32> to vector<32x1xf32>
    %cst_45 = arith.constant 3.200000e+01 : f32
    %121 = vector.broadcast %cst_45 : f32 to vector<32x1xf32>
    %122 = arith.divf %120, %121 : vector<32x1xf32>
    %123 = vector.broadcast %115 : vector<32x1xf32> to vector<32x32xf32>
    %124 = arith.subf %109, %123 : vector<32x32xf32>
    %cst_46 = arith.constant 9.99999974E-6 : f32
    %125 = vector.broadcast %cst_46 : f32 to vector<32x1xf32>
    %126 = arith.addf %122, %125 : vector<32x1xf32>
    %127 = math.rsqrt %126 : vector<32x1xf32>
    %128 = vector.broadcast %127 : vector<32x1xf32> to vector<32x32xf32>
    %129 = arith.mulf %124, %128 : vector<32x32xf32>
    %130 = vector.broadcast %110 : vector<1x32xf32> to vector<32x32xf32>
    %131 = arith.mulf %129, %130 : vector<32x32xf32>
    %132 = vector.broadcast %111 : vector<1x32xf32> to vector<32x32xf32>
    %133 = arith.addf %131, %132 : vector<32x32xf32>
    %c0_47 = arith.constant 0 : index
    %c0_48 = arith.constant 0 : index
    %134 = vector.load %arg11[%c0_47, %c0_48] : memref<32x32xf32, #tpu.memory_space<vmem>>, vector<32x32xf32>
    %cst_49 = arith.constant dense<0.000000e+00> : vector<32x32xf32>
    %135 = tpu.matmul %133, %134, %cst_49 {dimension_numbers = #tpu.dot_dimension_numbers<[1], [0], [0], [1], [0, 0, 1, 1], [], []>, precision = #tpu.contract_precision<fp32>} : vector<32x32xf32>, vector<32x32xf32>, vector<32x32xf32> -> vector<32x32xf32>
    %cst_50 = arith.constant 5.000000e-01 : f32
    %136 = vector.broadcast %cst_50 : f32 to vector<32x32xf32>
    %137 = arith.mulf %136, %135 : vector<32x32xf32>
    %cst_51 = arith.constant 0.707106769 : f32
    %138 = vector.broadcast %cst_51 : f32 to vector<32x32xf32>
    %139 = arith.mulf %135, %138 : vector<32x32xf32>
    %140 = math.erf %139 : vector<32x32xf32>
    %cst_52 = arith.constant 1.000000e+00 : f32
    %141 = vector.broadcast %cst_52 : f32 to vector<32x32xf32>
    %142 = arith.addf %141, %140 : vector<32x32xf32>
    %143 = arith.mulf %137, %142 : vector<32x32xf32>
    %144 = arith.addf %133, %143 : vector<32x32xf32>
    %c0_53 = arith.constant 0 : index
    %c0_54 = arith.constant 0 : index
    %145 = vector.load %arg14[%c0_53, %c0_54] : memref<32x32xf32, #tpu.memory_space<vmem>>, vector<32x32xf32>
    tpu.vector_store %arg14[%c0_53, %c0_54], %144 {strides = array<i32>} : memref<32x32xf32, #tpu.memory_space<vmem>>, vector<32x32xf32>,
    return
  }
  func.func @transform_0(%arg0: i32) -> (i32, i32) {
    %c0_i32 = arith.constant 0 : i32
    %c0_i32_0 = arith.constant 0 : i32
    return %arg0, %c0_i32 : i32, i32
  }
  func.func @transform_1(%arg0: i32) -> (i32, i32) {
    %c0_i32 = arith.constant 0 : i32
    %c0_i32_0 = arith.constant 0 : i32
    return %arg0, %c0_i32 : i32, i32
  }
  func.func @transform_2(%arg0: i32) -> (i32, i32) {
    %c0_i32 = arith.constant 0 : i32
    %c0_i32_0 = arith.constant 0 : i32
    return %arg0, %c0_i32 : i32, i32
  }
  func.func @transform_3(%arg0: i32) -> (i32, i32) {
    %c0_i32 = arith.constant 0 : i32
    %c0_i32_0 = arith.constant 0 : i32
    %c0_i32_1 = arith.constant 0 : i32
    return %c0_i32, %c0_i32_0 : i32, i32
  }
  func.func @transform_4(%arg0: i32) -> (i32, i32) {
    %c0_i32 = arith.constant 0 : i32
    %c0_i32_0 = arith.constant 0 : i32
    %c0_i32_1 = arith.constant 0 : i32
    return %c0_i32, %c0_i32_0 : i32, i32
  }
  func.func @transform_5(%arg0: i32) -> (i32, i32) {
    %c0_i32 = arith.constant 0 : i32
    %c0_i32_0 = arith.constant 0 : i32
    %c0_i32_1 = arith.constant 0 : i32
    return %c0_i32, %c0_i32_0 : i32, i32
  }
  func.func @transform_6(%arg0: i32) -> (i32, i32) {
    %c0_i32 = arith.constant 0 : i32
    %c0_i32_0 = arith.constant 0 : i32
    %c0_i32_1 = arith.constant 0 : i32
    return %c0_i32, %c0_i32_0 : i32, i32
  }
  func.func @transform_7(%arg0: i32) -> (i32, i32) {
    %c0_i32 = arith.constant 0 : i32
    %c0_i32_0 = arith.constant 0 : i32
    %c0_i32_1 = arith.constant 0 : i32
    return %c0_i32, %c0_i32_0 : i32, i32
  }
  func.func @transform_8(%arg0: i32) -> (i32, i32) {
    %c0_i32 = arith.constant 0 : i32
    %c0_i32_0 = arith.constant 0 : i32
    %c0_i32_1 = arith.constant 0 : i32
    return %c0_i32, %c0_i32_0 : i32, i32
  }
  func.func @transform_9(%arg0: i32) -> (i32, i32) {
    %c0_i32 = arith.constant 0 : i32
    %c0_i32_0 = arith.constant 0 : i32
    %c0_i32_1 = arith.constant 0 : i32
    return %c0_i32, %c0_i32_0 : i32, i32
  }
  func.func @transform_10(%arg0: i32) -> (i32, i32) {
    %c0_i32 = arith.constant 0 : i32
    %c0_i32_0 = arith.constant 0 : i32
    %c0_i32_1 = arith.constant 0 : i32
    return %c0_i32, %c0_i32_0 : i32, i32
  }
  func.func @transform_11(%arg0: i32) -> (i32, i32) {
    %c0_i32 = arith.constant 0 : i32
    %c0_i32_0 = arith.constant 0 : i32
    %c0_i32_1 = arith.constant 0 : i32
    return %c0_i32, %c0_i32_0 : i32, i32
  }
  func.func @transform_12(%arg0: i32) -> (i32, i32) {
    %c0_i32 = arith.constant 0 : i32
    %c0_i32_0 = arith.constant 0 : i32
    %c0_i32_1 = arith.constant 0 : i32
    return %c0_i32, %c0_i32_0 : i32, i32
  }
  func.func @transform_13(%arg0: i32) -> (i32, i32) {
    %c0_i32 = arith.constant 0 : i32
    %c0_i32_0 = arith.constant 0 : i32
    return %arg0, %c0_i32 : i32, i32
  }
}

</mosaic_0001>

<bundles_post_ra>
// kernel: cross_attention.1
= control target key start
LH: loop header
LB: loop body
LE: loop exit
PB: predicated region body
PF: predicated region fallthrough
CT: control target
= control target key end

     0   :  { %18 = vsyncpa [#allocation3], 0  ;;  %s14355_s0 = inlined_call_operand.hbm [shape: f32[32,32], index: 0, kind: input, shape index: {}]   ;;  %s14356_s1 = inlined_call_operand.hbm [shape: f32[16,32], index: 1, kind: input, shape index: {}]   ;;  %s14357_s2 = inlined_call_operand.hbm [shape: f32[16,24], index: 2, kind: input, shape index: {}]   ;;  %s14358_s3 = inlined_call_operand.hbm [shape: f32[1,32], index: 3, kind: input, shape index: {}]   ;;  %s14359_s4 = inlined_call_operand.hbm [shape: f32[1,32], index: 4, kind: input, shape index: {}]   ;;  %s14360_s5 = inlined_call_operand.hbm [shape: f32[1,32], index: 5, kind: input, shape index: {}]   ;;  %s14361_s6 = inlined_call_operand.hbm [shape: f32[1,32], index: 6, kind: input, shape index: {}]   ;;  %s14362_s7 = inlined_call_operand.vmem [shape: f32[32,32], index: 7, kind: input, shape index: {}]   ;;  %s14363_s8 = inlined_call_operand.hbm [shape: f32[32,32], index: 8, kind: input, shape index: {}]   ;;  %s14364_s9 = inlined_call_operand.vmem [shape: f32[24,32], index: 9, kind: input, shape index: {}]   ;;  %s14365_s10 = inlined_call_operand.hbm [shape: f32[32,32], index: 10, kind: input, shape index: {}]   ;;  %s14366_s11 = inlined_call_operand.hbm [shape: f32[1,32], index: 11, kind: input, shape index: {}]   ;;  %s14367_s12 = inlined_call_operand.hbm [shape: f32[1,32], index: 12, kind: input, shape index: {}]   ;;  %s14368_s13 = inlined_call_operand.hbm [shape: f32[32,32], index: 13, kind: output, shape index: {}]  }
   0x1   :  { %19 = vsyncpa [#allocation6], 0 }
   0x2   :  { %20 = vsyncpa [#allocation9], 0 }
   0x3   :  { %21 = vsyncpa [#allocation12], 0 }
   0x4   :  { %22 = vsyncpa [#allocation15], 0 }
   0x5   :  { %23 = vsyncpa [#allocation18], 0 }
   0x6   :  { %24 = vsyncpa [#allocation4], 0  ;;  %s13030_s25 = smov [#allocation5]   ;;  %s13031_s27 = smov [#allocation8]  }
   0x7   :  { %s42_s26 = sshll.u32 %s13030_s25, 4  ;;  %s67_s28 = sshll.u32 %s13031_s27, 4  ;;  %s43_s26 = int_to_ptr.vmem [resolvable:$true] %s42_s26  ;;  %s13119_s28 = int_to_ptr.vmem [resolvable:$true] %s67_s28 }
   0x8   :  { %s12752_s14 = scalar_lea.hbm %s14356_s1, 256 }
   0x9   :  { %p12753_p0 = scmp.ne.s32.totalorder %s14356_s1, %s12752_s14  ;;  %p12756_p1 = scmp.lt.u32.totalorder %s12752_s14, %s14356_s1 }
   0xb   :  { %p12758_p2 = pnand %p12756_p1, %p12753_p0 }
   0xd   :  { %12761 = shalt.err (!%p12758_p2)
}
   0xe   :  { %s12762_s19 = scalar_lea.vmem %s43_s26, 256  ;;  %p12767_p4 = scmp.lt.s32.totalorder %s43_s26, %s43_s26 }
   0xf   :  { %p12763_p3 = scmp.ne.s32.totalorder %s43_s26, %s12762_s19  ;;  %p12768_p5 = scmp.lt.s32.totalorder %s12762_s19, %s12762_s19 }
  0x11   :  { %p12769_p6 = por %p12768_p5, %p12767_p4 }
  0x13   :  { %p12770_p7 = pnand %p12769_p6, %p12763_p3 }
  0x15   :  { %12773 = shalt.err (!%p12770_p7)
}
  0x16   :  { %s13032_s20 = smov 128   ;;  %s13033_s21 = smov 8  }
  0x17   :  { %48 = dma.hbm_to_vmem [thread:$0]  %s14356_s1, 256, %s43_s26, [#allocation6], %s13032_s20, %s13032_s20, %s13033_s21  }
  0x18   :  { %s12774_s27 = scalar_lea.hbm %s14358_s3, 16 }
  0x19   :  { %p12775_p8 = scmp.ne.s32.totalorder %s14358_s3, %s12774_s27  ;;  %p12778_p9 = scmp.lt.u32.totalorder %s12774_s27, %s14358_s3 }
  0x1b   :  { %p12780_p10 = pnand %p12778_p9, %p12775_p8 }
  0x1d   :  { %12783 = shalt.err (!%p12780_p10)
}
  0x1e   :  { %s12784_s16 = scalar_lea.vmem %s13119_s28, 16  ;;  %s12788_s1 = scalar_lea.vmem %s13119_s28, 32 }
  0x1f   :  { %p12785_p11 = scmp.ne.s32.totalorder %s13119_s28, %s12784_s16  ;;  %p12789_p12 = scmp.lt.s32.totalorder %s13119_s28, %s13119_s28 }
  0x20   :  { %p12790_p13 = scmp.lt.s32.totalorder %s12788_s1, %s12784_s16 }
  0x22   :  { %p12791_p0 = por %p12790_p13, %p12789_p12 }
  0x24   :  { %p12792_p1 = pnand %p12791_p0, %p12785_p11 }
  0x26   :  { %12795 = shalt.err (!%p12792_p1)
}
  0x27   :  { %70 = dma.hbm_to_vmem [thread:$0]  %s14358_s3, 16, %s13119_s28, [#allocation9]  }
  0x28   :  { %s13034_s18 = smov [#allocation11]   ;;  %s13035_s22 = smov [#allocation14]  }
  0x29   :  { %s87_s19 = sshll.u32 %s13034_s18, 4  ;;  %s108_s23 = sshll.u32 %s13035_s22, 4  ;;  %s88_s19 = int_to_ptr.vmem [resolvable:$true] %s87_s19  ;;  %s13154_s23 = int_to_ptr.vmem [resolvable:$true] %s108_s23 }
  0x2a   :  { %s12796_s27 = scalar_lea.hbm %s14360_s5, 16 }
  0x2b   :  { %p12797_p2 = scmp.ne.s32.totalorder %s14360_s5, %s12796_s27  ;;  %p12800_p3 = scmp.lt.u32.totalorder %s12796_s27, %s14360_s5 }
  0x2d   :  { %p12802_p4 = pnand %p12800_p3, %p12797_p2 }
  0x2f   :  { %12805 = shalt.err (!%p12802_p4)
}
  0x30   :  { %s12806_s3 = scalar_lea.vmem %s88_s19, 16  ;;  %s12810_s28 = scalar_lea.vmem %s88_s19, 32 }
  0x31   :  { %p12807_p5 = scmp.ne.s32.totalorder %s88_s19, %s12806_s3  ;;  %p12811_p6 = scmp.lt.s32.totalorder %s88_s19, %s88_s19 }
  0x32   :  { %p12812_p7 = scmp.lt.s32.totalorder %s12810_s28, %s12806_s3 }
  0x34   :  { %p12813_p8 = por %p12812_p7, %p12811_p6 }
  0x36   :  { %p12814_p9 = pnand %p12813_p8, %p12807_p5 }
  0x38   :  { %12817 = shalt.err (!%p12814_p9)
}
  0x39   :  { %90 = dma.hbm_to_vmem [thread:$0]  %s14360_s5, 16, %s88_s19, [#allocation12]  }
  0x3a   :  { %s12818_s18 = scalar_lea.hbm %s14363_s8, 512 }
  0x3b   :  { %p12819_p10 = scmp.ne.s32.totalorder %s14363_s8, %s12818_s18  ;;  %p12822_p11 = scmp.lt.u32.totalorder %s12818_s18, %s14363_s8 }
  0x3d   :  { %p12824_p12 = pnand %p12822_p11, %p12819_p10 }
  0x3f   :  { %12827 = shalt.err (!%p12824_p12)
}
  0x40   :  { %s12828_s29 = scalar_lea.vmem %s13154_s23, 512  ;;  %p12833_p0 = scmp.lt.s32.totalorder %s13154_s23, %s13154_s23 }
  0x41   :  { %p12829_p13 = scmp.ne.s32.totalorder %s13154_s23, %s12828_s29  ;;  %p12834_p1 = scmp.lt.s32.totalorder %s12828_s29, %s12828_s29 }
  0x43   :  { %p12835_p2 = por %p12834_p1, %p12833_p0 }
  0x45   :  { %p12836_p3 = pnand %p12835_p2, %p12829_p13 }
  0x47   :  { %12839 = shalt.err (!%p12836_p3)
}
  0x48   :  { %114 = dma.hbm_to_vmem [thread:$0]  %s14363_s8, 512, %s13154_s23, [#allocation15], %s13032_s20, %s13032_s20, %s13033_s21  }
  0x49   :  { %s13036_s30 = smov [#allocation17]   ;;  %s13037_s15 = smov [#allocation2]  }
  0x4a   :  { %s135_s14 = sshll.u32 %s13036_s30, 4  ;;  %s30_s3 = sshll.u32 %s13037_s15, 4  ;;  %s136_s14 = int_to_ptr.vmem [resolvable:$true] %s135_s14  ;;  %s13188_s3 = int_to_ptr.vmem [resolvable:$true] %s30_s3 }
  0x4b   :  { %s12840_s1 = scalar_lea.hbm %s14366_s11, 16 }
  0x4c   :  { %p12841_p4 = scmp.ne.s32.totalorder %s14366_s11, %s12840_s1  ;;  %p12844_p5 = scmp.lt.u32.totalorder %s12840_s1, %s14366_s11 }
  0x4e   :  { %p12846_p6 = pnand %p12844_p5, %p12841_p4 }
  0x50   :  { %12849 = shalt.err (!%p12846_p6)
}
  0x51   :  { %s12850_s8 = scalar_lea.vmem %s136_s14, 16  ;;  %s12854_s23 = scalar_lea.vmem %s136_s14, 32 }
  0x52   :  { %p12851_p7 = scmp.ne.s32.totalorder %s136_s14, %s12850_s8  ;;  %p12855_p8 = scmp.lt.s32.totalorder %s136_s14, %s136_s14 }
  0x53   :  { %p12856_p9 = scmp.lt.s32.totalorder %s12854_s23, %s12850_s8 }
  0x55   :  { %p12857_p10 = por %p12856_p9, %p12855_p8 }
  0x57   :  { %p12858_p11 = pnand %p12857_p10, %p12851_p7 }
  0x59   :  { %12861 = shalt.err (!%p12858_p11)
}
  0x5a   :  { %138 = dma.hbm_to_vmem [thread:$0]  %s14366_s11, 16, %s136_s14, [#allocation18]  }
  0x5b   :  { %s12862_s5 = scalar_lea.hbm %s14355_s0, 512 }
  0x5c   :  { %p12863_p12 = scmp.ne.s32.totalorder %s14355_s0, %s12862_s5  ;;  %p12866_p13 = scmp.lt.u32.totalorder %s12862_s5, %s14355_s0 }
  0x5e   :  { %p12868_p0 = pnand %p12866_p13, %p12863_p12 }
  0x60   :  { %12871 = shalt.err (!%p12868_p0)
}
  0x61   :  { %s12872_s16 = scalar_lea.vmem %s13188_s3, 512  ;;  %p12877_p2 = scmp.lt.s32.totalorder %s13188_s3, %s13188_s3 }
  0x62   :  { %p12873_p1 = scmp.ne.s32.totalorder %s13188_s3, %s12872_s16  ;;  %p12878_p3 = scmp.lt.s32.totalorder %s12872_s16, %s12872_s16 }
  0x64   :  { %p12879_p4 = por %p12878_p3, %p12877_p2 }
  0x66   :  { %p12880_p5 = pnand %p12879_p4, %p12873_p1 }
  0x68   :  { %12883 = shalt.err (!%p12880_p5)
}
  0x69   :  { %36 = dma.hbm_to_vmem [thread:$0]  %s14355_s0, 512, %s13188_s3, [#allocation3], %s13032_s20, %s13032_s20, %s13033_s21  }
  0x6a   :  { %s13038_s1 = smov [#allocation7]   ;;  %s13039_s17 = smov [#allocation10]  }
  0x6b   :  { %s54_s26 = sshll.u32 %s13038_s1, 4  ;;  %s77_s18 = sshll.u32 %s13039_s17, 4  ;;  %s55_s26 = int_to_ptr.vmem [resolvable:$true] %s54_s26  ;;  %s78_s18 = int_to_ptr.vmem [resolvable:$true] %s77_s18 }
  0x6c   :  { %s12884_s23 = scalar_lea.hbm %s14357_s2, 256 }
  0x6d   :  { %p12885_p6 = scmp.ne.s32.totalorder %s14357_s2, %s12884_s23  ;;  %p12888_p7 = scmp.lt.u32.totalorder %s12884_s23, %s14357_s2 }
  0x6f   :  { %p12890_p8 = pnand %p12888_p7, %p12885_p6 }
  0x71   :  { %12893 = shalt.err (!%p12890_p8)
}
  0x72   :  { %s12894_s0 = scalar_lea.vmem %s55_s26, 256  ;;  %p12899_p10 = scmp.lt.s32.totalorder %s55_s26, %s55_s26 }
  0x73   :  { %p12895_p9 = scmp.ne.s32.totalorder %s55_s26, %s12894_s0  ;;  %p12900_p11 = scmp.lt.s32.totalorder %s12894_s0, %s12894_s0 }
  0x75   :  { %p12901_p12 = por %p12900_p11, %p12899_p10 }
  0x77   :  { %p12902_p13 = pnand %p12901_p12, %p12895_p9 }
  0x79   :  { %12905 = shalt.err (!%p12902_p13)
}
  0x7a   :  { %60 = dma.hbm_to_vmem [thread:$0]  %s14357_s2, 256, %s55_s26, [#allocation6], %s13032_s20, %s13032_s20, %s13033_s21  }
  0x7b   :  { %s12906_s15 = scalar_lea.hbm %s14359_s4, 16 }
  0x7c   :  { %p12907_p0 = scmp.ne.s32.totalorder %s14359_s4, %s12906_s15  ;;  %p12910_p1 = scmp.lt.u32.totalorder %s12906_s15, %s14359_s4 }
  0x7e   :  { %p12912_p2 = pnand %p12910_p1, %p12907_p0 }
  0x80   :  { %12915 = shalt.err (!%p12912_p2)
}
  0x81   :  { %s12916_s1 = scalar_lea.vmem %s78_s18, 16  ;;  %s12920_s17 = scalar_lea.vmem %s78_s18, 32 }
  0x82   :  { %p12917_p3 = scmp.ne.s32.totalorder %s78_s18, %s12916_s1  ;;  %p12921_p4 = scmp.lt.s32.totalorder %s78_s18, %s78_s18 }
  0x83   :  { %p12922_p5 = scmp.lt.s32.totalorder %s12920_s17, %s12916_s1 }
  0x85   :  { %p12923_p6 = por %p12922_p5, %p12921_p4 }
  0x87   :  { %p12924_p7 = pnand %p12923_p6, %p12917_p3 }
  0x89   :  { %12927 = shalt.err (!%p12924_p7)
}
  0x8a   :  { %80 = dma.hbm_to_vmem [thread:$0]  %s14359_s4, 16, %s78_s18, [#allocation9]  }
  0x8b   :  { %s13040_s22 = smov [#allocation13]   ;;  %s13041_s23 = smov [#allocation16]  }
  0x8c   :  { %s97_s8 = sshll.u32 %s13040_s22, 4  ;;  %s122_s24 = sshll.u32 %s13041_s23, 4  ;;  %s98_s8 = int_to_ptr.vmem [resolvable:$true] %s97_s8  ;;  %s13249_s24 = int_to_ptr.vmem [resolvable:$true] %s122_s24 }
  0x8d   :  { %s12928_s29 = scalar_lea.hbm %s14361_s6, 16 }
  0x8e   :  { %p12929_p8 = scmp.ne.s32.totalorder %s14361_s6, %s12928_s29  ;;  %p12932_p9 = scmp.lt.u32.totalorder %s12928_s29, %s14361_s6 }
  0x90   :  { %p12934_p10 = pnand %p12932_p9, %p12929_p8 }
  0x92   :  { %12937 = shalt.err (!%p12934_p10)
}
  0x93   :  { %s12938_s4 = scalar_lea.vmem %s98_s8, 16  ;;  %s12942_s18 = scalar_lea.vmem %s98_s8, 32 }
  0x94   :  { %p12939_p11 = scmp.ne.s32.totalorder %s98_s8, %s12938_s4  ;;  %p12943_p12 = scmp.lt.s32.totalorder %s98_s8, %s98_s8 }
  0x95   :  { %p12944_p13 = scmp.lt.s32.totalorder %s12942_s18, %s12938_s4 }
  0x97   :  { %p12945_p0 = por %p12944_p13, %p12943_p12 }
  0x99   :  { %p12946_p1 = pnand %p12945_p0, %p12939_p11 }
  0x9b   :  { %12949 = shalt.err (!%p12946_p1)
}
  0x9c   :  { %100 = dma.hbm_to_vmem [thread:$0]  %s14361_s6, 16, %s98_s8, [#allocation12]  }
  0x9d   :  { %s12950_s11 = scalar_lea.hbm %s14365_s10, 512 }
  0x9e   :  { %p12951_p2 = scmp.ne.s32.totalorder %s14365_s10, %s12950_s11  ;;  %p12954_p3 = scmp.lt.u32.totalorder %s12950_s11, %s14365_s10 }
  0xa0   :  { %p12956_p4 = pnand %p12954_p3, %p12951_p2 }
  0xa2   :  { %12959 = shalt.err (!%p12956_p4)
}
  0xa3   :  { %s12960_s26 = scalar_lea.vmem %s13249_s24, 512  ;;  %p12965_p6 = scmp.lt.s32.totalorder %s13249_s24, %s13249_s24 }
  0xa4   :  { %p12961_p5 = scmp.ne.s32.totalorder %s13249_s24, %s12960_s26  ;;  %p12966_p7 = scmp.lt.s32.totalorder %s12960_s26, %s12960_s26 }
  0xa6   :  { %p12967_p8 = por %p12966_p7, %p12965_p6 }
  0xa8   :  { %p12968_p9 = pnand %p12967_p8, %p12961_p5 }
  0xaa   :  { %12971 = shalt.err (!%p12968_p9)
}
  0xab   :  { %128 = dma.hbm_to_vmem [thread:$0]  %s14365_s10, 512, %s13249_s24, [#allocation15], %s13032_s20, %s13032_s20, %s13033_s21  }
  0xac   :  { %s13042_s8 = smov [#allocation19]   ;;  %s12972_s29 = scalar_lea.hbm %s14367_s12, 16 }
  0xad   :  { %s145_s23 = sshll.u32 %s13042_s8, 4  ;;  %p12973_p10 = scmp.ne.s32.totalorder %s14367_s12, %s12972_s29  ;;  %s146_s23 = int_to_ptr.vmem [resolvable:$true] %s145_s23 }
  0xae   :  { %p12976_p11 = scmp.lt.u32.totalorder %s12972_s29, %s14367_s12 }
  0xb0   :  { %p12978_p12 = pnand %p12976_p11, %p12973_p10 }
  0xb2   :  { %12981 = shalt.err (!%p12978_p12)
}
  0xb3   :  { %s12982_s4 = scalar_lea.vmem %s146_s23, 16  ;;  %s12986_s10 = scalar_lea.vmem %s146_s23, 32 }
  0xb4   :  { %p12983_p13 = scmp.ne.s32.totalorder %s146_s23, %s12982_s4  ;;  %p12987_p0 = scmp.lt.s32.totalorder %s146_s23, %s146_s23 }
  0xb5   :  { %p12988_p1 = scmp.lt.s32.totalorder %s12986_s10, %s12982_s4 }
  0xb7   :  { %p12989_p2 = por %p12988_p1, %p12987_p0 }
  0xb9   :  { %p12990_p3 = pnand %p12989_p2, %p12983_p13 }
  0xbb   :  { %12993 = shalt.err (!%p12990_p3)
}
  0xbc   :  { %148 = dma.hbm_to_vmem [thread:$0]  %s14367_s12, 16, %s146_s23, [#allocation18]  }
  0xbd   :  { %13016 = dma.done.wait [#allocation3], 512  }
  0xbe   :  { %13017 = vsyncadd [#allocation3], 4294966784 }
  0xbf   :  { %13018 = dma.done.wait [#allocation6], 512  }
  0xc0   :  { %13019 = vsyncadd [#allocation6], 4294966784 }
  0xc1   :  { %13020 = dma.done.wait [#allocation9], 32  }
  0xc2   :  { %13021 = vsyncadd [#allocation9], 4294967264 }
  0xc3   :  { %13022 = dma.done.wait [#allocation12], 32  }
  0xc4   :  { %13023 = vsyncadd [#allocation12], 4294967264 }
  0xc5   :  { %13024 = dma.done.wait [#allocation15], 1024  }
  0xc6   :  { %13025 = vsyncadd [#allocation15], 4294966272 }
  0xc7   :  { %13026 = dma.done.wait [#allocation18], 32  }
  0xc8   :  { %13027 = vsyncadd [#allocation18], 4294967264  ;;  %vm188_vm0 = vcmask 261120   ;;  %v182_v0 = vld [vmem:[#allocation2] sm:$0xff]  ;;  %v184_v1 = vld [vmem:[#allocation2 + $0x10] sm:$0xff]  ;;  %vm1485_vm1 = vcmask 195584  }
  0xc9   :  { %v183_v2 = vld [vmem:[#allocation2 + $0x8] sm:$0xff]  ;;  %v189_v3 = vsel %vm188_vm0, %v182_v0, 0.0  ;;  %v195_v4 = vsel %vm188_vm0, %v184_v1, 0.0  ;;  %v185_v5 = vld [vmem:[#allocation2 + $0x18] sm:$0xff]  ;;  %v262_v8 = vld [vmem:[#allocation5] sm:$0xff]  ;;  %vm2069_vm2 = vcmask 64512  }
  0xca   :  { %190 = vadd.xlane.f32.xlu0 %v189_v3  ;;  %196 = vadd.xlane.f32.xlu1 %v195_v4  ;;  %v192_v6 = vsel %vm188_vm0, %v183_v2, 0.0  ;;  %v198_v7 = vsel %vm188_vm0, %v185_v5, 0.0  ;;  %v263_v9 = vld [vmem:[#allocation5 + $0x8] sm:$0xff]  ;;  %v266_v10 = vsel %vm188_vm0, %v262_v8, 0.0  ;;  %v308_v42 = vld [vmem:[%s14362_s7] sm:$0xff]  ;;  %v943_v47 = vld [vmem:[#allocation14 + $0x8] sm:$0xff] }
  0xcb   :  { %v269_v11 = vsel %vm188_vm0, %v263_v9, 0.0  ;;  %v309_v43 = vld [vmem:[%s14362_s7 + $0x8] sm:$0xff]  ;;  %v325_v45 = vand.u32 4294901760, %v308_v42  ;;  %v310_v49 = vld [vmem:[%s14362_s7 + $0x10] sm:$0xff]  ;;  %v311_v50 = vld [vmem:[%s14362_s7 + $0x18] sm:$0xff]  ;;  %v956_v51 = vand.u32 4294901760, %v943_v47 }
  0xcc   :  { %v942_v44 = vld [vmem:[#allocation14] sm:$0xff]  ;;  %v328_v46 = vand.u32 4294901760, %v309_v43  ;;  %v331_v52 = vand.u32 4294901760, %v310_v49  ;;  %v334_v53 = vand.u32 4294901760, %v311_v50  ;;  %v944_v59 = vld [vmem:[#allocation14 + $0x10] sm:$0xff]  ;;  %v945_v60 = vld [vmem:[#allocation14 + $0x18] sm:$0xff] }
  0xcd   :  { %v953_v48 = vand.u32 4294901760, %v942_v44  ;;  %v1050_v56 = vsub.f32 %v943_v47, %v956_v51  ;;  %v435_v58 = vsub.f32 %v308_v42, %v325_v45  ;;  %v959_v63 = vand.u32 4294901760, %v944_v59  ;;  %s13044_s8 = smov 112   ;;  %s13045_s23 = smov 104  }
  0xce   :  { %193 = vadd.xlane.f32.xlu0 %v192_v6  ;;  %199 = vadd.xlane.f32.xlu1 %v198_v7  ;;  %v13343_v54 = vpack.c.bf16 %v328_v46, %v325_v45  ;;  %v13345_v57 = vpack.c.bf16 %v334_v53, %v331_v52  ;;  %v442_v61 = vsub.f32 %v309_v43, %v328_v46  ;;  %s13046_s25 = smov 16   ;;  %s13047_s27 = smov 24   ;;  %vm10250_vm3 = vcmask 130048  }
  0xcf   :  { %v1043_v55 = vsub.f32 %v942_v44, %v953_v48  ;;  %v1057_v3 = vsub.f32 %v944_v59, %v959_v63  ;;  %v449_v6 = vsub.f32 %v310_v49, %v331_v52  ;;  %s13048_s29 = smov [#allocation20]  }
  0xd0   :  { %12254 = vmatprep.subr.bf16.mxu0 %v13343_v54  ;;  %s10996_s0 = sshll.u32 %s13048_s29, 4  ;;  %s10997_s0 = int_to_ptr.vmem [resolvable:$true] %s10996_s0 }
  0xd1   :  { %12256 = vmatpush3.bf16.msra.mxu0 %v13343_v54  ;;  %v12317_v62 = vpack.c.bf16 %v1050_v56, %v1043_v55  ;;  %s12994_s3 = scalar_lea.vmem %s10997_s0, 512  ;;  %p12999_p5 = scmp.lt.s32.totalorder %s10997_s0, %s10997_s0 }
  0xd2   :  { %267 = vadd.xlane.f32.xlu0 %v266_v10  ;;  %270 = vadd.xlane.f32.xlu1 %v269_v11  ;;  %v13352_v10 = vpack.c.bf16 %v956_v51, %v953_v48  ;;  %p12995_p4 = scmp.ne.s32.totalorder %s10997_s0, %s12994_s3  ;;  %p13000_p6 = scmp.lt.s32.totalorder %s12994_s3, %s12994_s3 }
  0xd3   :  { %12258 = vmatprep.subr.bf16.mxu0 %v13345_v57  ;;  %12318 = vmatprep.subr.bf16.mxu1 %v12317_v62 }
  0xd4   :  { %12320 = vmatpush3.bf16.msra.mxu1 %v12317_v62  ;;  %p13001_p7 = por %p13000_p6, %p12999_p5 }
  0xd5   :  { %12260 = vmatpush3.bf16.msra.mxu0 %v13345_v57 }
  0xd6   :  { %p13002_p8 = pnand %p13001_p7, %p12995_p4 }
 0x157   :  { %v191_v12 = vpop.xlane.xlu0 %190  ;;  %v197_v13 = vpop.xlane.xlu1 %196 }
 0x158   :  { %v202_v14 = vmul.f32 0.03125, %v191_v12  ;;  %v204_v15 = vmul.f32 0.03125, %v197_v13  ;;  %v450_v13 = vand.u32 4294901760, %v449_v6 }
 0x15a   :  { %v13301_v16 = vsub.f32 %v182_v0, %v202_v14  ;;  %v13303_v17 = vsub.f32 %v184_v1, %v204_v15  ;;  %v962_v0 = vand.u32 4294901760, %v945_v60  ;;  %v436_v1 = vand.u32 4294901760, %v435_v58 }
 0x15b   :  { %v194_v18 = vpop.xlane.xlu0 %193  ;;  %v200_v19 = vpop.xlane.xlu1 %199 }
 0x15c   :  { %v203_v20 = vmul.f32 0.03125, %v194_v18  ;;  %v205_v21 = vmul.f32 0.03125, %v200_v19  ;;  %v210_v22 = vmul.f32 %v13301_v16, %v13301_v16  ;;  %v212_v23 = vmul.f32 %v13303_v17, %v13303_v17 }
 0x15d   :  { %v1064_v4 = vsub.f32 %v945_v60, %v962_v0  ;;  %v13350_v7 = vpack.c.bf16 %v962_v0, %v959_v63  ;;  %v451_v18 = vsub.f32 %v449_v6, %v450_v13 }
 0x15e   :  { %v13309_v24 = vsub.f32 %v183_v2, %v203_v20  ;;  %v13311_v25 = vsub.f32 %v185_v5, %v205_v21  ;;  %v214_v26 = vsel %vm188_vm0, %v210_v22, 0.0  ;;  %v220_v29 = vsel %vm188_vm0, %v212_v23, 0.0 }
 0x15f   :  { %215 = vadd.xlane.f32.xlu0 %v214_v26  ;;  %v268_v27 = vpop.xlane.xlu0 %267  ;;  %v271_v28 = vpop.xlane.xlu1 %270  ;;  %v443_v2 = vand.u32 4294901760, %v442_v61  ;;  %v437_v5 = vsub.f32 %v435_v58, %v436_v1  ;;  %v12321_v11 = vpack.c.bf16 %v1064_v4, %v1057_v3  ;;  %v452_v21 = vand.u32 4294901760, %v451_v18 }
 0x160   :  { %v272_v30 = vmul.f32 0.03125, %v268_v27  ;;  %v273_v31 = vmul.f32 0.03125, %v271_v28  ;;  %v211_v32 = vmul.f32 %v13309_v24, %v13309_v24  ;;  %v213_v33 = vmul.f32 %v13311_v25, %v13311_v25 }
 0x161   :  { %v438_v12 = vand.u32 4294901760, %v437_v5  ;;  %12322 = vmatprep.subr.bf16.mxu1 %v12321_v11  ;;  %v13361_v26 = vpack.c.bf16 %v442_v61, %v435_v58  ;;  %v1044_v27 = vand.u32 4294901760, %v1043_v55  ;;  %v1051_v28 = vand.u32 4294901760, %v1050_v56  ;;  %v11013_v5 = vld [vmem:[#allocation8] ss:$0 sm:$0xff] }
 0x162   :  { %v13319_v34 = vsub.f32 %v262_v8, %v272_v30  ;;  %v13321_v35 = vsub.f32 %v263_v9, %v273_v31  ;;  %v217_v36 = vsel %vm188_vm0, %v211_v32, 0.0  ;;  %v223_v37 = vsel %vm188_vm0, %v213_v33, 0.0  ;;  %12324 = vmatpush3.bf16.msra.mxu1 %v12321_v11 }
 0x163   :  { %221 = vadd.xlane.f32.xlu0 %v220_v29  ;;  %218 = vadd.xlane.f32.xlu1 %v217_v36  ;;  %v444_v8 = vsub.f32 %v442_v61, %v443_v2  ;;  %v456_v9 = vsub.f32 %v311_v50, %v334_v53  ;;  %v13363_v29 = vpack.c.bf16 %v1051_v28, %v1044_v27  ;;  %v1058_v31 = vand.u32 4294901760, %v1057_v3 }
 0x164   :  { %v276_v38 = vmul.f32 %v13319_v34, %v13319_v34  ;;  %v277_v39 = vmul.f32 %v13321_v35, %v13321_v35  ;;  %12326 = vmatprep.subr.bf16.mxu1 %v13352_v10  ;;  %v1065_v32 = vand.u32 4294901760, %v1064_v4  ;;  %v13369_v36 = vpack.c.bf16 %v443_v2, %v436_v1 }
 0x165   :  { %v445_v14 = vand.u32 4294901760, %v444_v8  ;;  %v457_v15 = vand.u32 4294901760, %v456_v9  ;;  %v13365_v30 = vpack.c.bf16 %v456_v9, %v449_v6  ;;  %v1059_v43 = vsub.f32 %v1057_v3, %v1058_v31  ;;  %v11014_v8 = vld [vmem:[#allocation10] ss:$0 sm:$0xff] }
 0x166   :  { %v278_v40 = vsel %vm188_vm0, %v276_v38, 0.0  ;;  %v281_v41 = vsel %vm188_vm0, %v277_v39, 0.0  ;;  %v13367_v33 = vpack.c.bf16 %v1065_v32, %v1058_v31  ;;  %v1045_v38 = vsub.f32 %v1043_v55, %v1044_v27  ;;  %v11015_v31 = vld [vmem:[#allocation11] ss:$0 sm:$0xff] }
 0x167   :  { %224 = vadd.xlane.f32.xlu1 %v223_v37  ;;  %279 = vadd.xlane.f32.xlu0 %v278_v40  ;;  %v13355_v19 = vpack.c.bf16 %v445_v14, %v438_v12  ;;  %v458_v20 = vsub.f32 %v456_v9, %v457_v15  ;;  %v13371_v37 = vpack.c.bf16 %v457_v15, %v450_v13  ;;  %v1060_v45 = vand.u32 4294901760, %v1059_v43 }
 0x168   :  { %v1052_v39 = vsub.f32 %v1050_v56, %v1051_v28  ;;  %v1046_v40 = vand.u32 4294901760, %v1045_v38  ;;  %v1066_v44 = vsub.f32 %v1064_v4, %v1065_v32 }
 0x169   :  { %12262 = vmatprep.subr.bf16.mxu0 %v13355_v19  ;;  %v459_v22 = vand.u32 4294901760, %v458_v20 }
 0x16a   :  { %v1067_v46 = vand.u32 4294901760, %v1066_v44 }
 0x16b   :  { %282 = vadd.xlane.f32.xlu1 %v281_v41  ;;  %v13359_v23 = vpack.c.bf16 %v459_v22, %v452_v21  ;;  %v1053_v41 = vand.u32 4294901760, %v1052_v39 }
 0x16c   :  { %v13375_v47 = vpack.c.bf16 %v1067_v46, %v1060_v45 }
 0x16d   :  { %v13373_v42 = vpack.c.bf16 %v1053_v41, %v1046_v40  ;;  %v11016_v40 = vld [vmem:[#allocation13] ss:$0 sm:$0xff] }
 0x1ec   :  { %v216_v48 = vpop.xlane.xlu0 %215 }
 0x1ed   :  { %v226_v49 = vmul.f32 0.03125, %v216_v48 }
 0x1ef   :  { %v230_v50 = vadd.f32 1e-05, %v226_v49 }
 0x1f0   :  { %v219_v51 = vpop.xlane.xlu1 %218  ;;  %v222_v52 = vpop.xlane.xlu0 %221 }
 0x1f1   :  { %12660 = vrsqrt.f32 %v230_v50  ;;  %v227_v53 = vmul.f32 0.03125, %v219_v51  ;;  %v228_v58 = vmul.f32 0.03125, %v222_v52 }
 0x1f3   :  { %v231_v55 = vadd.f32 1e-05, %v227_v53  ;;  %v232_v56 = vadd.f32 1e-05, %v228_v58 }
 0x1f4   :  { %v225_v59 = vpop.xlane.xlu1 %224  ;;  %v280_v60 = vpop.xlane.xlu0 %279 }
 0x1f5   :  { %12662 = vrsqrt.f32 %v231_v55  ;;  %v229_v61 = vmul.f32 0.03125, %v225_v59  ;;  %v284_v62 = vmul.f32 0.03125, %v280_v60 }
 0x1f6   :  { %12664 = vrsqrt.f32 %v232_v56 }
 0x1f7   :  { %v233_v63 = vadd.f32 1e-05, %v229_v61  ;;  %v286_v0 = vadd.f32 1e-05, %v284_v62 }
 0x1f8   :  { %v283_v1 = vpop.xlane.xlu1 %282 }
 0x1f9   :  { %12666 = vrsqrt.f32 %v233_v63  ;;  %v285_v2 = vmul.f32 0.03125, %v283_v1 }
 0x1fa   :  { %12668 = vrsqrt.f32 %v286_v0 }
 0x1fb   :  { %v12661_v3 = vpop.eup %12660  ;;  %v287_v4 = vadd.f32 1e-05, %v285_v2 }
 0x1fc   :  { %v238_v6 = vmul.f32 %v12661_v3, %v13301_v16 }
 0x1fd   :  { %12670 = vrsqrt.f32 %v287_v4 }
 0x1fe   :  { %v248_v9 = vmul.f32 %v11013_v5, %v238_v6 }
 0x1ff   :  { %v12663_v11 = vpop.eup %12662 }
 0x200   :  { %v12665_v12 = vpop.eup %12664  ;;  %v239_v13 = vmul.f32 %v12663_v11, %v13309_v24  ;;  %v258_v14 = vadd.f32 %v11014_v8, %v248_v9 }
 0x201   :  { %v240_v15 = vmul.f32 %v12665_v12, %v13303_v17 }
 0x202   :  { %v313_v18 = vsel %vm188_vm0, %v258_v14, 0  ;;  %v249_v20 = vmul.f32 %v11013_v5, %v239_v13 }
 0x203   :  { %v12667_v21 = vpop.eup %12666  ;;  %v13381_v22 = vand.u32 4294901760, %v313_v18  ;;  %v250_v27 = vmul.f32 %v11013_v5, %v240_v15 }
 0x204   :  { %v12669_v28 = vpop.eup %12668  ;;  %v241_v16 = vmul.f32 %v12667_v21, %v13311_v25  ;;  %v259_v32 = vadd.f32 %v11014_v8, %v249_v20 }
 0x205   :  { %v13385_v38 = vsub.f32 %v313_v18, %v13381_v22  ;;  %v290_v24 = vmul.f32 %v12669_v28, %v13319_v34  ;;  %v260_v39 = vadd.f32 %v11014_v8, %v250_v27  ;;  %v1484_v28 = vld [vmem:[%s14364_s9 + $0x10] sm:$0xff] }
 0x206   :  { %v316_v17 = vsel %vm188_vm0, %v259_v32, 0  ;;  %v251_v41 = vmul.f32 %v11013_v5, %v241_v16 }
 0x207   :  { %v12671_v43 = vpop.eup %12670  ;;  %v395_v44 = vand.u32 4294901760, %v13385_v38  ;;  %v298_v45 = vmul.f32 %v11015_v31, %v290_v24  ;;  %v13390_v46 = vand.u32 4294901760, %v316_v17  ;;  %v319_v25 = vsel %vm188_vm0, %v260_v39, 0 }
 0x208   :  { %v13393_v48 = vand.u32 4294901760, %v319_v25  ;;  %v291_v49 = vmul.f32 %v12671_v43, %v13321_v35  ;;  %v261_v50 = vadd.f32 %v11014_v8, %v251_v41 }
 0x209   :  { %v396_v34 = vsub.f32 %v13385_v38, %v395_v44  ;;  %v306_v51 = vadd.f32 %v11016_v40, %v298_v45  ;;  %v13400_v52 = vsub.f32 %v316_v17, %v13390_v46 }
 0x20a   :  { %v13403_v53 = vsub.f32 %v319_v25, %v13393_v48  ;;  %v299_v58 = vmul.f32 %v11015_v31, %v291_v49  ;;  %v322_v55 = vsel %vm188_vm0, %v261_v50, 0  ;;  %v1499_v31 = vand.u32 4294901760, %v1484_v28 }
 0x20b   :  { %v397_v56 = vand.u32 4294901760, %v396_v34  ;;  %v947_v59 = vsel %vm188_vm0, %v306_v51, 0  ;;  %v405_v35 = vand.u32 4294901760, %v13400_v52  ;;  %v13408_v60 = vand.u32 4294901760, %v322_v55 }
 0x20c   :  { %v13410_v61 = vand.u32 4294901760, %v947_v59  ;;  %v415_v62 = vand.u32 4294901760, %v13403_v53  ;;  %v307_v63 = vadd.f32 %v11016_v40, %v299_v58  ;;  %v1596_v25 = vsub.f32 %v1484_v28, %v1499_v31 }
 0x20d   :  { %11493 = vmatprep.mubr.f32.mxu0 %v397_v56  ;;  %v406_v0 = vsub.f32 %v13400_v52, %v405_v35  ;;  %v424_v1 = vsub.f32 %v322_v55, %v13408_v60 }
 0x20e   :  { %v13416_v2 = vsub.f32 %v947_v59, %v13410_v61  ;;  %v416_v3 = vsub.f32 %v13403_v53, %v415_v62  ;;  %v950_v4 = vsel %vm188_vm0, %v307_v63, 0  ;;  %v1597_v49 = vand.u32 4294901760, %v1596_v25 }
 0x20f   :  { %v407_v5 = vand.u32 4294901760, %v406_v0  ;;  %v13420_v6 = vand.u32 4294901760, %v950_v4  ;;  %v425_v8 = vand.u32 4294901760, %v424_v1 }
 0x210   :  { %11599 = vmatprep.mubr.f32.mxu1 %v13416_v2  ;;  %v417_v9 = vand.u32 4294901760, %v416_v3  ;;  %v1023_v13 = vand.u32 4294901760, %v13416_v2  ;;  %v1598_v50 = vsub.f32 %v1596_v25, %v1597_v49 }
 0x211   :  { %11494 = vmatmul.mubr.f32.vlgmr.msra.gmra.mrb[0].mxu0 %v407_v5  ;;  %v13424_v11 = vsub.f32 %v950_v4, %v13420_v6  ;;  %v426_v12 = vsub.f32 %v424_v1, %v425_v8 }
 0x212   :  { %11496 = vmatprep.mubr.f32.mxu0 %v417_v9  ;;  %12264 = vmatpush3.bf16.msra.mxu0 %v13355_v19  ;;  %v1599_v34 = vand.u32 4294901760, %v1598_v50 }
 0x213   :  { %11600 = vmatmul.mubr.f32.vlgmr.msra.gmra.mrb[0].mxu1 %v13424_v11  ;;  %v427_v14 = vand.u32 4294901760, %v426_v12  ;;  %12266 = vmatprep.subr.bf16.mxu0 %v13359_v23  ;;  %v1033_v19 = vand.u32 4294901760, %v13424_v11 }
 0x214   :  { %12328 = vmatpush3.bf16.msra.mxu1 %v13352_v10  ;;  %11610 = vmatprep.mubr.f32.mxu1 %v1023_v13 }
 0x215   :  { %11497 = vmatmul.mubr.f32.gmra.mrb[2].mxu0 %v427_v14  ;;  %12330 = vmatprep.subr.bf16.mxu1 %v13350_v7 }
 0x216   :  { %12268 = vmatpush3.bf16.msra.mxu0 %v13359_v23  ;;  %11507 = vmatprep.mubr.f32.mxu0 %v13381_v22  ;;  %v1024_v23 = vsub.f32 %v13416_v2, %v1023_v13 }
 0x217   :  { %12270 = vmatprep.subr.bf16.mxu0 %v13361_v26 }
 0x218   :  { %12332 = vmatpush3.bf16.msra.mxu1 %v13350_v7 }
 0x219   :  { %11508 = vmatmul.mubr.f32.vlgmr.msra.gmra.mrb[0].mxu0 %v13390_v46  ;;  %12334 = vmatprep.subr.bf16.mxu1 %v13363_v29 }
 0x21a   :  { %11510 = vmatprep.mubr.f32.mxu0 %v13393_v48  ;;  %12272 = vmatpush3.bf16.msra.mxu0 %v13361_v26  ;;  %v1025_v26 = vand.u32 4294901760, %v1024_v23 }
 0x21b   :  { %11611 = vmatmul.mubr.f32.vlgmr.msra.gmra.mrb[0].mxu1 %v1033_v19  ;;  %12274 = vmatprep.subr.bf16.mxu0 %v13365_v30 }
 0x21c   :  { %12336 = vmatpush3.bf16.msra.mxu1 %v13363_v29  ;;  %11621 = vmatprep.mubr.f32.mxu1 %v13410_v61 }
 0x21d   :  { %11511 = vmatmul.mubr.f32.gmra.mrb[2].mxu0 %v13408_v60  ;;  %12338 = vmatprep.subr.bf16.mxu1 %v13367_v33 }
 0x21e   :  { %12276 = vmatpush3.bf16.msra.mxu0 %v13365_v30  ;;  %11521 = vmatprep.mubr.f32.mxu0 %v13385_v38  ;;  %v1482_v30 = vld [vmem:[%s14364_s9] sm:$0xff] }
 0x21f   :  { %12278 = vmatprep.subr.bf16.mxu0 %v13343_v54 }
 0x220   :  { %12340 = vmatpush3.bf16.msra.mxu1 %v13367_v33  ;;  %v1483_v33 = vld [vmem:[%s14364_s9 + $0x8] sm:$0xff]  ;;  %s13043_s9 = smov 120  }
 0x221   :  { %11522 = vmatmul.mubr.f32.vlgmr.msra.gmra.mrb[0].mxu0 %v13400_v52  ;;  %12342 = vmatprep.subr.bf16.mxu1 %v13352_v10 }
 0x222   :  { %11524 = vmatprep.mubr.f32.mxu0 %v13403_v53  ;;  %12280 = vmatpush3.bf16.msra.mxu0 %v13343_v54 }
 0x223   :  { %11622 = vmatmul.mubr.f32.vlgmr.msra.gmra.mrb[0].mxu1 %v13420_v6  ;;  %12282 = vmatprep.subr.bf16.mxu0 %v13345_v57 }
 0x224   :  { %12344 = vmatpush3.bf16.msra.mxu1 %v13352_v10  ;;  %11632 = vmatprep.mubr.f32.mxu1 %v13410_v61 }
 0x225   :  { %11525 = vmatmul.mubr.f32.gmra.mrb[2].mxu0 %v424_v1  ;;  %12346 = vmatprep.subr.bf16.mxu1 %v13350_v7 }
 0x226   :  { %12284 = vmatpush3.bf16.msra.mxu0 %v13345_v57  ;;  %11535 = vmatprep.mubr.f32.mxu0 %v395_v44 }
 0x227   :  { %12286 = vmatprep.subr.bf16.mxu0 %v13369_v36 }
 0x228   :  { %12348 = vmatpush3.bf16.msra.mxu1 %v13350_v7 }
 0x229   :  { %11536 = vmatmul.mubr.f32.vlgmr.msra.gmra.mrb[0].mxu0 %v405_v35 }
 0x22a   :  { %11538 = vmatprep.mubr.f32.mxu0 %v415_v62  ;;  %12288 = vmatpush3.bf16.msra.mxu0 %v13369_v36 }
 0x22b   :  { %11633 = vmatmul.mubr.f32.vlgmr.msra.gmra.mrb[0].mxu1 %v13420_v6  ;;  %12290 = vmatprep.subr.bf16.mxu0 %v13371_v37 }
 0x22d   :  { %11539 = vmatmul.mubr.f32.gmra.mrb[2].mxu0 %v425_v8 }
 0x22e   :  { %12292 = vmatpush3.bf16.msra.mxu0 %v13371_v37  ;;  %11549 = vmatprep.mubr.f32.mxu0 %v13381_v22 }
 0x22f   :  { %12294 = vmatprep.subr.bf16.mxu0 %v13343_v54 }
 0x231   :  { %11550 = vmatmul.mubr.f32.vlgmr.msra.gmra.mrb[0].mxu0 %v13390_v46 }
 0x232   :  { %11552 = vmatprep.mubr.f32.mxu0 %v13393_v48  ;;  %12296 = vmatpush3.bf16.msra.mxu0 %v13343_v54  ;;  %v1034_v54 = vsub.f32 %v13424_v11, %v1033_v19 }
 0x233   :  { %12298 = vmatprep.subr.bf16.mxu0 %v13345_v57 }
 0x235   :  { %11553 = vmatmul.mubr.f32.gmra.mrb[2].mxu0 %v13408_v60 }
 0x236   :  { %12300 = vmatpush3.bf16.msra.mxu0 %v13345_v57  ;;  %11563 = vmatprep.mubr.f32.mxu0 %v13381_v22  ;;  %v1035_v57 = vand.u32 4294901760, %v1034_v54 }
 0x237   :  { %12302 = vmatprep.subr.bf16.mxu0 %v13352_v10 }
 0x239   :  { %11564 = vmatmul.mubr.f32.vlgmr.msra.gmra.mrb[0].mxu0 %v13390_v46 }
 0x23a   :  { %11566 = vmatprep.mubr.f32.mxu0 %v13393_v48  ;;  %12304 = vmatpush3.bf16.msra.mxu0 %v13352_v10  ;;  %v1480_v10 = vld [vmem:[#allocation7] sm:$0xff] }
 0x23b   :  { %12306 = vmatprep.subr.bf16.mxu0 %v13350_v7  ;;  %v1487_v29 = vsel %vm1485_vm1, %v1480_v10, 0 }
 0x23c   :  { %v1560_v36 = vand.u32 4294901760, %v1487_v29 }
 0x23d   :  { %11567 = vmatmul.mubr.f32.gmra.mrb[2].mxu0 %v13408_v60 }
 0x23e   :  { %12308 = vmatpush3.bf16.msra.mxu0 %v13350_v7  ;;  %11577 = vmatprep.mubr.f32.mxu0 %v1025_v26  ;;  %v1481_v7 = vld [vmem:[#allocation7 + $0x8] sm:$0xff]  ;;  %v1561_v18 = vsub.f32 %v1487_v29, %v1560_v36 }
 0x23f   :  { %12310 = vmatprep.subr.bf16.mxu0 %v13373_v42  ;;  %v1490_v37 = vsel %vm1485_vm1, %v1481_v7, 0 }
 0x240   :  { %v1570_v15 = vand.u32 4294901760, %v1490_v37  ;;  %v1562_v16 = vand.u32 4294901760, %v1561_v18 }
 0x241   :  { %11578 = vmatmul.mubr.f32.vlgmr.msra.gmra.mrb[4].mxu0 %v1035_v57 }
 0x242   :  { %12312 = vmatpush3.bf16.msra.mxu0 %v13373_v42  ;;  %11588 = vmatprep.mubr.f32.mxu0 %v13410_v61  ;;  %v1493_v42 = vand.u32 4294901760, %v1482_v30  ;;  %v1571_v21 = vsub.f32 %v1490_v37, %v1570_v15  ;;  %v1563_v39 = vsub.f32 %v1561_v18, %v1562_v16 }
 0x243   :  { %12314 = vmatprep.subr.bf16.mxu0 %v13375_v47 }
 0x244   :  { %v1582_v22 = vsub.f32 %v1482_v30, %v1493_v42  ;;  %v1572_v32 = vand.u32 4294901760, %v1571_v21  ;;  %v1564_v43 = vand.u32 4294901760, %v1563_v39 }
 0x246   :  { %12316 = vmatpush3.bf16.msra.mxu0 %v13375_v47  ;;  %v1496_v47 = vand.u32 4294901760, %v1483_v33  ;;  %v1583_v38 = vand.u32 4294901760, %v1582_v22  ;;  %v1573_v40 = vsub.f32 %v1571_v21, %v1572_v32  ;;  %11641 = vmatprep.mubr.f32.mxu1 %v1564_v43 }
 0x248   :  { %v12349_v20 = vpack.c.bf16 %v1496_v47, %v1493_v42  ;;  %v1589_v27 = vsub.f32 %v1483_v33, %v1496_v47  ;;  %v1584_v17 = vsub.f32 %v1582_v22, %v1583_v38  ;;  %v1574_v44 = vand.u32 4294901760, %v1573_v40 }
 0x249   :  { %11589 = vmatmul.mubr.f32.vlgmr.msra.gmra.mrb[4].mxu0 %v13420_v6 }
 0x24a   :  { %12350 = vmatprep.subr.bf16.mxu1 %v12349_v20  ;;  %v1590_v24 = vand.u32 4294901760, %v1589_v27  ;;  %v1585_v45 = vand.u32 4294901760, %v1584_v17  ;;  %v12357_v51 = vpack.c.bf16 %v1589_v27, %v1582_v22 }
 0x24b   :  { %12352 = vmatpush3.bf16.msra.mxu1 %v12349_v20 }
 0x24c   :  { %11639 = vmatprep.subr.mxu1 %v1499_v31  ;;  %v1591_v41 = vsub.f32 %v1589_v27, %v1590_v24  ;;  %v12365_v52 = vpack.c.bf16 %v1590_v24, %v1583_v38 }
 0x24e   :  { %v1592_v46 = vand.u32 4294901760, %v1591_v41 }
 0x24f   :  { %11640 = vmatpush3.msra.mxu1 %v1499_v31 }
 0x250   :  { %11642 = vmatmul.mubr.f32.vlgmr.msra.gmra.mrb[2].mxu1 %v1574_v44  ;;  %v12353_v48 = vpack.c.bf16 %v1592_v46, %v1585_v45 }
 0x251   :  { %11650 = vmatprep.mubr.f32.mxu1 %v1560_v36 }
 0x252   :  { %12354 = vmatprep.subr.bf16.mxu1 %v12353_v48 }
 0x253   :  { %12356 = vmatpush3.bf16.msra.mxu1 %v12353_v48 }
 0x254   :  { %11648 = vmatprep.subr.mxu1 %v1599_v34 }
 0x257   :  { %11649 = vmatpush3.msra.mxu1 %v1599_v34 }
 0x258   :  { %11651 = vmatmul.mubr.f32.vlgmr.msra.gmra.mrb[2].mxu1 %v1570_v15  ;;  %12358 = vmatprep.subr.bf16.mxu1 %v12357_v51 }
 0x259   :  { %11659 = vmatprep.mubr.f32.mxu1 %v1561_v18  ;;  %12360 = vmatpush3.bf16.msra.mxu1 %v12357_v51 }
 0x25a   :  { %11657 = vmatprep.subr.mxu1 %v1596_v25 }
 0x25d   :  { %11658 = vmatpush3.msra.mxu1 %v1596_v25 }
 0x25e   :  { %12362 = vmatprep.subr.bf16.mxu1 %v12349_v20 }
 0x260   :  { %11660 = vmatmul.mubr.f32.vlgmr.msra.gmra.mrb[2].mxu1 %v1571_v21 }
 0x261   :  { %12364 = vmatpush3.bf16.msra.mxu1 %v12349_v20  ;;  %11668 = vmatprep.mubr.f32.mxu1 %v1562_v16 }
 0x262   :  { %11666 = vmatprep.subr.mxu1 %v1499_v31 }
 0x265   :  { %11667 = vmatpush3.msra.mxu1 %v1499_v31 }
 0x266   :  { %12366 = vmatprep.subr.bf16.mxu1 %v12365_v52 }
 0x268   :  { %11669 = vmatmul.mubr.f32.vlgmr.msra.gmra.mrb[2].mxu1 %v1572_v32 }
 0x269   :  { %12368 = vmatpush3.bf16.msra.mxu1 %v12365_v52  ;;  %11677 = vmatprep.mubr.f32.mxu1 %v1560_v36 }
 0x26a   :  { %11675 = vmatprep.subr.mxu1 %v1597_v49 }
 0x26d   :  { %11676 = vmatpush3.msra.mxu1 %v1597_v49 }
 0x26e   :  { %12370 = vmatprep.subr.bf16.mxu1 %v12349_v20 }
 0x270   :  { %11678 = vmatmul.mubr.f32.vlgmr.msra.gmra.mrb[2].mxu1 %v1570_v15 }
 0x271   :  { %12372 = vmatpush3.bf16.msra.mxu1 %v12349_v20  ;;  %11686 = vmatprep.mubr.f32.mxu1 %v1560_v36 }
 0x272   :  { %11684 = vmatprep.subr.mxu1 %v1499_v31 }
 0x275   :  { %11685 = vmatpush3.msra.mxu1 %v1499_v31 }
 0x278   :  { %11687 = vmatmul.mubr.f32.vlgmr.msra.gmra.mrb[2].mxu1 %v1570_v15 }
 0x2fe   :  { %v11634_v53 = vpop.f32.mrb[0].mxu1 }
 0x2ff   :  { %v1470_v58 = vpop.f32.mrb[1].mxu1 }
 0x30c   :  { %v11565_v55 = vpop.f32.mrb[0].mxu0 }
 0x30d   :  { %v939_v56 = vmul.f32 0.17677669, %v11565_v55  ;;  %v916_v59 = vpop.f32.mrb[1].mxu0 }
 0x30e   :  { %v938_v35 = vmul.f32 0.17677669, %v916_v59 }
 0x30f   :  { %2013 = vrot.lane.b32.xlu1 %v939_v56, %s13043_s9  ;;  %v2072_v1 = vsel %vm2069_vm2, %v939_v56, 0 }
 0x310   :  { %v2070_v60 = vsel %vm2069_vm2, %v938_v35, 0  ;;  %2011 = vrot.lane.b32.xlu0 %v938_v35, %s13043_s9  ;;  %v11568_v61 = vpop.f32.mrb[2].mxu0  ;;  %v13511_v4 = vand.u32 4294901760, %v2072_v1 }
 0x311   :  { %v13506_v62 = vand.u32 4294901760, %v2070_v60  ;;  %v941_v63 = vmul.f32 0.17677669, %v11568_v61  ;;  %v928_v0 = vpop.f32.mrb[3].mxu0 }
 0x312   :  { %v2153_v8 = vsub.f32 %v2072_v1, %v13511_v4  ;;  %v940_v9 = vmul.f32 0.17677669, %v928_v0 }
 0x313   :  { %v2143_v2 = vsub.f32 %v2070_v60, %v13506_v62  ;;  %v2567_v37 = vsel %vm2069_vm2, %v941_v63, 0 }
 0x314   :  { %2017 = vrot.lane.b32.xlu0 %v941_v63, %s13043_s9  ;;  %v2154_v19 = vand.u32 4294901760, %v2153_v8  ;;  %v2565_v33 = vsel %vm2069_vm2, %v940_v9, 0  ;;  %v2647_v15 = vand.u32 4294901760, %v2567_v37 }
 0x315   :  { %v2144_v3 = vand.u32 4294901760, %v2143_v2  ;;  %v2637_v42 = vand.u32 4294901760, %v2565_v33 }
 0x316   :  { %v2155_v26 = vsub.f32 %v2153_v8, %v2154_v19  ;;  %v2648_v21 = vsub.f32 %v2567_v37, %v2647_v15 }
 0x317   :  { %v2145_v5 = vsub.f32 %v2143_v2, %v2144_v3  ;;  %v2638_v18 = vsub.f32 %v2565_v33, %v2637_v42 }
 0x318   :  { %2019 = vrot.lane.b32.xlu0 %v938_v35, %s13044_s8  ;;  %v2156_v29 = vand.u32 4294901760, %v2155_v26  ;;  %v2649_v28 = vand.u32 4294901760, %v2648_v21 }
 0x319   :  { %v2146_v6 = vand.u32 4294901760, %v2145_v5  ;;  %v2639_v22 = vand.u32 4294901760, %v2638_v18 }
 0x31a   :  { %v2650_v32 = vsub.f32 %v2648_v21, %v2649_v28 }
 0x31b   :  { %11691 = vmatprep.mubr.f32.mxu0 %v2146_v6  ;;  %v2640_v16 = vsub.f32 %v2638_v18, %v2639_v22 }
 0x31c   :  { %2023 = vrot.lane.b32.xlu0 %v940_v9, %s13044_s8  ;;  %v11590_v11 = vpop.f32.mrb[4].mxu0  ;;  %v2651_v39 = vand.u32 4294901760, %v2650_v32 }
 0x31d   :  { %v12421_v12 = vadd.f32 %v11634_v53, %v11590_v11  ;;  %v1128_v13 = vpop.f32.mrb[5].mxu0  ;;  %v2641_v38 = vand.u32 4294901760, %v2640_v16 }
 0x31e   :  { %v12422_v14 = vadd.f32 %v1470_v58, %v1128_v13 }
 0x31f   :  { %v2569_v36 = vsel %vm2069_vm2, %v12421_v12, 0 }
 0x320   :  { %v2074_v23 = vsel %vm2069_vm2, %v12422_v14, 0  ;;  %2041 = vrot.lane.b32.xlu0 %v12422_v14, %s13044_s8  ;;  %2037 = vrot.lane.b32.xlu1 %v12422_v14, %s13043_s9  ;;  %v2572_v47 = vand.u32 4294901760, %v2569_v36 }
 0x321   :  { %v2077_v54 = vand.u32 4294901760, %v2074_v23 }
 0x322   :  { %v2659_v20 = vsub.f32 %v2569_v36, %v2572_v47 }
 0x323   :  { %v2164_v57 = vsub.f32 %v2074_v23, %v2077_v54  ;;  %11689 = vmatprep.subr.mxu0 %v2077_v54 }
 0x324   :  { %2027 = vrot.lane.b32.xlu0 %v938_v35, %s13045_s23  ;;  %2015 = vrot.lane.b32.xlu1 %v940_v9, %s13043_s9  ;;  %v2660_v27 = vand.u32 4294901760, %v2659_v20 }
 0x325   :  { %11690 = vmatpush3.xpose.msra.mxu0 %v2077_v54  ;;  %v2165_v10 = vand.u32 4294901760, %v2164_v57 }
 0x326   :  { %v2661_v31 = vsub.f32 %v2659_v20, %v2660_v27 }
 0x327   :  { %v2166_v7 = vsub.f32 %v2164_v57, %v2165_v10 }
 0x328   :  { %11692 = vmatmul.mubr.f32.vlgmr.msra.gmra.mrb[6].mxu0 %v2156_v29  ;;  %2031 = vrot.lane.b32.xlu0 %v940_v9, %s13045_s23  ;;  %v2662_v24 = vand.u32 4294901760, %v2661_v31 }
 0x329   :  { %2039 = vrot.lane.b32.xlu1 %v12421_v12, %s13043_s9  ;;  %11696 = vmatprep.mubr.f32.mxu0 %v13506_v62  ;;  %v2167_v30 = vand.u32 4294901760, %v2166_v7 }
 0x32b   :  { %11694 = vmatprep.subr.mxu0 %v2167_v30 }
 0x32c   :  { %2045 = vrot.lane.b32.xlu0 %v12422_v14, %s13045_s23  ;;  %11695 = vmatpush3.xpose.msra.mxu0 %v2167_v30 }
 0x32d   :  { %2021 = vrot.lane.b32.xlu1 %v939_v56, %s13044_s8  ;;  %11699 = vmatprep.subr.mxu0 %v2164_v57 }
 0x330   :  { %11697 = vmatmul.mubr.f32.vlgmr.msra.gmra.mrb[6].mxu0 %v13511_v4 }
 0x331   :  { %2025 = vrot.lane.b32.xlu1 %v941_v63, %s13044_s8  ;;  %11700 = vmatpush3.xpose.msra.mxu0 %v2164_v57 }
 0x332   :  { %11701 = vmatprep.mubr.f32.mxu0 %v2143_v2  ;;  %11704 = vmatprep.subr.mxu0 %v2077_v54 }
 0x335   :  { %2043 = vrot.lane.b32.xlu1 %v12421_v12, %s13044_s8 }
 0x338   :  { %11702 = vmatmul.mubr.f32.vlgmr.msra.gmra.mrb[6].mxu0 %v2153_v8 }
 0x339   :  { %11705 = vmatpush3.xpose.msra.mxu0 %v2077_v54  ;;  %2029 = vrot.lane.b32.xlu1 %v939_v56, %s13045_s23 }
 0x33a   :  { %11706 = vmatprep.mubr.f32.mxu0 %v2144_v3  ;;  %11709 = vmatprep.subr.mxu0 %v2165_v10 }
 0x33d   :  { %2033 = vrot.lane.b32.xlu1 %v941_v63, %s13045_s23 }
 0x340   :  { %11707 = vmatmul.mubr.f32.vlgmr.msra.gmra.mrb[6].mxu0 %v2154_v19 }
 0x341   :  { %11710 = vmatpush3.xpose.msra.mxu0 %v2165_v10  ;;  %2047 = vrot.lane.b32.xlu1 %v12421_v12, %s13045_s23 }
 0x342   :  { %11711 = vmatprep.mubr.f32.mxu0 %v13506_v62  ;;  %11714 = vmatprep.subr.mxu0 %v2077_v54 }
 0x348   :  { %11712 = vmatmul.mubr.f32.vlgmr.msra.gmra.mrb[6].mxu0 %v13511_v4 }
 0x349   :  { %11715 = vmatpush3.xpose.msra.mxu0 %v2077_v54  ;;  %11716 = vmatprep.mubr.f32.mxu0 %v13506_v62 }
 0x34a   :  { %11719 = vmatprep.subr.mxu0 %v2572_v47 }
 0x350   :  { %11717 = vmatmul.mubr.f32.vlgmr.msra.gmra.mrb[6].mxu0 %v13511_v4 }
 0x351   :  { %11720 = vmatpush3.xpose.msra.mxu0 %v2572_v47  ;;  %11721 = vmatprep.mubr.f32.mxu0 %v2641_v38 }
 0x352   :  { %11724 = vmatprep.subr.mxu0 %v2662_v24 }
 0x354   :  { %11722 = vmatmul.mubr.f32.vlgmr.msra.gmra.mrb[8].mxu0 %v2651_v39 }
 0x355   :  { %11725 = vmatpush3.xpose.msra.mxu0 %v2662_v24  ;;  %11726 = vmatprep.mubr.f32.mxu0 %v2637_v42 }
 0x356   :  { %11729 = vmatprep.subr.mxu0 %v2659_v20 }
 0x35c   :  { %11727 = vmatmul.mubr.f32.vlgmr.msra.gmra.mrb[8].mxu0 %v2647_v15 }
 0x35d   :  { %11730 = vmatpush3.xpose.msra.mxu0 %v2659_v20  ;;  %11731 = vmatprep.mubr.f32.mxu0 %v2638_v18 }
 0x35e   :  { %11734 = vmatprep.subr.mxu0 %v2572_v47 }
 0x364   :  { %11732 = vmatmul.mubr.f32.vlgmr.msra.gmra.mrb[8].mxu0 %v2648_v21 }
 0x365   :  { %11735 = vmatpush3.xpose.msra.mxu0 %v2572_v47  ;;  %11736 = vmatprep.mubr.f32.mxu0 %v2639_v22 }
 0x366   :  { %11739 = vmatprep.subr.mxu0 %v2660_v27 }
 0x36c   :  { %11737 = vmatmul.mubr.f32.vlgmr.msra.gmra.mrb[8].mxu0 %v2649_v28 }
 0x36d   :  { %11740 = vmatpush3.xpose.msra.mxu0 %v2660_v27  ;;  %11741 = vmatprep.mubr.f32.mxu0 %v2637_v42 }
 0x36e   :  { %11744 = vmatprep.subr.mxu0 %v2572_v47 }
 0x374   :  { %11742 = vmatmul.mubr.f32.vlgmr.msra.gmra.mrb[8].mxu0 %v2647_v15 }
 0x375   :  { %11745 = vmatpush3.xpose.msra.mxu0 %v2572_v47  ;;  %11746 = vmatprep.mubr.f32.mxu0 %v2637_v42 }
 0x37c   :  { %11747 = vmatmul.mubr.f32.vlgmr.msra.gmra.mrb[8].mxu0 %v2647_v15 }
 0x381   :  { %v2014_v40 = vpop.permute.xlu1 %2013 }
 0x382   :  { %v2012_v17 = vpop.permute.xlu0 %2011  ;;  %v3062_v44 = vsel %vm2069_vm2, %v2014_v40, 0 }
 0x383   :  { %v3060_v41 = vsel %vm2069_vm2, %v2012_v17, 0  ;;  %v13547_v46 = vand.u32 4294901760, %v3062_v44 }
 0x384   :  { %v13540_v43 = vand.u32 4294901760, %v3060_v41 }
 0x385   :  { %v13552_v50 = vsub.f32 %v3062_v44, %v13547_v46 }
 0x386   :  { %v13544_v45 = vsub.f32 %v3060_v41, %v13540_v43  ;;  %11756 = vmatprep.mubr.f32.mxu1 %v13540_v43  ;;  %v2018_v49 = vpop.permute.xlu0 %2017 }
 0x387   :  { %v3557_v51 = vsel %vm2069_vm2, %v2018_v49, 0  ;;  %v3144_v52 = vand.u32 4294901760, %v13552_v50 }
 0x388   :  { %v3134_v25 = vand.u32 4294901760, %v13544_v45  ;;  %v13556_v53 = vand.u32 4294901760, %v3557_v51 }
 0x389   :  { %v3145_v56 = vsub.f32 %v13552_v50, %v3144_v52 }
 0x38a   :  { %v3135_v48 = vsub.f32 %v13544_v45, %v3134_v25  ;;  %v13565_v35 = vsub.f32 %v3557_v51, %v13556_v53  ;;  %v2020_v54 = vpop.permute.xlu0 %2019 }
 0x38b   :  { %v3146_v63 = vand.u32 4294901760, %v3145_v56  ;;  %v4050_v36 = vsel %vm2069_vm2, %v2020_v54, 0 }
 0x38c   :  { %v3136_v34 = vand.u32 4294901760, %v3135_v48  ;;  %v3639_v2 = vand.u32 4294901760, %v13565_v35  ;;  %v13595_v47 = vand.u32 4294901760, %v4050_v36 }
 0x38e   :  { %11751 = vmatprep.mubr.f32.mxu0 %v3136_v34  ;;  %v3640_v9 = vsub.f32 %v13565_v35, %v3639_v2  ;;  %v2024_v29 = vpop.permute.xlu0 %2023  ;;  %v13608_v21 = vsub.f32 %v4050_v36, %v13595_v47 }
 0x38f   :  { %v4545_v22 = vsel %vm2069_vm2, %v2024_v29, 0 }
 0x390   :  { %v3641_v23 = vand.u32 4294901760, %v3640_v9  ;;  %v13616_v31 = vand.u32 4294901760, %v4545_v22  ;;  %v4124_v38 = vand.u32 4294901760, %v13608_v21 }
 0x392   :  { %v2038_v58 = vpop.permute.xlu1 %2037  ;;  %v2042_v30 = vpop.permute.xlu0 %2041  ;;  %v13634_v41 = vsub.f32 %v4545_v22, %v13616_v31 }
 0x393   :  { %v3064_v55 = vsel %vm2069_vm2, %v2038_v58, 0  ;;  %v4054_v37 = vsel %vm2069_vm2, %v2042_v30, 0 }
 0x394   :  { %v13562_v59 = vand.u32 4294901760, %v3064_v55  ;;  %v13597_v15 = vand.u32 4294901760, %v4054_v37  ;;  %v4619_v49 = vand.u32 4294901760, %v13634_v41 }
 0x396   :  { %v3154_v60 = vsub.f32 %v3064_v55, %v13562_v59  ;;  %v2016_v61 = vpop.permute.xlu1 %2015  ;;  %11749 = vmatprep.subr.mxu0 %v13562_v59  ;;  %v4144_v27 = vsub.f32 %v4054_v37, %v13597_v15 }
 0x397   :  { %v3555_v62 = vsel %vm2069_vm2, %v2016_v61, 0  ;;  %11750 = vmatpush3.xpose.msra.mxu0 %v13562_v59 }
 0x398   :  { %v13571_v0 = vand.u32 4294901760, %v3555_v62  ;;  %v3155_v1 = vand.u32 4294901760, %v3154_v60  ;;  %v13625_v39 = vand.u32 4294901760, %v4144_v27 }
 0x39a   :  { %v3628_v3 = vsub.f32 %v3555_v62, %v13571_v0  ;;  %11752 = vmatmul.mubr.f32.vlgmr.msra.gmra.mrb[10].mxu0 %v3146_v63  ;;  %v3156_v4 = vsub.f32 %v3154_v60, %v3155_v1  ;;  %v2028_v62 = vpop.permute.xlu0 %2027 }
 0x39b   :  { %v2040_v5 = vpop.permute.xlu1 %2039 }
 0x39c   :  { %v3629_v6 = vand.u32 4294901760, %v3628_v3  ;;  %v3559_v8 = vsel %vm2069_vm2, %v2040_v5, 0  ;;  %v3157_v12 = vand.u32 4294901760, %v3156_v4 }
 0x39d   :  { %v13579_v11 = vand.u32 4294901760, %v3559_v8 }
 0x39e   :  { %v3630_v13 = vsub.f32 %v3628_v3, %v3629_v6  ;;  %11754 = vmatprep.subr.mxu1 %v3157_v12 }
 0x39f   :  { %v3649_v14 = vsub.f32 %v3559_v8, %v13579_v11  ;;  %11779 = vmatprep.subr.mxu0 %v13579_v11  ;;  %11755 = vmatpush3.xpose.msra.mxu1 %v3157_v12  ;;  %v2022_v7 = vpop.permute.xlu1 %2021 }
 0x3a0   :  { %11780 = vmatpush3.xpose.msra.mxu0 %v13579_v11  ;;  %v3631_v19 = vand.u32 4294901760, %v3630_v13  ;;  %11759 = vmatprep.subr.mxu1 %v3154_v60  ;;  %v4052_v42 = vsel %vm2069_vm2, %v2022_v7, 0 }
 0x3a1   :  { %v3650_v26 = vand.u32 4294901760, %v3649_v14  ;;  %v13603_v18 = vand.u32 4294901760, %v4052_v42 }
 0x3a2   :  { %11781 = vmatprep.mubr.f32.mxu0 %v3631_v19  ;;  %11757 = vmatmul.mubr.f32.vlgmr.msra.gmra.mrb[4].mxu1 %v13547_v46 }
 0x3a3   :  { %11782 = vmatmul.mubr.f32.vlgmr.msra.gmra.mrb[12].mxu0 %v3641_v23  ;;  %v3651_v57 = vsub.f32 %v3649_v14, %v3650_v26  ;;  %11760 = vmatpush3.xpose.msra.mxu1 %v3154_v60  ;;  %v2026_v33 = vpop.permute.xlu1 %2025  ;;  %v13614_v16 = vsub.f32 %v4052_v42, %v13603_v18 }
 0x3a4   :  { %11761 = vmatprep.mubr.f32.mxu1 %v13544_v45  ;;  %11764 = vmatprep.subr.mxu1 %v13562_v59  ;;  %v4547_v32 = vsel %vm2069_vm2, %v2026_v33, 0  ;;  %v4125_v45 = vsub.f32 %v13608_v21, %v4124_v38 }
 0x3a5   :  { %11786 = vmatprep.mubr.f32.mxu0 %v13571_v0  ;;  %v3652_v10 = vand.u32 4294901760, %v3651_v57  ;;  %v4134_v40 = vand.u32 4294901760, %v13614_v16  ;;  %v13630_v17 = vand.u32 4294901760, %v4547_v32 }
 0x3a7   :  { %11784 = vmatprep.subr.mxu0 %v3652_v10  ;;  %v2044_v20 = vpop.permute.xlu1 %2043  ;;  %v13645_v48 = vsub.f32 %v4547_v32, %v13630_v17 }
 0x3a8   :  { %11785 = vmatpush3.xpose.msra.mxu0 %v3652_v10  ;;  %v4549_v28 = vsel %vm2069_vm2, %v2044_v20, 0 }
 0x3a9   :  { %11789 = vmatprep.subr.mxu0 %v3649_v14  ;;  %v13620_v24 = vand.u32 4294901760, %v4549_v28  ;;  %v4629_v55 = vand.u32 4294901760, %v13645_v48 }
 0x3aa   :  { %11762 = vmatmul.mubr.f32.vlgmr.msra.gmra.mrb[4].mxu1 %v13552_v50  ;;  %v4126_v50 = vand.u32 4294901760, %v4125_v45 }
 0x3ab   :  { %11787 = vmatmul.mubr.f32.vlgmr.msra.gmra.mrb[12].mxu0 %v13556_v53  ;;  %11765 = vmatpush3.xpose.msra.mxu1 %v13562_v59  ;;  %v4639_v44 = vsub.f32 %v4549_v28, %v13620_v24 }
 0x3ac   :  { %11766 = vmatprep.mubr.f32.mxu1 %v3134_v25  ;;  %11769 = vmatprep.subr.mxu1 %v3155_v1  ;;  %v4135_v25 = vsub.f32 %v13614_v16, %v4134_v40 }
 0x3ad   :  { %11790 = vmatpush3.xpose.msra.mxu0 %v3649_v14  ;;  %11791 = vmatprep.mubr.f32.mxu0 %v3628_v3  ;;  %v13650_v51 = vand.u32 4294901760, %v4639_v44  ;;  %v5040_v3 = vsel %vm2069_vm2, %v2028_v62, 0 }
 0x3ae   :  { %11794 = vmatprep.subr.mxu0 %v13579_v11  ;;  %v4136_v58 = vand.u32 4294901760, %v4135_v25 }
 0x3b2   :  { %11767 = vmatmul.mubr.f32.vlgmr.msra.gmra.mrb[4].mxu1 %v3144_v52  ;;  %v13654_v52 = vpop.f32.mrb[2].mxu1 }
 0x3b3   :  { %11792 = vmatmul.mubr.f32.vlgmr.msra.gmra.mrb[12].mxu0 %v13565_v35  ;;  %11770 = vmatpush3.xpose.msra.mxu1 %v3155_v1  ;;  %v13657_v56 = vpop.f32.mrb[3].mxu1  ;;  %v4630_v35 = vsub.f32 %v13645_v48, %v4629_v55 }
 0x3b4   :  { %11771 = vmatprep.mubr.f32.mxu1 %v13540_v43  ;;  %11774 = vmatprep.subr.mxu1 %v13562_v59 }
 0x3b5   :  { %11795 = vmatpush3.xpose.msra.mxu0 %v13579_v11  ;;  %11796 = vmatprep.mubr.f32.mxu0 %v3629_v6  ;;  %v4631_v63 = vand.u32 4294901760, %v4630_v35  ;;  %v13684_v6 = vand.u32 4294901760, %v5040_v3 }
 0x3b6   :  { %11799 = vmatprep.subr.mxu0 %v3650_v26 }
 0x3b7   :  { %v13701_v12 = vsub.f32 %v5040_v3, %v13684_v6 }
 0x3b9   :  { %v5114_v57 = vand.u32 4294901760, %v13701_v12 }
 0x3ba   :  { %11772 = vmatmul.mubr.f32.vlgmr.msra.gmra.mrb[4].mxu1 %v13547_v46 }
 0x3bb   :  { %11797 = vmatmul.mubr.f32.vlgmr.msra.gmra.mrb[12].mxu0 %v3639_v2  ;;  %11775 = vmatpush3.xpose.msra.mxu1 %v13562_v59  ;;  %v4641_v59 = vsub.f32 %v4639_v44, %v13650_v51  ;;  %v5115_v37 = vsub.f32 %v13701_v12, %v5114_v57 }
 0x3bc   :  { %11776 = vmatprep.mubr.f32.mxu1 %v13540_v43  ;;  %11800 = vmatpush3.xpose.msra.mxu0 %v3650_v26  ;;  %v4146_v43 = vsub.f32 %v4144_v27, %v13625_v39 }
 0x3bd   :  { %11809 = vmatprep.subr.mxu1 %v13597_v15  ;;  %11801 = vmatprep.mubr.f32.mxu0 %v13571_v0  ;;  %v4642_v61 = vand.u32 4294901760, %v4641_v59 }
 0x3be   :  { %11804 = vmatprep.subr.mxu0 %v13579_v11  ;;  %v4147_v34 = vand.u32 4294901760, %v4146_v43 }
 0x3c2   :  { %11777 = vmatmul.mubr.f32.vlgmr.msra.gmra.mrb[4].mxu1 %v13547_v46  ;;  %v4620_v46 = vsub.f32 %v13634_v41, %v4619_v49 }
 0x3c3   :  { %11802 = vmatmul.mubr.f32.vlgmr.msra.gmra.mrb[12].mxu0 %v13556_v53  ;;  %11810 = vmatpush3.xpose.msra.mxu1 %v13597_v15 }
 0x3c4   :  { %11805 = vmatpush3.xpose.msra.mxu0 %v13579_v11  ;;  %11811 = vmatprep.mubr.f32.mxu1 %v4126_v50  ;;  %v4621_v60 = vand.u32 4294901760, %v4620_v46 }
 0x3c5   :  { %11814 = vmatprep.subr.mxu1 %v4147_v34  ;;  %11806 = vmatprep.mubr.f32.mxu0 %v13571_v0  ;;  %v2030_v0 = vpop.permute.xlu1 %2029 }
 0x3c6   :  { %11839 = vmatprep.subr.mxu0 %v13620_v24  ;;  %11812 = vmatmul.mubr.f32.vlgmr.msra.gmra.mrb[6].mxu1 %v4136_v58  ;;  %v5042_v5 = vsel %vm2069_vm2, %v2030_v0, 0 }
 0x3c7   :  { %11815 = vmatpush3.xpose.msra.mxu1 %v4147_v34  ;;  %11816 = vmatprep.mubr.f32.mxu1 %v13595_v47  ;;  %v13693_v9 = vand.u32 4294901760, %v5042_v5 }
 0x3c8   :  { %11819 = vmatprep.subr.mxu1 %v4144_v27 }
 0x3c9   :  { %v2034_v2 = vpop.permute.xlu1 %2033  ;;  %v13707_v23 = vsub.f32 %v5042_v5, %v13693_v9 }
 0x3ca   :  { %v5537_v26 = vsel %vm2069_vm2, %v2034_v2, 0 }
 0x3cb   :  { %11807 = vmatmul.mubr.f32.vlgmr.msra.gmra.mrb[12].mxu0 %v13556_v53  ;;  %v2032_v53 = vpop.permute.xlu0 %2031  ;;  %v5124_v7 = vand.u32 4294901760, %v13707_v23  ;;  %v13721_v30 = vand.u32 4294901760, %v5537_v26 }
 0x3cc   :  { %11840 = vmatpush3.xpose.msra.mxu0 %v13620_v24  ;;  %11841 = vmatprep.mubr.f32.mxu0 %v4621_v60  ;;  %v5535_v13 = vsel %vm2069_vm2, %v2032_v53, 0 }
 0x3cd   :  { %11844 = vmatprep.subr.mxu0 %v4642_v61  ;;  %v2048_v11 = vpop.permute.xlu1 %2047  ;;  %v13709_v54 = vand.u32 4294901760, %v5535_v13 }
 0x3ce   :  { %11817 = vmatmul.mubr.f32.vlgmr.msra.gmra.mrb[6].mxu1 %v13603_v18  ;;  %v5539_v19 = vsel %vm2069_vm2, %v2048_v11, 0 }
 0x3cf   :  { %11842 = vmatmul.mubr.f32.vlgmr.msra.gmra.mrb[14].mxu0 %v4631_v63  ;;  %11820 = vmatpush3.xpose.msra.mxu1 %v4144_v27  ;;  %v2046_v1 = vpop.permute.xlu0 %2045  ;;  %v13713_v10 = vand.u32 4294901760, %v5539_v19  ;;  %v5608_v33 = vsub.f32 %v5535_v13, %v13709_v54 }
 0x3d0   :  { %11821 = vmatprep.mubr.f32.mxu1 %v13608_v21  ;;  %11824 = vmatprep.subr.mxu1 %v13597_v15  ;;  %v5044_v4 = vsel %vm2069_vm2, %v2046_v1, 0  ;;  %v5116_v21 = vand.u32 4294901760, %v5115_v37 }
 0x3d1   :  { %11845 = vmatpush3.xpose.msra.mxu0 %v4642_v61  ;;  %11846 = vmatprep.mubr.f32.mxu0 %v13616_v31  ;;  %v13686_v8 = vand.u32 4294901760, %v5044_v4  ;;  %v5629_v36 = vsub.f32 %v5539_v19, %v13713_v10  ;;  %v5609_v20 = vand.u32 4294901760, %v5608_v33 }
 0x3d2   :  { %11849 = vmatprep.subr.mxu0 %v4639_v44 }
 0x3d3   :  { %v5134_v14 = vsub.f32 %v5044_v4, %v13686_v8  ;;  %v5630_v27 = vand.u32 4294901760, %v5629_v36  ;;  %v5610_v32 = vsub.f32 %v5608_v33, %v5609_v20 }
 0x3d5   :  { %v5135_v29 = vand.u32 4294901760, %v5134_v14 }
 0x3d6   :  { %11822 = vmatmul.mubr.f32.vlgmr.msra.gmra.mrb[6].mxu1 %v13614_v16 }
 0x3d7   :  { %11847 = vmatmul.mubr.f32.vlgmr.msra.gmra.mrb[14].mxu0 %v13630_v17  ;;  %11825 = vmatpush3.xpose.msra.mxu1 %v13597_v15  ;;  %v5136_v42 = vsub.f32 %v5134_v14, %v5135_v29 }
 0x3d8   :  { %11826 = vmatprep.mubr.f32.mxu1 %v4124_v38  ;;  %11829 = vmatprep.subr.mxu1 %v13625_v39 }
 0x3d9   :  { %11850 = vmatpush3.xpose.msra.mxu0 %v4639_v44  ;;  %11851 = vmatprep.mubr.f32.mxu0 %v13634_v41  ;;  %v5137_v22 = vand.u32 4294901760, %v5136_v42  ;;  %v13760_v41 = vand.u32 4294901760, %v13654_v52 }
 0x3da   :  { %11854 = vmatprep.subr.mxu0 %v13620_v24 }
 0x3db   :  { %v13771_v45 = vsub.f32 %v13654_v52, %v13760_v41 }
 0x3dd   :  { %v13778_v25 = vand.u32 4294901760, %v13771_v45 }
 0x3de   :  { %11827 = vmatmul.mubr.f32.vlgmr.msra.gmra.mrb[6].mxu1 %v4134_v40 }
 0x3df   :  { %11852 = vmatmul.mubr.f32.vlgmr.msra.gmra.mrb[14].mxu0 %v13645_v48  ;;  %11830 = vmatpush3.xpose.msra.mxu1 %v13625_v39  ;;  %v5611_v39 = vand.u32 4294901760, %v5610_v32 }
 0x3e0   :  { %11831 = vmatprep.mubr.f32.mxu1 %v13595_v47  ;;  %11834 = vmatprep.subr.mxu1 %v13597_v15 }
 0x3e1   :  { %11855 = vmatpush3.xpose.msra.mxu0 %v13620_v24  ;;  %11856 = vmatprep.mubr.f32.mxu0 %v4619_v49  ;;  %v6829_v49 = vsub.f32 %v13771_v45, %v13778_v25 }
 0x3e2   :  { %11859 = vmatprep.subr.mxu0 %v13650_v51 }
 0x3e3   :  { %v13791_v50 = vand.u32 4294901760, %v6829_v49 }
 0x3e6   :  { %11832 = vmatmul.mubr.f32.vlgmr.msra.gmra.mrb[6].mxu1 %v13603_v18 }
 0x3e7   :  { %11857 = vmatmul.mubr.f32.vlgmr.msra.gmra.mrb[14].mxu0 %v4629_v55  ;;  %11835 = vmatpush3.xpose.msra.mxu1 %v13597_v15  ;;  %v5618_v15 = vsub.f32 %v5537_v26, %v13721_v30 }
 0x3e8   :  { %11836 = vmatprep.mubr.f32.mxu1 %v13595_v47  ;;  %11860 = vmatpush3.xpose.msra.mxu0 %v13650_v51  ;;  %v5125_v47 = vsub.f32 %v13707_v23, %v5124_v7 }
 0x3e9   :  { %11869 = vmatprep.subr.mxu1 %v13686_v8  ;;  %11861 = vmatprep.mubr.f32.mxu0 %v13616_v31  ;;  %v5619_v16 = vand.u32 4294901760, %v5618_v15 }
 0x3ea   :  { %11864 = vmatprep.subr.mxu0 %v13620_v24  ;;  %v5126_v28 = vand.u32 4294901760, %v5125_v47 }
 0x3eb   :  { %v5620_v38 = vsub.f32 %v5618_v15, %v5619_v16 }
 0x3ed   :  { %v5621_v40 = vand.u32 4294901760, %v5620_v38 }
 0x3ee   :  { %11837 = vmatmul.mubr.f32.vlgmr.msra.gmra.mrb[6].mxu1 %v13603_v18  ;;  %v5631_v18 = vsub.f32 %v5629_v36, %v5630_v27 }
 0x3ef   :  { %11862 = vmatmul.mubr.f32.vlgmr.msra.gmra.mrb[14].mxu0 %v13630_v17  ;;  %11870 = vmatpush3.xpose.msra.mxu1 %v13686_v8 }
 0x3f0   :  { %11865 = vmatpush3.xpose.msra.mxu0 %v13620_v24  ;;  %11871 = vmatprep.mubr.f32.mxu1 %v5116_v21  ;;  %v5632_v24 = vand.u32 4294901760, %v5631_v18 }
 0x3f1   :  { %11874 = vmatprep.subr.mxu1 %v5137_v22  ;;  %11866 = vmatprep.mubr.f32.mxu0 %v13616_v31  ;;  %v13750_v31 = vand.u32 4294901760, %v13657_v56 }
 0x3f2   :  { %11899 = vmatprep.subr.mxu0 %v13713_v10  ;;  %11872 = vmatmul.mubr.f32.vlgmr.msra.gmra.mrb[8].mxu1 %v5126_v28 }
 0x3f3   :  { %11875 = vmatpush3.xpose.msra.mxu1 %v5137_v22  ;;  %11876 = vmatprep.mubr.f32.mxu1 %v13684_v6 }
 0x3f4   :  { %11879 = vmatprep.subr.mxu1 %v5134_v14 }
 0x3f7   :  { %11867 = vmatmul.mubr.f32.vlgmr.msra.gmra.mrb[14].mxu0 %v13630_v17  ;;  %v13757_v17 = vsub.f32 %v13657_v56, %v13750_v31 }
 0x3f8   :  { %11900 = vmatpush3.xpose.msra.mxu0 %v13713_v10  ;;  %11901 = vmatprep.mubr.f32.mxu0 %v5611_v39 }
 0x3f9   :  { %11904 = vmatprep.subr.mxu0 %v5632_v24  ;;  %v13763_v44 = vand.u32 4294901760, %v13757_v17 }
 0x3fa   :  { %11877 = vmatmul.mubr.f32.vlgmr.msra.gmra.mrb[8].mxu1 %v13693_v9 }
 0x3fb   :  { %11902 = vmatmul.mubr.f32.vlgmr.msra.gmra.mrb[16].mxu0 %v5621_v40  ;;  %11880 = vmatpush3.xpose.msra.mxu1 %v5134_v14  ;;  %v6334_v43 = vsub.f32 %v13757_v17, %v13763_v44 }
 0x3fc   :  { %11881 = vmatprep.mubr.f32.mxu1 %v13701_v12  ;;  %11884 = vmatprep.subr.mxu1 %v13686_v8 }
 0x3fd   :  { %11905 = vmatpush3.xpose.msra.mxu0 %v5632_v24  ;;  %11906 = vmatprep.mubr.f32.mxu0 %v13709_v54  ;;  %v13780_v48 = vand.u32 4294901760, %v6334_v43 }
 0x3fe   :  { %11909 = vmatprep.subr.mxu0 %v5629_v36 }
 0x402   :  { %11882 = vmatmul.mubr.f32.vlgmr.msra.gmra.mrb[8].mxu1 %v13707_v23 }
 0x403   :  { %11907 = vmatmul.mubr.f32.vlgmr.msra.gmra.mrb[16].mxu0 %v13721_v30  ;;  %11885 = vmatpush3.xpose.msra.mxu1 %v13686_v8 }
 0x404   :  { %11886 = vmatprep.mubr.f32.mxu1 %v5114_v57  ;;  %11889 = vmatprep.subr.mxu1 %v5135_v29 }
 0x405   :  { %11910 = vmatpush3.xpose.msra.mxu0 %v5629_v36  ;;  %11911 = vmatprep.mubr.f32.mxu0 %v5608_v33 }
 0x406   :  { %11914 = vmatprep.subr.mxu0 %v13713_v10 }
 0x40a   :  { %11887 = vmatmul.mubr.f32.vlgmr.msra.gmra.mrb[8].mxu1 %v5124_v7 }
 0x40b   :  { %11912 = vmatmul.mubr.f32.vlgmr.msra.gmra.mrb[16].mxu0 %v5618_v15  ;;  %11890 = vmatpush3.xpose.msra.mxu1 %v5135_v29 }
 0x40c   :  { %11891 = vmatprep.mubr.f32.mxu1 %v13684_v6  ;;  %11894 = vmatprep.subr.mxu1 %v13686_v8 }
 0x40d   :  { %11915 = vmatpush3.xpose.msra.mxu0 %v13713_v10  ;;  %11916 = vmatprep.mubr.f32.mxu0 %v5609_v20 }
 0x40e   :  { %11919 = vmatprep.subr.mxu0 %v5630_v27 }
 0x412   :  { %11892 = vmatmul.mubr.f32.vlgmr.msra.gmra.mrb[8].mxu1 %v13693_v9 }
 0x413   :  { %11917 = vmatmul.mubr.f32.vlgmr.msra.gmra.mrb[16].mxu0 %v5619_v16  ;;  %11895 = vmatpush3.xpose.msra.mxu1 %v13686_v8 }
 0x414   :  { %11896 = vmatprep.mubr.f32.mxu1 %v13684_v6  ;;  %11920 = vmatpush3.xpose.msra.mxu0 %v5630_v27 }
 0x415   :  { %11921 = vmatprep.mubr.f32.mxu0 %v13709_v54  ;;  %11924 = vmatprep.subr.mxu0 %v13713_v10 }
 0x416   :  { %11929 = vmatprep.subr.mxu1 %v13750_v31 }
 0x41a   :  { %11897 = vmatmul.mubr.f32.vlgmr.msra.gmra.mrb[8].mxu1 %v13693_v9 }
 0x41b   :  { %11922 = vmatmul.mubr.f32.vlgmr.msra.gmra.mrb[16].mxu0 %v13721_v30  ;;  %11930 = vmatpush3.msra.mxu1 %v13750_v31 }
 0x41c   :  { %11925 = vmatpush3.xpose.msra.mxu0 %v13713_v10  ;;  %11926 = vmatprep.mubr.f32.mxu0 %v13709_v54 }
 0x41d   :  { %11959 = vmatprep.subr.mxu0 %v13760_v41  ;;  %11934 = vmatprep.subr.mxu1 %v13780_v48 }
 0x423   :  { %v11718_v34 = vpop.f32.mrb[6].mxu0  ;;  %11927 = vmatmul.mubr.f32.vlgmr.msra.gmra.mrb[16].mxu0 %v13721_v30 }
 0x424   :  { %v11018_v51 = vclamps-f32 %v11718_v34, 10000.0  ;;  %v2555_v58 = vpop.f32.mrb[7].mxu0  ;;  %11960 = vmatpush3.msra.mxu0 %v13760_v41 }
 0x425   :  { %v11017_v55 = vclamps-f32 %v2555_v58, 10000.0  ;;  %11964 = vmatprep.subr.mxu0 %v13791_v50 }
 0x426   :  { %v6065_v46 = vsel %vm2069_vm2, %v11018_v51, -inf }
 0x427   :  { %6066 = vmax.xlane.f32.xlu1 %v6065_v46  ;;  %v6062_v59 = vsel %vm2069_vm2, %v11017_v55, -inf }
 0x428   :  { %6063 = vmax.xlane.f32.xlu0 %v6062_v59 }
 0x44f   :  { %v13798_v35 = vpop.f32.mrb[8].mxu0 }
 0x450   :  { %v3050_v60 = vpop.f32.mrb[9].mxu0  ;;  %v11020_v62 = vclamps-f32 %v13798_v35, 10000.0 }
 0x451   :  { %v11019_v61 = vclamps-f32 %v3050_v60, 10000.0 }
 0x452   :  { %v6071_v53 = vsel %vm2069_vm2, %v11020_v62, -inf }
 0x453   :  { %v6068_v63 = vsel %vm2069_vm2, %v11019_v61, -inf }
 0x454   :  { %6069 = vmax.xlane.f32.xlu0 %v6068_v63 }
 0x458   :  { %6072 = vmax.xlane.f32.xlu0 %v6071_v53 }
 0x46d   :  { %v11753_v0 = vpop.f32.mrb[10].mxu0 }
 0x46e   :  { %v3138_v1 = vpop.f32.mrb[11].mxu0 }
 0x495   :  { %v11778_v2 = vpop.f32.mrb[4].mxu1 }
 0x496   :  { %v13803_v3 = vadd.f32 %v11778_v2, %v11753_v0  ;;  %v3545_v4 = vpop.f32.mrb[5].mxu1 }
 0x497   :  { %v13805_v5 = vadd.f32 %v3545_v4, %v3138_v1 }
 0x498   :  { %v11022_v6 = vclamps-f32 %v13803_v3, 10000.0 }
 0x499   :  { %v11021_v8 = vclamps-f32 %v13805_v5, 10000.0 }
 0x49a   :  { %v6077_v9 = vsel %vm2069_vm2, %v11022_v6, -inf }
 0x49b   :  { %6078 = vmax.xlane.f32.xlu1 %v6077_v9  ;;  %v6074_v11 = vsel %vm2069_vm2, %v11021_v8, -inf }
 0x49c   :  { %6075 = vmax.xlane.f32.xlu0 %v6074_v11 }
 0x49e   :  { %v13815_v12 = vpop.f32.mrb[12].mxu0 }
 0x49f   :  { %v11024_v13 = vclamps-f32 %v13815_v12, 10000.0  ;;  %v13818_v14 = vpop.f32.mrb[13].mxu0 }
 0x4a0   :  { %v11023_v19 = vclamps-f32 %v13818_v14, 10000.0 }
 0x4a1   :  { %v6083_v23 = vsel %vm2069_vm2, %v11024_v13, -inf }
 0x4a2   :  { %6084 = vmax.xlane.f32.xlu1 %v6083_v23  ;;  %v6080_v54 = vsel %vm2069_vm2, %v11023_v19, -inf }
 0x4a3   :  { %6081 = vmax.xlane.f32.xlu0 %v6080_v54 }
 0x4b4   :  { %v6067_v26 = vpop.xlane.xlu1 %6066 }
 0x4b5   :  { %v6111_v57 = vsub.f32 %v11018_v51, %v6067_v26  ;;  %v6064_v10 = vpop.xlane.xlu0 %6063 }
 0x4b6   :  { %v6110_v29 = vsub.f32 %v11017_v55, %v6064_v10 }
 0x4b7   :  { %v6128_v7 = vmul.f32 1.442695, %v6111_v57 }
 0x4b8   :  { %v6126_v30 = vmul.f32 1.442695, %v6110_v29 }
 0x4b9   :  { %12672 = vpow2.f32 %v6128_v7 }
 0x4ba   :  { %12674 = vpow2.f32 %v6126_v30 }
 0x4c1   :  { %v13827_v33 = vpop.f32.mrb[6].mxu1 }
 0x4c2   :  { %v11026_v37 = vclamps-f32 %v13827_v33, 10000.0  ;;  %v13832_v42 = vpop.f32.mrb[7].mxu1 }
 0x4c3   :  { %v13829_v36 = vpop.eup %12672  ;;  %v11025_v20 = vclamps-f32 %v13832_v42, 10000.0 }
 0x4c4   :  { %v6161_v47 = vsel %vm2069_vm2, %v13829_v36, 0.0  ;;  %v13836_v15 = vpop.eup %12674  ;;  %v6089_v21 = vsel %vm2069_vm2, %v11026_v37, -inf }
 0x4c5   :  { %6162 = vadd.xlane.f32.xlu1 %v6161_v47  ;;  %6090 = vmax.xlane.f32.xlu0 %v6089_v21  ;;  %v6158_v22 = vsel %vm2069_vm2, %v13836_v15, 0.0  ;;  %v6086_v27 = vsel %vm2069_vm2, %v11025_v20, -inf }
 0x4c9   :  { %6159 = vadd.xlane.f32.xlu1 %v6158_v22  ;;  %6087 = vmax.xlane.f32.xlu0 %v6086_v27 }
 0x4ca   :  { %v13847_v28 = vpop.f32.mrb[14].mxu0 }
 0x4cb   :  { %v13849_v16 = vpop.f32.mrb[15].mxu0  ;;  %v11028_v18 = vclamps-f32 %v13847_v28, 10000.0 }
 0x4cc   :  { %v11027_v32 = vclamps-f32 %v13849_v16, 10000.0 }
 0x4cd   :  { %v6095_v39 = vsel %vm2069_vm2, %v11028_v18, -inf }
 0x4ce   :  { %v6092_v38 = vsel %vm2069_vm2, %v11027_v32, -inf }
 0x4cf   :  { %6093 = vmax.xlane.f32.xlu0 %v6092_v38 }
 0x4d3   :  { %6096 = vmax.xlane.f32.xlu0 %v6095_v39 }
 0x4e1   :  { %v6070_v24 = vpop.xlane.xlu0 %6069 }
 0x4e2   :  { %v6112_v40 = vsub.f32 %v11019_v61, %v6070_v24 }
 0x4e4   :  { %v6130_v43 = vmul.f32 1.442695, %v6112_v40 }
 0x4e5   :  { %v6073_v49 = vpop.xlane.xlu0 %6072 }
 0x4e6   :  { %12676 = vpow2.f32 %v6130_v43  ;;  %v6113_v34 = vsub.f32 %v11020_v62, %v6073_v49 }
 0x4e8   :  { %v6132_v51 = vmul.f32 1.442695, %v6113_v34 }
 0x4ea   :  { %12678 = vpow2.f32 %v6132_v51 }
 0x4ed   :  { %v13859_v58 = vpop.f32.mrb[8].mxu1 }
 0x4ee   :  { %v11030_v55 = vclamps-f32 %v13859_v58, 10000.0  ;;  %v13862_v46 = vpop.f32.mrb[9].mxu1 }
 0x4ef   :  { %v11029_v35 = vclamps-f32 %v13862_v46, 10000.0 }
 0x4f0   :  { %v13864_v59 = vpop.eup %12676  ;;  %v6101_v60 = vsel %vm2069_vm2, %v11030_v55, -inf }
 0x4f1   :  { %v6164_v61 = vsel %vm2069_vm2, %v13864_v59, 0.0  ;;  %6102 = vmax.xlane.f32.xlu0 %v6101_v60  ;;  %v6098_v63 = vsel %vm2069_vm2, %v11029_v35, -inf }
 0x4f2   :  { %6165 = vadd.xlane.f32.xlu1 %v6164_v61 }
 0x4f4   :  { %v13872_v62 = vpop.eup %12678 }
 0x4f5   :  { %v6167_v53 = vsel %vm2069_vm2, %v13872_v62, 0.0  ;;  %6099 = vmax.xlane.f32.xlu0 %v6098_v63 }
 0x4f6   :  { %6168 = vadd.xlane.f32.xlu1 %v6167_v53  ;;  %v13879_v0 = vpop.f32.mrb[16].mxu0 }
 0x4f7   :  { %v11032_v1 = vclamps-f32 %v13879_v0, 10000.0  ;;  %v13882_v2 = vpop.f32.mrb[17].mxu0 }
 0x4f8   :  { %v11031_v4 = vclamps-f32 %v13882_v2, 10000.0 }
 0x4f9   :  { %v6107_v9 = vsel %vm2069_vm2, %v11032_v1, -inf }
 0x4fa   :  { %6108 = vmax.xlane.f32.xlu0 %v6107_v9  ;;  %v6104_v11 = vsel %vm2069_vm2, %v11031_v4, -inf }
 0x4fe   :  { %6105 = vmax.xlane.f32.xlu0 %v6104_v11 }
 0x514   :  { %2051 = vrot.lane.b32.xlu0 %v13657_v56, %s13043_s9 }
 0x528   :  { %v6079_v23 = vpop.xlane.xlu1 %6078 }
 0x529   :  { %v6115_v54 = vsub.f32 %v11022_v6, %v6079_v23  ;;  %v6076_v26 = vpop.xlane.xlu0 %6075 }
 0x52a   :  { %v6114_v57 = vsub.f32 %v11021_v8, %v6076_v26 }
 0x52b   :  { %v6136_v10 = vmul.f32 1.442695, %v6115_v54 }
 0x52c   :  { %v6134_v29 = vmul.f32 1.442695, %v6114_v57 }
 0x52d   :  { %12680 = vpow2.f32 %v6136_v10 }
 0x52e   :  { %12682 = vpow2.f32 %v6134_v29 }
 0x52f   :  { %v6085_v7 = vpop.xlane.xlu1 %6084 }
 0x530   :  { %v6117_v30 = vsub.f32 %v11024_v13, %v6085_v7  ;;  %v6082_v47 = vpop.xlane.xlu0 %6081 }
 0x531   :  { %v6116_v21 = vsub.f32 %v11023_v19, %v6082_v47 }
 0x532   :  { %v6140_v22 = vmul.f32 1.442695, %v6117_v30 }
 0x533   :  { %v6138_v3 = vmul.f32 1.442695, %v6116_v21 }
 0x534   :  { %12684 = vpow2.f32 %v6140_v22 }
 0x535   :  { %12686 = vpow2.f32 %v6138_v3 }
 0x537   :  { %v13901_v6 = vpop.eup %12680 }
 0x538   :  { %v6173_v5 = vsel %vm2069_vm2, %v13901_v6, 0.0  ;;  %v13905_v8 = vpop.eup %12682 }
 0x539   :  { %6174 = vadd.xlane.f32.xlu1 %v6173_v5  ;;  %v6170_v12 = vsel %vm2069_vm2, %v13905_v8, 0.0 }
 0x53d   :  { %6171 = vadd.xlane.f32.xlu1 %v6170_v12 }
 0x53e   :  { %v13909_v13 = vpop.eup %12684 }
 0x53f   :  { %v6179_v14 = vsel %vm2069_vm2, %v13909_v13, 0.0  ;;  %v13913_v19 = vpop.eup %12686 }
 0x540   :  { %v6176_v27 = vsel %vm2069_vm2, %v13913_v19, 0.0 }
 0x541   :  { %6180 = vadd.xlane.f32.xlu1 %v6179_v14 }
 0x545   :  { %6177 = vadd.xlane.f32.xlu1 %v6176_v27 }
 0x552   :  { %v6163_v38 = vpop.xlane.xlu1 %6162  ;;  %v6091_v39 = vpop.xlane.xlu0 %6090 }
 0x553   :  { %12688 = vrcp.f32 %v6163_v38  ;;  %v6119_v24 = vsub.f32 %v11026_v37, %v6091_v39 }
 0x555   :  { %v6144_v40 = vmul.f32 1.442695, %v6119_v24 }
 0x556   :  { %v6160_v43 = vpop.xlane.xlu1 %6159  ;;  %2053 = vrot.lane.b32.xlu1 %v13654_v52, %s13043_s9  ;;  %v6088_v49 = vpop.xlane.xlu0 %6087 }
 0x557   :  { %12690 = vrcp.f32 %v6160_v43 }
 0x558   :  { %12692 = vpow2.f32 %v6144_v40 }
 0x55c   :  { %v6094_v34 = vpop.xlane.xlu0 %6093 }
 0x55d   :  { %v12689_v51 = vpop.eup %12688  ;;  %v6120_v60 = vsub.f32 %v11027_v32, %v6094_v34 }
 0x55e   :  { %v6209_v61 = vmul.f32 %v12689_v51, %v13829_v36  ;;  %v6118_v36 = vsub.f32 %v11025_v20, %v6088_v49 }
 0x55f   :  { %v6146_v63 = vmul.f32 1.442695, %v6120_v60 }
 0x560   :  { %v6242_v53 = vsel %vm2069_vm2, %v6209_v61, 0  ;;  %v6097_v26 = vpop.xlane.xlu0 %6096  ;;  %v6142_v29 = vmul.f32 1.442695, %v6118_v36 }
 0x561   :  { %v12691_v33 = vpop.eup %12690  ;;  %12694 = vpow2.f32 %v6146_v63  ;;  %v13925_v37 = vand.u32 4294901760, %v6242_v53 }
 0x562   :  { %v13927_v9 = vpop.eup %12692  ;;  %v6207_v11 = vmul.f32 %v12691_v33, %v13836_v15  ;;  %v6121_v15 = vsub.f32 %v11028_v18, %v6097_v26  ;;  %12696 = vpow2.f32 %v6142_v29 }
 0x563   :  { %v6185_v23 = vsel %vm2069_vm2, %v13927_v9, 0.0  ;;  %v6321_v54 = vsub.f32 %v6242_v53, %v13925_v37 }
 0x564   :  { %6186 = vadd.xlane.f32.xlu0 %v6185_v23  ;;  %v6239_v16 = vsel %vm2069_vm2, %v6207_v11, 0  ;;  %v6148_v42 = vmul.f32 1.442695, %v6121_v15 }
 0x565   :  { %v13936_v32 = vand.u32 4294901760, %v6239_v16  ;;  %v6322_v57 = vand.u32 4294901760, %v6321_v54 }
 0x566   :  { %12698 = vpow2.f32 %v6148_v42 }
 0x567   :  { %v6311_v10 = vsub.f32 %v6239_v16, %v13936_v32  ;;  %v6323_v30 = vsub.f32 %v6321_v54, %v6322_v57 }
 0x569   :  { %v6312_v7 = vand.u32 4294901760, %v6311_v10  ;;  %v6324_v3 = vand.u32 4294901760, %v6323_v30 }
 0x56b   :  { %v13941_v47 = vpop.eup %12694  ;;  %v6313_v21 = vsub.f32 %v6311_v10, %v6312_v7 }
 0x56c   :  { %v6188_v22 = vsel %vm2069_vm2, %v13941_v47, 0.0  ;;  %v13948_v28 = vpop.eup %12696 }
 0x56d   :  { %6189 = vadd.xlane.f32.xlu0 %v6188_v22  ;;  %v6314_v20 = vand.u32 4294901760, %v6313_v21  ;;  %v6182_v18 = vsel %vm2069_vm2, %v13948_v28, 0.0 }
 0x56f   :  { %11931 = vmatprep.mubr.f32.mxu1 %v6314_v20 }
 0x570   :  { %11932 = vmatmul.mubr.f32.vlgmr.msra.gmra.mrb[10].mxu1 %v6324_v3  ;;  %v13955_v5 = vpop.eup %12698 }
 0x571   :  { %11935 = vmatpush3.msra.mxu1 %v13780_v48  ;;  %11936 = vmatprep.mubr.f32.mxu1 %v13936_v32  ;;  %v6191_v48 = vsel %vm2069_vm2, %v13955_v5, 0.0 }
 0x572   :  { %11939 = vmatprep.subr.mxu1 %v13757_v17 }
 0x578   :  { %11937 = vmatmul.mubr.f32.vlgmr.msra.gmra.mrb[10].mxu1 %v13925_v37 }
 0x579   :  { %11940 = vmatpush3.msra.mxu1 %v13757_v17  ;;  %11941 = vmatprep.mubr.f32.mxu1 %v6311_v10 }
 0x57a   :  { %11944 = vmatprep.subr.mxu1 %v13750_v31  ;;  %6183 = vadd.xlane.f32.xlu1 %v6182_v18 }
 0x57e   :  { %6192 = vadd.xlane.f32.xlu1 %v6191_v48  ;;  %v6103_v14 = vpop.xlane.xlu0 %6102 }
 0x57f   :  { %v6166_v12 = vpop.xlane.xlu1 %6165  ;;  %v6123_v43 = vsub.f32 %v11030_v55, %v6103_v14 }
 0x580   :  { %12700 = vrcp.f32 %v6166_v12  ;;  %11942 = vmatmul.mubr.f32.vlgmr.msra.gmra.mrb[10].mxu1 %v6321_v54 }
 0x581   :  { %11945 = vmatpush3.msra.mxu1 %v13750_v31  ;;  %11946 = vmatprep.mubr.f32.mxu1 %v6312_v7  ;;  %v6152_v61 = vmul.f32 1.442695, %v6123_v43 }
 0x582   :  { %11949 = vmatprep.subr.mxu1 %v13763_v44  ;;  %v6100_v27 = vpop.xlane.xlu0 %6099 }
 0x583   :  { %v6169_v17 = vpop.xlane.xlu1 %6168  ;;  %2057 = vrot.lane.b32.xlu0 %v13657_v56, %s13044_s8  ;;  %v6122_v10 = vsub.f32 %v11029_v35, %v6100_v27 }
 0x584   :  { %12702 = vrcp.f32 %v6169_v17 }
 0x585   :  { %12704 = vpow2.f32 %v6152_v61  ;;  %v6150_v29 = vmul.f32 1.442695, %v6122_v10 }
 0x587   :  { %v6109_v38 = vpop.xlane.xlu0 %6108 }
 0x588   :  { %11947 = vmatmul.mubr.f32.vlgmr.msra.gmra.mrb[10].mxu1 %v6322_v57  ;;  %v6125_v15 = vsub.f32 %v11032_v1, %v6109_v38 }
 0x589   :  { %11950 = vmatpush3.msra.mxu1 %v13763_v44  ;;  %11951 = vmatprep.mubr.f32.mxu1 %v13936_v32 }
 0x58a   :  { %v12701_v39 = vpop.eup %12700  ;;  %11954 = vmatprep.subr.mxu1 %v13750_v31  ;;  %v6156_v46 = vmul.f32 1.442695, %v6125_v15 }
 0x58b   :  { %v6211_v24 = vmul.f32 %v12701_v39, %v13864_v59  ;;  %v6106_v40 = vpop.xlane.xlu0 %6105 }
 0x58c   :  { %v6124_v58 = vsub.f32 %v11031_v4, %v6106_v40 }
 0x58d   :  { %v6734_v49 = vsel %vm2069_vm2, %v6211_v24, 0 }
 0x58e   :  { %v13970_v34 = vand.u32 4294901760, %v6734_v49  ;;  %v12703_v51 = vpop.eup %12702  ;;  %v6154_v2 = vmul.f32 1.442695, %v6124_v58 }
 0x58f   :  { %v2052_v60 = vpop.permute.xlu0 %2051  ;;  %v6213_v44 = vmul.f32 %v12703_v51, %v13872_v62  ;;  %2059 = vrot.lane.b32.xlu1 %v13654_v52, %s13044_s8  ;;  %v13998_v57 = vpop.eup %12704 }
 0x590   :  { %11952 = vmatmul.mubr.f32.vlgmr.msra.gmra.mrb[10].mxu1 %v13925_v37  ;;  %v13976_v63 = vand.u32 4294901760, %v2052_v60  ;;  %v6806_v59 = vsub.f32 %v6734_v49, %v13970_v34  ;;  %12706 = vpow2.f32 %v6154_v2 }
 0x591   :  { %11955 = vmatpush3.msra.mxu1 %v13750_v31  ;;  %11956 = vmatprep.mubr.f32.mxu1 %v13936_v32  ;;  %v6737_v53 = vsel %vm2069_vm2, %v6213_v44, 0  ;;  %12708 = vpow2.f32 %v6150_v29 }
 0x592   :  { %v13984_v55 = vsub.f32 %v2052_v60, %v13976_v63  ;;  %11989 = vmatprep.subr.mxu1 %v13976_v63  ;;  %v6807_v62 = vand.u32 4294901760, %v6806_v59  ;;  %v6815_v33 = vand.u32 4294901760, %v6737_v53  ;;  %12710 = vpow2.f32 %v6156_v46 }
 0x594   :  { %v6808_v11 = vsub.f32 %v6806_v59, %v6807_v62  ;;  %v13989_v23 = vand.u32 4294901760, %v13984_v55  ;;  %v6816_v4 = vsub.f32 %v6737_v53, %v6815_v33 }
 0x596   :  { %v6809_v54 = vand.u32 4294901760, %v6808_v11  ;;  %v7324_v31 = vsub.f32 %v13984_v55, %v13989_v23  ;;  %v6817_v16 = vand.u32 4294901760, %v6816_v4 }
 0x598   :  { %11957 = vmatmul.mubr.f32.vlgmr.msra.gmra.mrb[10].mxu1 %v13925_v37  ;;  %11961 = vmatprep.mubr.f32.mxu0 %v6809_v54  ;;  %v13994_v36 = vand.u32 4294901760, %v7324_v31  ;;  %v6818_v32 = vsub.f32 %v6816_v4, %v6817_v16  ;;  %v6197_v37 = vsel %vm2069_vm2, %v13998_v57, 0.0 }
 0x599   :  { %11990 = vmatpush3.msra.mxu1 %v13976_v63 }
 0x59a   :  { %11994 = vmatprep.subr.mxu1 %v13994_v36  ;;  %v6819_v26 = vand.u32 4294901760, %v6818_v32  ;;  %v14009_v7 = vpop.eup %12706 }
 0x59b   :  { %v14017_v35 = vpop.eup %12708 }
 0x59c   :  { %11962 = vmatmul.mubr.f32.vlgmr.msra.gmra.mrb[18].mxu0 %v6819_v26  ;;  %v6194_v0 = vsel %vm2069_vm2, %v14017_v35, 0.0 }
 0x59d   :  { %11965 = vmatpush3.msra.mxu0 %v13791_v50  ;;  %11966 = vmatprep.mubr.f32.mxu0 %v13970_v34  ;;  %v6200_v50 = vsel %vm2069_vm2, %v14009_v7, 0.0 }
 0x59e   :  { %11969 = vmatprep.subr.mxu0 %v13771_v45 }
 0x5a2   :  { %6198 = vadd.xlane.f32.xlu0 %v6197_v37 }
 0x5a4   :  { %11967 = vmatmul.mubr.f32.vlgmr.msra.gmra.mrb[18].mxu0 %v6815_v33 }
 0x5a5   :  { %11970 = vmatpush3.msra.mxu0 %v13771_v45  ;;  %11971 = vmatprep.mubr.f32.mxu0 %v6806_v59  ;;  %v14021_v45 = vpop.eup %12710 }
 0x5a6   :  { %11974 = vmatprep.subr.mxu0 %v13760_v41  ;;  %6201 = vadd.xlane.f32.xlu0 %v6200_v50  ;;  %v6203_v1 = vsel %vm2069_vm2, %v14021_v45, 0.0 }
 0x5ac   :  { %11972 = vmatmul.mubr.f32.vlgmr.msra.gmra.mrb[18].mxu0 %v6816_v4 }
 0x5ad   :  { %11975 = vmatpush3.msra.mxu0 %v13760_v41  ;;  %11976 = vmatprep.mubr.f32.mxu0 %v6807_v62 }
 0x5ae   :  { %11979 = vmatprep.subr.mxu0 %v13778_v25 }
 0x5b3   :  { %6195 = vadd.xlane.f32.xlu1 %v6194_v0 }
 0x5b4   :  { %11977 = vmatmul.mubr.f32.vlgmr.msra.gmra.mrb[18].mxu0 %v6817_v16 }
 0x5b5   :  { %11980 = vmatpush3.msra.mxu0 %v13778_v25  ;;  %11981 = vmatprep.mubr.f32.mxu0 %v13970_v34 }
 0x5b6   :  { %11984 = vmatprep.subr.mxu0 %v13760_v41 }
 0x5b7   :  { %6204 = vadd.xlane.f32.xlu1 %v6203_v1 }
 0x5bc   :  { %11982 = vmatmul.mubr.f32.vlgmr.msra.gmra.mrb[18].mxu0 %v6815_v33  ;;  %2063 = vrot.lane.b32.xlu0 %v13657_v56, %s13045_s23 }
 0x5bd   :  { %11985 = vmatpush3.msra.mxu0 %v13760_v41  ;;  %11986 = vmatprep.mubr.f32.mxu0 %v13970_v34 }
 0x5c4   :  { %11987 = vmatmul.mubr.f32.vlgmr.msra.gmra.mrb[18].mxu0 %v6815_v33 }
 0x5c6   :  { %v6175_v30 = vpop.xlane.xlu1 %6174 }
 0x5c7   :  { %12712 = vrcp.f32 %v6175_v30 }
 0x5c8   :  { %2065 = vrot.lane.b32.xlu1 %v13654_v52, %s13045_s23 }
 0x5ca   :  { %v6172_v25 = vpop.xlane.xlu1 %6171 }
 0x5cb   :  { %12714 = vrcp.f32 %v6172_v25 }
 0x5ce   :  { %v6181_v21 = vpop.xlane.xlu1 %6180 }
 0x5cf   :  { %12716 = vrcp.f32 %v6181_v21 }
 0x5d1   :  { %v12713_v22 = vpop.eup %12712 }
 0x5d2   :  { %v6217_v42 = vmul.f32 %v12713_v22, %v13901_v6  ;;  %v6178_v20 = vpop.xlane.xlu1 %6177 }
 0x5d3   :  { %12718 = vrcp.f32 %v6178_v20 }
 0x5d4   :  { %v7232_v56 = vsel %vm2069_vm2, %v6217_v42, 0 }
 0x5d5   :  { %v12715_v41 = vpop.eup %12714  ;;  %v14036_v3 = vand.u32 4294901760, %v7232_v56 }
 0x5d6   :  { %v6215_v18 = vmul.f32 %v12715_v41, %v13905_v8  ;;  %v2054_v48 = vpop.permute.xlu1 %2053 }
 0x5d7   :  { %v14039_v12 = vand.u32 4294901760, %v2054_v48  ;;  %v7311_v52 = vsub.f32 %v7232_v56, %v14036_v3 }
 0x5d8   :  { %v7229_v14 = vsel %vm2069_vm2, %v6215_v18, 0 }
 0x5d9   :  { %v12717_v17 = vpop.eup %12716  ;;  %v7817_v27 = vsub.f32 %v2054_v48, %v14039_v12  ;;  %12019 = vmatprep.subr.mxu0 %v14039_v12  ;;  %v14045_v6 = vand.u32 4294901760, %v7229_v14  ;;  %v7312_v39 = vand.u32 4294901760, %v7311_v52 }
 0x5da   :  { %v6221_v38 = vmul.f32 %v12717_v17, %v13909_v13  ;;  %12020 = vmatpush3.msra.mxu0 %v14039_v12 }
 0x5db   :  { %v14049_v8 = vand.u32 4294901760, %v7817_v27  ;;  %v7301_v24 = vsub.f32 %v7229_v14, %v14045_v6  ;;  %v7313_v61 = vsub.f32 %v7311_v52, %v7312_v39 }
 0x5dc   :  { %v7727_v40 = vsel %vm2069_vm2, %v6221_v38, 0 }
 0x5dd   :  { %v12719_v43 = vpop.eup %12718  ;;  %v7819_v49 = vsub.f32 %v7817_v27, %v14049_v8  ;;  %v7302_v34 = vand.u32 4294901760, %v7301_v24  ;;  %v14054_v51 = vand.u32 4294901760, %v7727_v40  ;;  %v7314_v33 = vand.u32 4294901760, %v7313_v61 }
 0x5de   :  { %v6219_v60 = vmul.f32 %v12719_v43, %v13913_v19 }
 0x5df   :  { %v7820_v44 = vand.u32 4294901760, %v7819_v49  ;;  %v7303_v13 = vsub.f32 %v7301_v24, %v7302_v34  ;;  %v7806_v59 = vsub.f32 %v7727_v40, %v14054_v51 }
 0x5e0   :  { %v7724_v58 = vsel %vm2069_vm2, %v6219_v60, 0 }
 0x5e1   :  { %12024 = vmatprep.subr.mxu0 %v7820_v44  ;;  %v7304_v62 = vand.u32 4294901760, %v7303_v13  ;;  %v14059_v53 = vand.u32 4294901760, %v7724_v58  ;;  %v7807_v11 = vand.u32 4294901760, %v7806_v59 }
 0x5e3   :  { %11991 = vmatprep.mubr.f32.mxu1 %v7304_v62  ;;  %v7796_v2 = vsub.f32 %v7724_v58, %v14059_v53  ;;  %v7808_v4 = vsub.f32 %v7806_v59, %v7807_v11 }
 0x5e4   :  { %11992 = vmatmul.mubr.f32.vlgmr.msra.gmra.mrb[12].mxu1 %v7314_v33 }
 0x5e5   :  { %11995 = vmatpush3.msra.mxu1 %v13994_v36  ;;  %11996 = vmatprep.mubr.f32.mxu1 %v14045_v6  ;;  %v7797_v19 = vand.u32 4294901760, %v7796_v2  ;;  %v7809_v16 = vand.u32 4294901760, %v7808_v4 }
 0x5e6   :  { %11999 = vmatprep.subr.mxu1 %v13984_v55 }
 0x5e7   :  { %v7798_v54 = vsub.f32 %v7796_v2, %v7797_v19 }
 0x5e9   :  { %v7799_v31 = vand.u32 4294901760, %v7798_v54 }
 0x5eb   :  { %12021 = vmatprep.mubr.f32.mxu0 %v7799_v31 }
 0x5ec   :  { %11997 = vmatmul.mubr.f32.vlgmr.msra.gmra.mrb[12].mxu1 %v14036_v3  ;;  %12022 = vmatmul.mubr.f32.vlgmr.msra.gmra.mrb[20].mxu0 %v7809_v16 }
 0x5ed   :  { %12000 = vmatpush3.msra.mxu1 %v13984_v55  ;;  %12025 = vmatpush3.msra.mxu0 %v7820_v44 }
 0x5ee   :  { %12001 = vmatprep.mubr.f32.mxu1 %v7301_v24  ;;  %12004 = vmatprep.subr.mxu1 %v13976_v63 }
 0x5ef   :  { %12026 = vmatprep.mubr.f32.mxu0 %v14059_v53  ;;  %12029 = vmatprep.subr.mxu0 %v7817_v27 }
 0x5f1   :  { %v6187_v36 = vpop.xlane.xlu0 %6186 }
 0x5f4   :  { %12002 = vmatmul.mubr.f32.vlgmr.msra.gmra.mrb[12].mxu1 %v7311_v52  ;;  %12027 = vmatmul.mubr.f32.vlgmr.msra.gmra.mrb[20].mxu0 %v14054_v51 }
 0x5f5   :  { %12005 = vmatpush3.msra.mxu1 %v13976_v63  ;;  %12030 = vmatpush3.msra.mxu0 %v7817_v27 }
 0x5f6   :  { %12006 = vmatprep.mubr.f32.mxu1 %v7302_v34  ;;  %12009 = vmatprep.subr.mxu1 %v13989_v23 }
 0x5f7   :  { %12031 = vmatprep.mubr.f32.mxu0 %v7796_v2  ;;  %12034 = vmatprep.subr.mxu0 %v14039_v12 }
 0x5fa   :  { %v6190_v55 = vpop.xlane.xlu0 %6189 }
 0x5fb   :  { %12720 = vrcp.f32 %v6190_v55 }
 0x5fc   :  { %12722 = vrcp.f32 %v6187_v36  ;;  %12007 = vmatmul.mubr.f32.vlgmr.msra.gmra.mrb[12].mxu1 %v7312_v39  ;;  %12032 = vmatmul.mubr.f32.vlgmr.msra.gmra.mrb[20].mxu0 %v7806_v59 }
 0x5fd   :  { %12010 = vmatpush3.msra.mxu1 %v13989_v23  ;;  %12035 = vmatpush3.msra.mxu0 %v14039_v12 }
 0x5fe   :  { %v2058_v32 = vpop.permute.xlu0 %2057  ;;  %12011 = vmatprep.mubr.f32.mxu1 %v14045_v6  ;;  %12014 = vmatprep.subr.mxu1 %v13976_v63 }
 0x5ff   :  { %v14077_v26 = vand.u32 4294901760, %v2058_v32  ;;  %12036 = vmatprep.mubr.f32.mxu0 %v7797_v19  ;;  %12039 = vmatprep.subr.mxu0 %v14049_v8 }
 0x601   :  { %v14081_v10 = vsub.f32 %v2058_v32, %v14077_v26 }
 0x603   :  { %v14085_v23 = vand.u32 4294901760, %v14081_v10 }
 0x604   :  { %12012 = vmatmul.mubr.f32.vlgmr.msra.gmra.mrb[12].mxu1 %v14036_v3  ;;  %12037 = vmatmul.mubr.f32.vlgmr.msra.gmra.mrb[20].mxu0 %v7807_v11 }
 0x605   :  { %v12721_v37 = vpop.eup %12720  ;;  %12015 = vmatpush3.msra.mxu1 %v13976_v63  ;;  %12040 = vmatpush3.msra.mxu0 %v14049_v8 }
 0x606   :  { %v12723_v29 = vpop.eup %12722  ;;  %v6227_v15 = vmul.f32 %v12721_v37, %v13941_v47  ;;  %12016 = vmatprep.mubr.f32.mxu1 %v14045_v6  ;;  %12041 = vmatprep.mubr.f32.mxu0 %v14059_v53  ;;  %v8314_v47 = vsub.f32 %v14081_v10, %v14085_v23 }
 0x607   :  { %12044 = vmatprep.subr.mxu0 %v14039_v12  ;;  %12049 = vmatprep.subr.mxu1 %v14077_v26  ;;  %v6184_v46 = vpop.xlane.xlu1 %6183  ;;  %v6225_v0 = vmul.f32 %v12723_v29, %v13927_v9 }
 0x608   :  { %v8714_v50 = vsel %vm2069_vm2, %v6227_v15, 0  ;;  %12724 = vrcp.f32 %v6184_v46  ;;  %v8315_v25 = vand.u32 4294901760, %v8314_v47 }
 0x609   :  { %v14098_v63 = vand.u32 4294901760, %v8714_v50  ;;  %v8222_v9 = vsel %vm2069_vm2, %v6225_v0, 0 }
 0x60a   :  { %v14113_v20 = vand.u32 4294901760, %v8222_v9 }
 0x60b   :  { %v14101_v1 = vsub.f32 %v8714_v50, %v14098_v63  ;;  %v6193_v30 = vpop.xlane.xlu1 %6192 }
 0x60c   :  { %12726 = vrcp.f32 %v6193_v30  ;;  %12017 = vmatmul.mubr.f32.vlgmr.msra.gmra.mrb[12].mxu1 %v14036_v3  ;;  %12042 = vmatmul.mubr.f32.vlgmr.msra.gmra.mrb[20].mxu0 %v14054_v51 }
 0x60d   :  { %v8787_v21 = vand.u32 4294901760, %v14101_v1  ;;  %12045 = vmatpush3.msra.mxu0 %v14039_v12  ;;  %12050 = vmatpush3.msra.mxu1 %v14077_v26  ;;  %v8301_v12 = vsub.f32 %v8222_v9, %v14113_v20 }
 0x60e   :  { %12046 = vmatprep.mubr.f32.mxu0 %v14059_v53  ;;  %12054 = vmatprep.subr.mxu1 %v8315_v25 }
 0x60f   :  { %v2060_v22 = vpop.permute.xlu1 %2059  ;;  %v8788_v42 = vsub.f32 %v14101_v1, %v8787_v21  ;;  %v8302_v39 = vand.u32 4294901760, %v8301_v12 }
 0x610   :  { %v14115_v56 = vand.u32 4294901760, %v2060_v22 }
 0x611   :  { %v8789_v48 = vand.u32 4294901760, %v8788_v42  ;;  %v8303_v49 = vsub.f32 %v8301_v12, %v8302_v39 }
 0x612   :  { %v12725_v41 = vpop.eup %12724  ;;  %v8807_v3 = vsub.f32 %v2060_v22, %v14115_v56  ;;  %12079 = vmatprep.subr.mxu0 %v14115_v56 }
 0x613   :  { %v6223_v18 = vmul.f32 %v12725_v41, %v13948_v28  ;;  %v8304_v44 = vand.u32 4294901760, %v8303_v49 }
 0x614   :  { %12047 = vmatmul.mubr.f32.vlgmr.msra.gmra.mrb[20].mxu0 %v14054_v51  ;;  %v8808_v52 = vand.u32 4294901760, %v8807_v3 }
 0x615   :  { %12080 = vmatpush3.msra.mxu0 %v14115_v56  ;;  %12081 = vmatprep.mubr.f32.mxu0 %v8789_v48  ;;  %v8219_v14 = vsel %vm2069_vm2, %v6223_v18, 0 }
 0x616   :  { %v12727_v17 = vpop.eup %12726  ;;  %v8809_v27 = vsub.f32 %v8807_v3, %v8808_v52  ;;  %v14124_v6 = vand.u32 4294901760, %v8219_v14 }
 0x617   :  { %v6229_v38 = vmul.f32 %v12727_v17, %v13955_v5 }
 0x618   :  { %v8810_v8 = vand.u32 4294901760, %v8809_v27  ;;  %v8291_v28 = vsub.f32 %v8219_v14, %v14124_v6 }
 0x619   :  { %v8717_v24 = vsel %vm2069_vm2, %v6229_v38, 0 }
 0x61a   :  { %12084 = vmatprep.subr.mxu0 %v8810_v8  ;;  %v8292_v40 = vand.u32 4294901760, %v8291_v28  ;;  %v14129_v43 = vand.u32 4294901760, %v8717_v24 }
 0x61c   :  { %v8293_v34 = vsub.f32 %v8291_v28, %v8292_v40  ;;  %v8796_v51 = vsub.f32 %v8717_v24, %v14129_v43 }
 0x61e   :  { %v8294_v60 = vand.u32 4294901760, %v8293_v34  ;;  %v8797_v61 = vand.u32 4294901760, %v8796_v51 }
 0x620   :  { %12051 = vmatprep.mubr.f32.mxu1 %v8294_v60  ;;  %v8798_v13 = vsub.f32 %v8796_v51, %v8797_v61 }
 0x621   :  { %12052 = vmatmul.mubr.f32.vlgmr.msra.gmra.mrb[14].mxu1 %v8304_v44 }
 0x622   :  { %12055 = vmatpush3.msra.mxu1 %v8315_v25  ;;  %12056 = vmatprep.mubr.f32.mxu1 %v14124_v6  ;;  %v8799_v5 = vand.u32 4294901760, %v8798_v13 }
 0x623   :  { %12059 = vmatprep.subr.mxu1 %v14081_v10 }
 0x624   :  { %12082 = vmatmul.mubr.f32.vlgmr.msra.gmra.mrb[22].mxu0 %v8799_v5 }
 0x625   :  { %12085 = vmatpush3.msra.mxu0 %v8810_v8  ;;  %12086 = vmatprep.mubr.f32.mxu0 %v14098_v63 }
 0x626   :  { %12089 = vmatprep.subr.mxu0 %v8807_v3 }
 0x629   :  { %12057 = vmatmul.mubr.f32.vlgmr.msra.gmra.mrb[14].mxu1 %v14113_v20 }
 0x62a   :  { %12060 = vmatpush3.msra.mxu1 %v14081_v10  ;;  %12061 = vmatprep.mubr.f32.mxu1 %v8291_v28 }
 0x62b   :  { %12064 = vmatprep.subr.mxu1 %v14077_v26 }
 0x62c   :  { %12087 = vmatmul.mubr.f32.vlgmr.msra.gmra.mrb[22].mxu0 %v14129_v43 }
 0x62d   :  { %12090 = vmatpush3.msra.mxu0 %v8807_v3  ;;  %12091 = vmatprep.mubr.f32.mxu0 %v14101_v1 }
 0x62e   :  { %12094 = vmatprep.subr.mxu0 %v14115_v56 }
 0x62f   :  { %v6199_v59 = vpop.xlane.xlu0 %6198 }
 0x630   :  { %12728 = vrcp.f32 %v6199_v59 }
 0x631   :  { %12062 = vmatmul.mubr.f32.vlgmr.msra.gmra.mrb[14].mxu1 %v8301_v12 }
 0x632   :  { %12065 = vmatpush3.msra.mxu1 %v14077_v26  ;;  %12066 = vmatprep.mubr.f32.mxu1 %v8292_v40 }
 0x633   :  { %12069 = vmatprep.subr.mxu1 %v14085_v23  ;;  %v6202_v58 = vpop.xlane.xlu0 %6201 }
 0x634   :  { %12730 = vrcp.f32 %v6202_v58  ;;  %12092 = vmatmul.mubr.f32.vlgmr.msra.gmra.mrb[22].mxu0 %v8796_v51 }
 0x635   :  { %12095 = vmatpush3.msra.mxu0 %v14115_v56  ;;  %12096 = vmatprep.mubr.f32.mxu0 %v8787_v21 }
 0x636   :  { %12099 = vmatprep.subr.mxu0 %v8808_v52 }
 0x637   :  { %v2064_v62 = vpop.permute.xlu0 %2063 }
 0x638   :  { %v14146_v53 = vand.u32 4294901760, %v2064_v62 }
 0x639   :  { %12067 = vmatmul.mubr.f32.vlgmr.msra.gmra.mrb[14].mxu1 %v8302_v39 }
 0x63a   :  { %12070 = vmatpush3.msra.mxu1 %v14085_v23  ;;  %12071 = vmatprep.mubr.f32.mxu1 %v14124_v6  ;;  %v12729_v33 = vpop.eup %12728  ;;  %v14152_v11 = vsub.f32 %v2064_v62, %v14146_v53 }
 0x63b   :  { %12074 = vmatprep.subr.mxu1 %v14077_v26  ;;  %v6233_v54 = vmul.f32 %v12729_v33, %v13998_v57 }
 0x63c   :  { %12097 = vmatmul.mubr.f32.vlgmr.msra.gmra.mrb[22].mxu0 %v8797_v61  ;;  %v14160_v31 = vand.u32 4294901760, %v14152_v11 }
 0x63d   :  { %12100 = vmatpush3.msra.mxu0 %v8808_v52  ;;  %12101 = vmatprep.mubr.f32.mxu0 %v14098_v63  ;;  %v9212_v32 = vsel %vm2069_vm2, %v6233_v54, 0 }
 0x63e   :  { %v12731_v2 = vpop.eup %12730  ;;  %12104 = vmatprep.subr.mxu0 %v14115_v56  ;;  %v9304_v55 = vsub.f32 %v14152_v11, %v14160_v31  ;;  %v14181_v23 = vand.u32 4294901760, %v9212_v32 }
 0x63f   :  { %v6235_v19 = vmul.f32 %v12731_v2, %v14009_v7 }
 0x640   :  { %v6196_v4 = vpop.xlane.xlu1 %6195  ;;  %v9305_v15 = vand.u32 4294901760, %v9304_v55 }
 0x641   :  { %12732 = vrcp.f32 %v6196_v4  ;;  %12072 = vmatmul.mubr.f32.vlgmr.msra.gmra.mrb[14].mxu1 %v14113_v20  ;;  %v9704_v16 = vsel %vm2069_vm2, %v6235_v19, 0 }
 0x642   :  { %12075 = vmatpush3.msra.mxu1 %v14077_v26  ;;  %12076 = vmatprep.mubr.f32.mxu1 %v14124_v6  ;;  %v14165_v36 = vand.u32 4294901760, %v9704_v16 }
 0x643   :  { %12109 = vmatprep.subr.mxu1 %v14146_v53 }
 0x644   :  { %v6205_v7 = vpop.xlane.xlu1 %6204  ;;  %12102 = vmatmul.mubr.f32.vlgmr.msra.gmra.mrb[22].mxu0 %v14129_v43  ;;  %v14170_v57 = vsub.f32 %v9704_v16, %v14165_v36 }
 0x645   :  { %12734 = vrcp.f32 %v6205_v7  ;;  %12105 = vmatpush3.msra.mxu0 %v14115_v56  ;;  %12106 = vmatprep.mubr.f32.mxu0 %v14098_v63  ;;  %v9291_v63 = vsub.f32 %v9212_v32, %v14181_v23 }
 0x646   :  { %v9777_v26 = vand.u32 4294901760, %v14170_v57 }
 0x647   :  { %v9292_v42 = vand.u32 4294901760, %v9291_v63 }
 0x648   :  { %v2066_v10 = vpop.permute.xlu1 %2065  ;;  %v9778_v37 = vsub.f32 %v14170_v57, %v9777_v26 }
 0x649   :  { %v14183_v29 = vand.u32 4294901760, %v2066_v10  ;;  %12077 = vmatmul.mubr.f32.vlgmr.msra.gmra.mrb[14].mxu1 %v14113_v20  ;;  %v9293_v18 = vsub.f32 %v9291_v63, %v9292_v42 }
 0x64a   :  { %12110 = vmatpush3.msra.mxu1 %v14146_v53  ;;  %v9779_v46 = vand.u32 4294901760, %v9778_v37 }
 0x64b   :  { %v12733_v50 = vpop.eup %12732  ;;  %v9797_v0 = vsub.f32 %v2066_v10, %v14183_v29  ;;  %12114 = vmatprep.subr.mxu1 %v9305_v15  ;;  %12139 = vmatprep.subr.mxu0 %v14183_v29  ;;  %v9294_v17 = vand.u32 4294901760, %v9293_v18 }
 0x64c   :  { %v6231_v47 = vmul.f32 %v12733_v50, %v14017_v35  ;;  %12107 = vmatmul.mubr.f32.vlgmr.msra.gmra.mrb[22].mxu0 %v14129_v43 }
 0x64d   :  { %12140 = vmatpush3.msra.mxu0 %v14183_v29  ;;  %12141 = vmatprep.mubr.f32.mxu0 %v9779_v46  ;;  %v9798_v1 = vand.u32 4294901760, %v9797_v0 }
 0x64e   :  { %v9209_v30 = vsel %vm2069_vm2, %v6231_v47, 0 }
 0x64f   :  { %v12735_v25 = vpop.eup %12734  ;;  %v9799_v21 = vsub.f32 %v9797_v0, %v9798_v1  ;;  %v9280_v9 = vand.u32 4294901760, %v9209_v30 }
 0x650   :  { %v6237_v22 = vmul.f32 %v12735_v25, %v14021_v45 }
 0x651   :  { %v9800_v20 = vand.u32 4294901760, %v9799_v21  ;;  %v9281_v56 = vsub.f32 %v9209_v30, %v9280_v9 }
 0x652   :  { %v9707_v35 = vsel %vm2069_vm2, %v6237_v22, 0 }
 0x653   :  { %12144 = vmatprep.subr.mxu0 %v9800_v20  ;;  %v9282_v41 = vand.u32 4294901760, %v9281_v56  ;;  %v9785_v3 = vand.u32 4294901760, %v9707_v35 }
 0x655   :  { %v9283_v48 = vsub.f32 %v9281_v56, %v9282_v41  ;;  %v9786_v12 = vsub.f32 %v9707_v35, %v9785_v3 }
 0x657   :  { %v9284_v52 = vand.u32 4294901760, %v9283_v48  ;;  %v9787_v14 = vand.u32 4294901760, %v9786_v12 }
 0x659   :  { %12111 = vmatprep.mubr.f32.mxu1 %v9284_v52  ;;  %v9788_v27 = vsub.f32 %v9786_v12, %v9787_v14 }
 0x65a   :  { %12112 = vmatmul.mubr.f32.vlgmr.msra.gmra.mrb[16].mxu1 %v9294_v17 }
 0x65b   :  { %12115 = vmatpush3.msra.mxu1 %v9305_v15  ;;  %12116 = vmatprep.mubr.f32.mxu1 %v9280_v9  ;;  %v9789_v45 = vand.u32 4294901760, %v9788_v27 }
 0x65c   :  { %12119 = vmatprep.subr.mxu1 %v14152_v11 }
 0x65d   :  { %12142 = vmatmul.mubr.f32.vlgmr.msra.gmra.mrb[24].mxu0 %v9789_v45 }
 0x65e   :  { %12145 = vmatpush3.msra.mxu0 %v9800_v20  ;;  %12146 = vmatprep.mubr.f32.mxu0 %v14165_v36 }
 0x65f   :  { %12149 = vmatprep.subr.mxu0 %v9797_v0 }
 0x662   :  { %12117 = vmatmul.mubr.f32.vlgmr.msra.gmra.mrb[16].mxu1 %v14181_v23 }
 0x663   :  { %12120 = vmatpush3.msra.mxu1 %v14152_v11  ;;  %12121 = vmatprep.mubr.f32.mxu1 %v9281_v56 }
 0x664   :  { %12124 = vmatprep.subr.mxu1 %v14146_v53 }
 0x665   :  { %12147 = vmatmul.mubr.f32.vlgmr.msra.gmra.mrb[24].mxu0 %v9785_v3 }
 0x666   :  { %12150 = vmatpush3.msra.mxu0 %v9797_v0  ;;  %12151 = vmatprep.mubr.f32.mxu0 %v14170_v57 }
 0x667   :  { %12154 = vmatprep.subr.mxu0 %v14183_v29 }
 0x66a   :  { %12122 = vmatmul.mubr.f32.vlgmr.msra.gmra.mrb[16].mxu1 %v9291_v63 }
 0x66b   :  { %v14203_v6 = vpop.f32.mrb[10].mxu1  ;;  %12125 = vmatpush3.msra.mxu1 %v14146_v53  ;;  %12126 = vmatprep.mubr.f32.mxu1 %v9282_v41 }
 0x66c   :  { %v6723_v38 = vpop.f32.mrb[11].mxu1  ;;  %12129 = vmatprep.subr.mxu1 %v14160_v31 }
 0x66d   :  { %12152 = vmatmul.mubr.f32.vlgmr.msra.gmra.mrb[24].mxu0 %v9786_v12 }
 0x66e   :  { %12155 = vmatpush3.msra.mxu0 %v14183_v29  ;;  %12156 = vmatprep.mubr.f32.mxu0 %v9777_v26 }
 0x66f   :  { %12159 = vmatprep.subr.mxu0 %v9798_v1 }
 0x672   :  { %12127 = vmatmul.mubr.f32.vlgmr.msra.gmra.mrb[16].mxu1 %v9292_v42 }
 0x673   :  { %12130 = vmatpush3.msra.mxu1 %v14160_v31  ;;  %12131 = vmatprep.mubr.f32.mxu1 %v9280_v9 }
 0x674   :  { %12134 = vmatprep.subr.mxu1 %v14146_v53 }
 0x675   :  { %12157 = vmatmul.mubr.f32.vlgmr.msra.gmra.mrb[24].mxu0 %v9787_v14 }
 0x676   :  { %12160 = vmatpush3.msra.mxu0 %v9798_v1  ;;  %12161 = vmatprep.mubr.f32.mxu0 %v14165_v36 }
 0x677   :  { %12164 = vmatprep.subr.mxu0 %v14183_v29 }
 0x67a   :  { %12132 = vmatmul.mubr.f32.vlgmr.msra.gmra.mrb[16].mxu1 %v14181_v23 }
 0x67b   :  { %12135 = vmatpush3.msra.mxu1 %v14146_v53  ;;  %12136 = vmatprep.mubr.f32.mxu1 %v9280_v9 }
 0x67d   :  { %12162 = vmatmul.mubr.f32.vlgmr.msra.gmra.mrb[24].mxu0 %v9785_v3 }
 0x67e   :  { %12165 = vmatpush3.msra.mxu0 %v14183_v29  ;;  %12166 = vmatprep.mubr.f32.mxu0 %v14165_v36 }
 0x682   :  { %12137 = vmatmul.mubr.f32.vlgmr.msra.gmra.mrb[16].mxu1 %v14181_v23 }
 0x685   :  { %12167 = vmatmul.mubr.f32.vlgmr.msra.gmra.mrb[24].mxu0 %v9785_v3 }
 0x697   :  { %v11988_v39 = vpop.f32.mrb[18].mxu0 }
 0x698   :  { %v7218_v8 = vpop.f32.mrb[19].mxu0 }
 0x6df   :  { %v12018_v28 = vpop.f32.mrb[12].mxu1 }
 0x6e0   :  { %10204 = vrot.lane.b32.xlu1 %v12018_v28, %s13033_s21  ;;  %v7713_v24 = vpop.f32.mrb[13].mxu1 }
 0x6e4   :  { %10202 = vrot.lane.b32.xlu1 %v7713_v24, %s13033_s21  ;;  %v10335_v24 = vld [vmem:[#allocation16 + $0x10] sm:$0xff] }
 0x6e7   :  { %v12048_v40 = vpop.f32.mrb[20].mxu0 }
 0x6e8   :  { %v8208_v43 = vpop.f32.mrb[21].mxu0  ;;  %10208 = vrot.lane.b32.xlu1 %v12048_v40, %s13033_s21  ;;  %v10336_v40 = vld [vmem:[#allocation16 + $0x18] sm:$0xff] }
 0x6e9   :  { %10206 = vrot.lane.b32.xlu0 %v8208_v43, %s13033_s21  ;;  %v10356_v43 = vand.u32 4294901760, %v10335_v24 }
 0x71c   :  { %v12078_v49 = vpop.f32.mrb[14].mxu1 }
 0x71d   :  { %10220 = vrot.lane.b32.xlu1 %v12078_v49, %s13046_s25  ;;  %v8703_v34 = vpop.f32.mrb[15].mxu1  ;;  %v10359_v49 = vand.u32 4294901760, %v10336_v40 }
 0x71e   :  { %10218 = vrot.lane.b32.xlu0 %v8703_v34, %s13046_s25 }
 0x71f   :  { %v12108_v51 = vpop.f32.mrb[22].mxu0  ;;  %v14264_v34 = vpack.c.bf16 %v10359_v49, %v10356_v43 }
 0x720   :  { %v9198_v60 = vpop.f32.mrb[23].mxu0 }
 0x721   :  { %10224 = vrot.lane.b32.xlu1 %v12108_v51, %s13046_s25 }
 0x722   :  { %10222 = vrot.lane.b32.xlu0 %v9198_v60, %s13046_s25 }
 0x752   :  { %v10205_v59 = vpop.permute.xlu1 %10204 }
 0x753   :  { %v10247_v4 = vsel %vm2069_vm2, %v14203_v6, %v10205_v59  ;;  %v10333_v6 = vld [vmem:[#allocation16] sm:$0xff]  ;;  %v10474_v59 = vsub.f32 %v10335_v24, %v10356_v43 }
 0x755   :  { %v12138_v61 = vpop.f32.mrb[16].mxu1 }
 0x756   :  { %10236 = vrot.lane.b32.xlu1 %v12138_v61, %s13047_s27  ;;  %v9693_v44 = vpop.f32.mrb[17].mxu1  ;;  %v10203_v58 = vpop.permute.xlu1 %10202 }
 0x757   :  { %10234 = vrot.lane.b32.xlu0 %v9693_v44, %s13047_s27  ;;  %v10246_v54 = vsel %vm2069_vm2, %v6723_v38, %v10203_v58  ;;  %v10334_v38 = vld [vmem:[#allocation16 + $0x8] sm:$0xff]  ;;  %v10481_v58 = vsub.f32 %v10336_v40, %v10359_v49 }
 0x758   :  { %v12168_v13 = vpop.f32.mrb[24].mxu0 }
 0x759   :  { %v10188_v5 = vpop.f32.mrb[25].mxu0 }
 0x75a   :  { %10240 = vrot.lane.b32.xlu1 %v12168_v13, %s13047_s27  ;;  %v10209_v62 = vpop.permute.xlu1 %10208 }
 0x75b   :  { %10238 = vrot.lane.b32.xlu0 %v10188_v5, %s13047_s27  ;;  %v10207_v53 = vpop.permute.xlu0 %10206  ;;  %v10249_v15 = vsel %vm2069_vm2, %v11988_v39, %v10209_v62  ;;  %v10350_v39 = vand.u32 4294901760, %v10333_v6 }
 0x75c   :  { %v10248_v10 = vsel %vm2069_vm2, %v7218_v8, %v10207_v53  ;;  %v10353_v8 = vand.u32 4294901760, %v10334_v38 }
 0x75d   :  { %v10460_v51 = vsub.f32 %v10333_v6, %v10350_v39 }
 0x75e   :  { %v14260_v28 = vpack.c.bf16 %v10353_v8, %v10350_v39  ;;  %v10467_v60 = vsub.f32 %v10334_v38, %v10353_v8 }
 0x75f   :  { %v10461_v61 = vand.u32 4294901760, %v10460_v51 }
 0x760   :  { %12374 = vmatprep.subr.bf16.mxu1 %v14260_v28  ;;  %v10468_v44 = vand.u32 4294901760, %v10467_v60 }
 0x761   :  { %12376 = vmatpush3.bf16.msra.mxu1 %v14260_v28  ;;  %v10462_v13 = vsub.f32 %v10460_v51, %v10461_v61 }
 0x762   :  { %12378 = vmatprep.subr.bf16.mxu1 %v14264_v34  ;;  %v10469_v5 = vsub.f32 %v10467_v60, %v10468_v44 }
 0x763   :  { %v10463_v62 = vand.u32 4294901760, %v10462_v13 }
 0x764   :  { %v10470_v53 = vand.u32 4294901760, %v10469_v5 }
 0x765   :  { %12380 = vmatpush3.bf16.msra.mxu1 %v14264_v34 }
 0x78f   :  { %v10221_v33 = vpop.permute.xlu1 %10220 }
 0x790   :  { %v10219_v11 = vpop.permute.xlu0 %10218  ;;  %v10252_v31 = vsel %vm10250_vm3, %v10247_v4, %v10221_v33  ;;  %v10475_v33 = vand.u32 4294901760, %v10474_v59 }
 0x791   :  { %v10251_v36 = vsel %vm10250_vm3, %v10246_v54, %v10219_v11  ;;  %v10482_v11 = vand.u32 4294901760, %v10481_v58 }
 0x793   :  { %v10225_v2 = vpop.permute.xlu1 %10224  ;;  %v10483_v4 = vsub.f32 %v10481_v58, %v10482_v11 }
 0x794   :  { %v10223_v19 = vpop.permute.xlu0 %10222  ;;  %v10254_v50 = vsel %vm10250_vm3, %v10249_v15, %v10225_v2  ;;  %v14268_v2 = vpack.c.bf16 %v10470_v53, %v10463_v62 }
 0x795   :  { %v10253_v37 = vsel %vm10250_vm3, %v10248_v10, %v10223_v19  ;;  %v10476_v19 = vsub.f32 %v10474_v59, %v10475_v33 }
 0x796   :  { %12382 = vmatprep.subr.bf16.mxu1 %v14268_v2 }
 0x797   :  { %v10477_v54 = vand.u32 4294901760, %v10476_v19 }
 0x7c8   :  { %v10237_v16 = vpop.permute.xlu1 %10236 }
 0x7c9   :  { %v10235_v7 = vpop.permute.xlu0 %10234  ;;  %v10256_v57 = vsel %vm1485_vm1, %v10252_v31, %v10237_v16  ;;  %v10484_v31 = vand.u32 4294901760, %v10483_v4 }
 0x7ca   :  { %v10264_v55 = vsel %vm188_vm0, %v10256_v57, 0.0  ;;  %v10255_v32 = vsel %vm1485_vm1, %v10251_v36, %v10235_v7  ;;  %v14273_v36 = vpack.c.bf16 %v10467_v60, %v10460_v51  ;;  %v14275_v7 = vpack.c.bf16 %v10481_v58, %v10474_v59 }
 0x7cb   :  { %10265 = vadd.xlane.f32.xlu1 %v10264_v55  ;;  %v10261_v26 = vsel %vm188_vm0, %v10255_v32, 0.0  ;;  %v14271_v16 = vpack.c.bf16 %v10484_v31, %v10477_v54  ;;  %v14279_v55 = vpack.c.bf16 %v10482_v11, %v10475_v33 }
 0x7cc   :  { %10262 = vadd.xlane.f32.xlu0 %v10261_v26  ;;  %v10241_v23 = vpop.permute.xlu1 %10240 }
 0x7cd   :  { %v10239_v29 = vpop.permute.xlu0 %10238  ;;  %v10258_v47 = vsel %vm1485_vm1, %v10254_v50, %v10241_v23 }
 0x7ce   :  { %v10257_v46 = vsel %vm1485_vm1, %v10253_v37, %v10239_v29  ;;  %v10270_v63 = vsel %vm188_vm0, %v10258_v47, 0.0 }
 0x7cf   :  { %v10267_v0 = vsel %vm188_vm0, %v10257_v46, 0.0 }
 0x7d0   :  { %10268 = vadd.xlane.f32.xlu0 %v10267_v0 }
 0x7d4   :  { %10271 = vadd.xlane.f32.xlu0 %v10270_v63 }
 0x858   :  { %v10266_v1 = vpop.xlane.xlu1 %10265 }
 0x859   :  { %v10274_v30 = vmul.f32 0.03125, %v10266_v1  ;;  %v10263_v25 = vpop.xlane.xlu0 %10262 }
 0x85a   :  { %v10273_v21 = vmul.f32 0.03125, %v10263_v25 }
 0x85b   :  { %v14240_v9 = vsub.f32 %v10256_v57, %v10274_v30  ;;  %v14277_v57 = vpack.c.bf16 %v10468_v44, %v10461_v61  ;;  %v11033_v30 = vld [vmem:[#allocation17] ss:$0 sm:$0xff] }
 0x85c   :  { %v14242_v22 = vsub.f32 %v10255_v32, %v10273_v21 }
 0x85d   :  { %v10269_v42 = vpop.xlane.xlu0 %10268  ;;  %v10282_v20 = vmul.f32 %v14240_v9, %v14240_v9 }
 0x85e   :  { %v10275_v56 = vmul.f32 0.03125, %v10269_v42  ;;  %v10281_v35 = vmul.f32 %v14242_v22, %v14242_v22 }
 0x85f   :  { %v10288_v41 = vsel %vm188_vm0, %v10282_v20, 0.0  ;;  %v11034_v20 = vld [vmem:[#allocation19] ss:$0 sm:$0xff] }
 0x860   :  { %v14249_v3 = vsub.f32 %v10257_v46, %v10275_v56  ;;  %10289 = vadd.xlane.f32.xlu1 %v10288_v41  ;;  %v10285_v18 = vsel %vm188_vm0, %v10281_v35, 0.0 }
 0x861   :  { %10286 = vadd.xlane.f32.xlu0 %v10285_v18  ;;  %v10272_v48 = vpop.xlane.xlu0 %10271 }
 0x862   :  { %v10276_v12 = vmul.f32 0.03125, %v10272_v48  ;;  %v10283_v52 = vmul.f32 %v14249_v3, %v14249_v3 }
 0x864   :  { %v14254_v14 = vsub.f32 %v10258_v47, %v10276_v12  ;;  %v10291_v17 = vsel %vm188_vm0, %v10283_v52, 0.0 }
 0x865   :  { %10292 = vadd.xlane.f32.xlu0 %v10291_v17 }
 0x866   :  { %v10284_v27 = vmul.f32 %v14254_v14, %v14254_v14 }
 0x868   :  { %v10294_v45 = vsel %vm188_vm0, %v10284_v27, 0.0 }
 0x869   :  { %10295 = vadd.xlane.f32.xlu1 %v10294_v45 }
 0x8ed   :  { %v10290_v32 = vpop.xlane.xlu1 %10289 }
 0x8ee   :  { %v10298_v26 = vmul.f32 0.03125, %v10290_v32  ;;  %v10287_v10 = vpop.xlane.xlu0 %10286 }
 0x8ef   :  { %v10297_v37 = vmul.f32 0.03125, %v10287_v10 }
 0x8f0   :  { %v10302_v23 = vadd.f32 1e-05, %v10298_v26 }
 0x8f1   :  { %v10301_v29 = vadd.f32 1e-05, %v10297_v37 }
 0x8f2   :  { %12736 = vrsqrt.f32 %v10302_v23  ;;  %v10293_v15 = vpop.xlane.xlu0 %10292 }
 0x8f3   :  { %12738 = vrsqrt.f32 %v10301_v29  ;;  %v10299_v46 = vmul.f32 0.03125, %v10293_v15 }
 0x8f5   :  { %v10303_v50 = vadd.f32 1e-05, %v10299_v46 }
 0x8f6   :  { %v10296_v0 = vpop.xlane.xlu1 %10295 }
 0x8f7   :  { %12740 = vrsqrt.f32 %v10303_v50  ;;  %v10300_v47 = vmul.f32 0.03125, %v10296_v0 }
 0x8f9   :  { %v10304_v63 = vadd.f32 1e-05, %v10300_v47 }
 0x8fb   :  { %12742 = vrsqrt.f32 %v10304_v63 }
 0x8fc   :  { %v12737_v1 = vpop.eup %12736 }
 0x8fd   :  { %v12739_v25 = vpop.eup %12738  ;;  %v10310_v21 = vmul.f32 %v12737_v1, %v14240_v9 }
 0x8fe   :  { %v10309_v42 = vmul.f32 %v12739_v25, %v14242_v22 }
 0x8ff   :  { %v10320_v56 = vmul.f32 %v11033_v30, %v10310_v21 }
 0x900   :  { %v10319_v35 = vmul.f32 %v11033_v30, %v10309_v42 }
 0x901   :  { %v12741_v41 = vpop.eup %12740  ;;  %v14283_v18 = vadd.f32 %v11034_v20, %v10320_v56 }
 0x902   :  { %v10311_v48 = vmul.f32 %v12741_v41, %v14249_v3  ;;  %v14286_v12 = vadd.f32 %v11034_v20, %v10319_v35 }
 0x903   :  { %v10341_v52 = vsel %vm188_vm0, %v14283_v18, 0 }
 0x904   :  { %v10321_v17 = vmul.f32 %v11033_v30, %v10311_v48  ;;  %v10338_v27 = vsel %vm188_vm0, %v14286_v12, 0  ;;  %v14292_v9 = vand.u32 4294901760, %v10341_v52 }
 0x905   :  { %v12743_v22 = vpop.eup %12742  ;;  %v14294_v45 = vand.u32 4294901760, %v10338_v27 }
 0x906   :  { %v10312_v6 = vmul.f32 %v12743_v22, %v14254_v14  ;;  %v10429_v38 = vsub.f32 %v10341_v52, %v14292_v9  ;;  %v14298_v39 = vadd.f32 %v11034_v20, %v10321_v17 }
 0x907   :  { %v10419_v3 = vsub.f32 %v10338_v27, %v14294_v45 }
 0x908   :  { %v10322_v8 = vmul.f32 %v11033_v30, %v10312_v6  ;;  %v10430_v24 = vand.u32 4294901760, %v10429_v38  ;;  %v10344_v40 = vsel %vm188_vm0, %v14298_v39, 0 }
 0x909   :  { %v10420_v43 = vand.u32 4294901760, %v10419_v3  ;;  %v10438_v49 = vand.u32 4294901760, %v10344_v40 }
 0x90a   :  { %v10431_v51 = vsub.f32 %v10429_v38, %v10430_v24  ;;  %v14303_v60 = vadd.f32 %v11034_v20, %v10322_v8 }
 0x90b   :  { %v10421_v61 = vsub.f32 %v10419_v3, %v10420_v43  ;;  %v10439_v44 = vsub.f32 %v10344_v40, %v10438_v49 }
 0x90c   :  { %v10347_v14 = vsel %vm188_vm0, %v14303_v60, 0  ;;  %v10432_v58 = vand.u32 4294901760, %v10431_v51 }
 0x90d   :  { %v10422_v13 = vand.u32 4294901760, %v10421_v61  ;;  %v10440_v5 = vand.u32 4294901760, %v10439_v44  ;;  %v10448_v59 = vand.u32 4294901760, %v10347_v14 }
 0x90f   :  { %12177 = vmatprep.mubr.f32.mxu1 %v10422_v13  ;;  %v10441_v62 = vsub.f32 %v10439_v44, %v10440_v5  ;;  %v10449_v53 = vsub.f32 %v10347_v14, %v10448_v59 }
 0x910   :  { %12178 = vmatmul.mubr.f32.vlgmr.msra.gmra.mrb[18].mxu1 %v10432_v58 }
 0x911   :  { %v10442_v33 = vand.u32 4294901760, %v10441_v62  ;;  %12384 = vmatpush3.bf16.msra.mxu1 %v14268_v2  ;;  %v10450_v11 = vand.u32 4294901760, %v10449_v53 }
 0x912   :  { %12386 = vmatprep.subr.bf16.mxu1 %v14271_v16 }
 0x913   :  { %12180 = vmatprep.mubr.f32.mxu1 %v10442_v33  ;;  %v10451_v19 = vsub.f32 %v10449_v53, %v10450_v11 }
 0x915   :  { %v10452_v4 = vand.u32 4294901760, %v10451_v19  ;;  %12388 = vmatpush3.bf16.msra.mxu1 %v14271_v16 }
 0x916   :  { %12390 = vmatprep.subr.bf16.mxu1 %v14273_v36 }
 0x917   :  { %12181 = vmatmul.mubr.f32.gmra.mrb[20].mxu1 %v10452_v4 }
 0x918   :  { %12191 = vmatprep.mubr.f32.mxu1 %v14294_v45 }
 0x91b   :  { %12192 = vmatmul.mubr.f32.vlgmr.msra.gmra.mrb[18].mxu1 %v14292_v9 }
 0x91c   :  { %12194 = vmatprep.mubr.f32.mxu1 %v10438_v49  ;;  %12392 = vmatpush3.bf16.msra.mxu1 %v14273_v36 }
 0x91d   :  { %12394 = vmatprep.subr.bf16.mxu1 %v14275_v7 }
 0x91f   :  { %12195 = vmatmul.mubr.f32.gmra.mrb[20].mxu1 %v10448_v59 }
 0x920   :  { %12396 = vmatpush3.bf16.msra.mxu1 %v14275_v7  ;;  %12205 = vmatprep.mubr.f32.mxu1 %v10419_v3 }
 0x921   :  { %12398 = vmatprep.subr.bf16.mxu1 %v14260_v28 }
 0x923   :  { %12206 = vmatmul.mubr.f32.vlgmr.msra.gmra.mrb[18].mxu1 %v10429_v38 }
 0x924   :  { %12208 = vmatprep.mubr.f32.mxu1 %v10439_v44  ;;  %12400 = vmatpush3.bf16.msra.mxu1 %v14260_v28 }
 0x925   :  { %12402 = vmatprep.subr.bf16.mxu1 %v14264_v34 }
 0x927   :  { %12209 = vmatmul.mubr.f32.gmra.mrb[20].mxu1 %v10449_v53 }
 0x928   :  { %12404 = vmatpush3.bf16.msra.mxu1 %v14264_v34  ;;  %12219 = vmatprep.mubr.f32.mxu1 %v10420_v43 }
 0x929   :  { %12406 = vmatprep.subr.bf16.mxu1 %v14277_v57 }
 0x92b   :  { %12220 = vmatmul.mubr.f32.vlgmr.msra.gmra.mrb[18].mxu1 %v10430_v24 }
 0x92c   :  { %12222 = vmatprep.mubr.f32.mxu1 %v10440_v5  ;;  %12408 = vmatpush3.bf16.msra.mxu1 %v14277_v57 }
 0x92d   :  { %12410 = vmatprep.subr.bf16.mxu1 %v14279_v55 }
 0x92f   :  { %12223 = vmatmul.mubr.f32.gmra.mrb[20].mxu1 %v10450_v11 }
 0x930   :  { %12412 = vmatpush3.bf16.msra.mxu1 %v14279_v55  ;;  %12233 = vmatprep.mubr.f32.mxu1 %v14294_v45 }
 0x931   :  { %12414 = vmatprep.subr.bf16.mxu1 %v14260_v28 }
 0x933   :  { %12234 = vmatmul.mubr.f32.vlgmr.msra.gmra.mrb[18].mxu1 %v14292_v9 }
 0x934   :  { %12236 = vmatprep.mubr.f32.mxu1 %v10438_v49  ;;  %12416 = vmatpush3.bf16.msra.mxu1 %v14260_v28 }
 0x935   :  { %12418 = vmatprep.subr.bf16.mxu1 %v14264_v34 }
 0x937   :  { %12237 = vmatmul.mubr.f32.gmra.mrb[20].mxu1 %v10448_v59 }
 0x938   :  { %12420 = vmatpush3.bf16.msra.mxu1 %v14264_v34  ;;  %12247 = vmatprep.mubr.f32.mxu1 %v14294_v45 }
 0x93b   :  { %12248 = vmatmul.mubr.f32.vlgmr.msra.gmra.mrb[18].mxu1 %v14292_v9 }
 0x93c   :  { %12250 = vmatprep.mubr.f32.mxu1 %v10438_v49 }
 0x93f   :  { %12251 = vmatmul.mubr.f32.gmra.mrb[20].mxu1 %v10448_v59 }
 0xa0e   :  { %v12249_v2 = vpop.f32.mrb[18].mxu1 }
 0xa0f   :  { %v10968_v54 = vmul.f32 0.70710677, %v12249_v2  ;;  %v10941_v31 = vpop.f32.mrb[19].mxu1  ;;  %v10964_v32 = vmul.f32 0.5, %v12249_v2 }
 0xa10   :  { %v10967_v16 = vmul.f32 0.70710677, %v10941_v31  ;;  %v10963_v10 = vmul.f32 0.5, %v10941_v31 }
 0xa11   :  { %12744 = verf.f32 %v10968_v54 }
 0xa12   :  { %12746 = verf.f32 %v10967_v16  ;;  %v12252_v36 = vpop.f32.mrb[20].mxu1 }
 0xa13   :  { %v10970_v7 = vmul.f32 0.70710677, %v12252_v36  ;;  %v10953_v28 = vpop.f32.mrb[21].mxu1  ;;  %v10966_v0 = vmul.f32 0.5, %v12252_v36 }
 0xa14   :  { %v10969_v57 = vmul.f32 0.70710677, %v10953_v28  ;;  %v10965_v1 = vmul.f32 0.5, %v10953_v28 }
 0xa15   :  { %12748 = verf.f32 %v10970_v7 }
 0xa16   :  { %12750 = verf.f32 %v10969_v57 }
 0xa1b   :  { %v12745_v55 = vpop.eup %12744 }
 0xa1c   :  { %v12747_v34 = vpop.eup %12746  ;;  %v10976_v26 = vadd.f32 1.0, %v12745_v55 }
 0xa1d   :  { %v10975_v37 = vadd.f32 1.0, %v12747_v34 }
 0xa1e   :  { %v10980_v23 = vmul.f32 %v10976_v26, %v10964_v32 }
 0xa1f   :  { %v12749_v29 = vpop.eup %12748  ;;  %v10979_v15 = vmul.f32 %v10975_v37, %v10963_v10 }
 0xa20   :  { %v12751_v46 = vpop.eup %12750  ;;  %v10984_v50 = vadd.f32 %v10980_v23, %v14283_v18  ;;  %v10978_v47 = vadd.f32 1.0, %v12749_v29 }
 0xa21   :  { %v10983_v63 = vadd.f32 %v10979_v15, %v14286_v12  ;;  %v10977_v30 = vadd.f32 1.0, %v12751_v46 }
 0xa22   :  { %10988 = vst.msk [vmem:[#allocation20 + $0x8] sm:$0xff] %vm188_vm0, %v10984_v50  ;;  %v10982_v25 = vmul.f32 %v10978_v47, %v10966_v0 }
 0xa23   :  { %10987 = vst.msk [vmem:[#allocation20] sm:$0xff] %vm188_vm0, %v10983_v63  ;;  %v10981_v21 = vmul.f32 %v10977_v30, %v10965_v1 }
 0xa24   :  { %v10986_v42 = vadd.f32 %v10982_v25, %v14303_v60 }
 0xa25   :  { %v10985_v20 = vadd.f32 %v10981_v21, %v14298_v39 }
 0xa26   :  { %10990 = vst.msk [vmem:[#allocation20 + $0x18] sm:$0xff] %vm188_vm0, %v10986_v42 }
 0xa27   :  { %10989 = vst.msk [vmem:[#allocation20 + $0x10] sm:$0xff] %vm188_vm0, %v10985_v20 }
 0xa28   :  { %13005 = shalt.err (!%p13002_p8)
}
 0xa29   :  { %s13006_s4 = scalar_lea.hbm %s14368_s13, 512 }
 0xa2a   :  { %p13007_p9 = scmp.ne.s32.totalorder %s14368_s13, %s13006_s4  ;;  %p13010_p10 = scmp.lt.u32.totalorder %s13006_s4, %s14368_s13 }
 0xa2c   :  { %p13012_p11 = pnand %p13010_p10, %p13007_p9 }
 0xa2e   :  { %13015 = shalt.err (!%p13012_p11)
}
 0xa2f   :  { %11002 = dma.vmem_to_hbm [thread:$0]  %s10997_s0, 512, %s14368_s13, [#allocation4], %s13032_s20, %s13032_s20, %s13033_s21  }
 0xa30   :  { %13028 = dma.done.wait [#allocation4], 512  }
 0xa31   :  { %13029 = vsyncadd [#allocation4], 4294966784 }
 0xa32   :  { %11006 = vsyncpa [#allocation3], 1 }
 0xa33   :  { %11007 = vsyncpa [#allocation6], 1 }
 0xa34   :  { %11008 = vsyncpa [#allocation9], 1 }
 0xa35   :  { %11009 = vsyncpa [#allocation12], 1 }
 0xa36   :  { %11010 = vsyncpa [#allocation15], 1 }
 0xa37   :  { %11011 = vsyncpa [#allocation18], 1 }
 0xa38   :  { %11012 = vsyncpa [#allocation4], 1 }

</bundles_post_ra>
